<compile_context>
chip_gen: v6e
topology: v6e:2x2x1
jax: 0.10.0
libtpu: 0.0.40
codegen_flags: <defaults>
</compile_context>

<pallas_src>
import math

import jax
import jax.numpy as jnp
from jax.experimental import pallas as pl
from jax.experimental.pallas import tpu as pltpu

# ---------------- model hyper-parameters (the "args") -----------------------
D_MODEL = 32
N_HEADS = 4
D_K = 8
D_V = 8
D_FF = 64
N_LAYERS = 6
LN_EPS = 1e-5
NEG_INF = -1e30


# ---------------------------- helpers (in-kernel) ---------------------------
def _layer_norm(x):
    """LayerNorm over last axis, weight=1, bias=0, eps=1e-5 (PyTorch default)."""
    mean = jnp.mean(x, axis=-1, keepdims=True)
    xc = x - mean
    var = jnp.mean(xc * xc, axis=-1, keepdims=True)   # biased variance (matches PyTorch LN)
    return xc * jax.lax.rsqrt(var + LN_EPS)


# ------------------------------ fused kernel --------------------------------
def encoder_kernel(x_ref, pe_ref, bias_ref, wq_ref, wk_ref, wv_ref,
                   wo_ref, w1_ref, w2_ref, o_ref):
    """Whole encoder in one kernel invocation.

    Shapes (all fully VMEM-resident):
      x_ref, pe_ref, o_ref : [S*B, D]        (activation flattened row-major (s, b))
      bias_ref             : [S*B, S*B]      (0 inside each attention batch, -1e30 outside)
      wq/wk/wv_ref         : [L, D, H*DK]
      wo_ref               : [L, H*DV, D]
      w1_ref               : [L, D, D_FF]
      w2_ref               : [L, D_FF, D]
    """
    scale = 1.0 / math.sqrt(D_K)

    # Positional encoding (pe pre-broadcast wrapper-side) -- done once.
    act = x_ref[...] + pe_ref[...]                  # [SB, D]
    bias = bias_ref[...]                            # [SB, SB] block-diagonal mask (hoisted)

    # Static unrolled layer loop: N_LAYERS is a compile-time constant, so this is
    # equivalent to lax.fori_loop(..., unroll=True) with fully static weight indices.
    for l in range(N_LAYERS):
        wq = wq_ref[l]                              # [D, H*DK]
        wk = wk_ref[l]
        wv = wv_ref[l]
        wo = wo_ref[l]                              # [H*DV, D]
        w1 = w1_ref[l]                              # [D, D_FF]
        w2 = w2_ref[l]                              # [D_FF, D]

        # ---- QKV projections: three full-width [SB, D] @ [D, H*DK] matmuls.
        q = jnp.dot(act, wq, preferred_element_type=jnp.float32)   # [SB, H*DK]
        k = jnp.dot(act, wk, preferred_element_type=jnp.float32)   # [SB, H*DK]
        v = jnp.dot(act, wv, preferred_element_type=jnp.float32)   # [SB, H*DV]

        # ---- per-head attention via full [SB, SB] gram + block-diagonal mask.
        # The mask restricts the softmax (and hence the context matmul, since the
        # masked probabilities are exactly 0) to rows sharing the same attention
        # batch index s -- identical to the reference per-batch attention.
        ctx_heads = []
        for h in range(N_HEADS):
            qh = q[:, h * D_K:(h + 1) * D_K]        # [SB, DK]
            kh = k[:, h * D_K:(h + 1) * D_K]        # [SB, DK]
            vh = v[:, h * D_V:(h + 1) * D_V]        # [SB, DV]

            s = jnp.einsum('nk,mk->nm', qh, kh,
                           preferred_element_type=jnp.float32) * scale + bias   # [SB, SB]
            s = s - jnp.max(s, axis=-1, keepdims=True)
            p = jnp.exp(s)
            att = p / jnp.sum(p, axis=-1, keepdims=True)            # exact divide

            ctx_heads.append(jnp.dot(att, vh,
                                     preferred_element_type=jnp.float32))       # [SB, DV]

        # heads concatenated once (h outer, matching .view(batch,-1,H*DV)),
        # then ONE output projection against the un-split W_O.
        ctx = jnp.concatenate(ctx_heads, axis=-1)                    # [SB, H*DV]
        attn_out = jnp.dot(ctx, wo, preferred_element_type=jnp.float32)  # [SB, D]

        # residual + LayerNorm
        h1 = _layer_norm(attn_out + act)

        # ---- position-wise feed-forward (two full-width matmuls)
        f = jnp.dot(h1, w1, preferred_element_type=jnp.float32)     # [SB, D_FF]
        f = jnp.maximum(f, 0.0)
        f = jnp.dot(f, w2, preferred_element_type=jnp.float32)      # [SB, D]

        act = _layer_norm(f + h1)

    o_ref[...] = act.astype(o_ref.dtype)


# ------------------------------ host wrapper ---------------------------------
def encoder_forward(x, pe, wq, wk, wv, wo, w1, w2):
    """x: [S, B, D]; pe: [S, 1, D]; stacked per-layer weights on leading axis [L, ...]."""
    S, B, D = x.shape
    SB = S * B

    # Flatten the position-wise axes wrapper-side (free row-major collapse).
    x2 = x.reshape(SB, D)
    pe2 = jnp.broadcast_to(pe, (S, B, D)).reshape(SB, D)

    # Block-diagonal additive mask: row n=(s,t) may only attend to columns m=(s,u).
    groups = jnp.arange(SB, dtype=jnp.int32) // B
    attn_bias = jnp.where(groups[:, None] == groups[None, :], 0.0, NEG_INF
                          ).astype(jnp.float32)                      # [SB, SB]

    vmem = pl.BlockSpec(memory_space=pltpu.MemorySpace.VMEM)         # whole array in VMEM

    out2 = pl.pallas_call(
        encoder_kernel,
        out_shape=jax.ShapeDtypeStruct((SB, D), x.dtype),
        in_specs=[vmem] * 9,
        out_specs=vmem,
        input_output_aliases={0: 0},        # activation carried in the x/out buffer
    )(x2, pe2, attn_bias, wq, wk, wv, wo, w1, w2)

    return out2.reshape(S, B, D)


def make_positional_encoding(max_len, d_model):
    position = jnp.arange(max_len, dtype=jnp.float32)[:, None]            # [L, 1]
    div_term = jnp.exp(jnp.arange(0, d_model, 2, dtype=jnp.float32)
                       * (-math.log(10000.0) / d_model))                  # [D/2]
    pe = jnp.zeros((max_len, d_model), dtype=jnp.float32)
    pe = pe.at[:, 0::2].set(jnp.sin(position * div_term))
    pe = pe.at[:, 1::2].set(jnp.cos(position * div_term))
    return pe[:, None, :]   # [max_len, 1, d_model] (== pe.unsqueeze(0).transpose(0,1))


def init_stacked_params(key):
    """nn.Linear(no bias) init: U(-1/sqrt(fan_in), 1/sqrt(fan_in)).
    Weights stored transposed ([in, out]) so the kernel does x @ W directly,
    stacked over the layer axis.  Q/K/V output columns are head-major (h, k),
    matching .view(batch, -1, n_heads, d_k)."""
    ks = jax.random.split(key, 6)

    def lin(k, fan_in, fan_out):
        bound = 1.0 / math.sqrt(fan_in)
        return jax.random.uniform(k, (N_LAYERS, fan_in, fan_out), jnp.float32,
                                  minval=-bound, maxval=bound)

    wq = lin(ks[0], D_MODEL, N_HEADS * D_K)     # [L, D, H*DK]
    wk = lin(ks[1], D_MODEL, N_HEADS * D_K)
    wv = lin(ks[2], D_MODEL, N_HEADS * D_V)
    wo = lin(ks[3], N_HEADS * D_V, D_MODEL)     # [L, H*DV, D]  (un-split)
    w1 = lin(ks[4], D_MODEL, D_FF)
    w2 = lin(ks[5], D_FF, D_MODEL)
    return wq, wk, wv, wo, w1, w2


# ----------------------------------- main ------------------------------------
if __name__ == "__main__":
    SEQ_LEN = 8   # dim 0 of the input (positional-encoding axis / attention batch)
    BATCH = 2     # dim 1 of the input (attention sequence axis)

    key = jax.random.PRNGKey(0)
    k_x, k_p = jax.random.split(key)

    x = jax.random.normal(k_x, (SEQ_LEN, BATCH, D_MODEL), dtype=jnp.float32)
    pe = make_positional_encoding(max_len=5000, d_model=D_MODEL)[:SEQ_LEN]  # [S, 1, D]

    wq, wk, wv, wo, w1, w2 = init_stacked_params(k_p)

    fwd = jax.jit(encoder_forward)
    out = jax.block_until_ready(fwd(x, pe, wq, wk, wv, wo, w1, w2))

    assert out.shape == (SEQ_LEN, BATCH, D_MODEL)
    assert out.dtype == jnp.float32
    assert bool(jnp.all(jnp.isfinite(out)))
    print("KERNEL_OK")
</pallas_src>

<mosaic_0001>
module attributes {stable_mosaic.version = 11 : i64} {
  func.func @encoder_kernel(%arg0: memref<16x32xf32, #tpu.memory_space<vmem>>, %arg1: memref<16x32xf32, #tpu.memory_space<vmem>>, %arg2: memref<16x16xf32, #tpu.memory_space<vmem>>, %arg3: memref<6x32x32xf32, #tpu.memory_space<vmem>>, %arg4: memref<6x32x32xf32, #tpu.memory_space<vmem>>, %arg5: memref<6x32x32xf32, #tpu.memory_space<vmem>>, %arg6: memref<6x32x32xf32, #tpu.memory_space<vmem>>, %arg7: memref<6x32x64xf32, #tpu.memory_space<vmem>>, %arg8: memref<6x64x32xf32, #tpu.memory_space<vmem>>, %arg9: memref<16x32xf32, #tpu.memory_space<vmem>>) attributes {dimension_semantics = [], scalar_prefetch = 0 : i64, scratch_operands = 0 : i64, tpu.core_type = #tpu.core_type<tc>} {
    %c0 = arith.constant 0 : index
    %c0_0 = arith.constant 0 : index
    %0 = vector.load %arg0[%c0, %c0_0] : memref<16x32xf32, #tpu.memory_space<vmem>>, vector<16x32xf32>
    %c0_1 = arith.constant 0 : index
    %c0_2 = arith.constant 0 : index
    %1 = vector.load %arg1[%c0_1, %c0_2] : memref<16x32xf32, #tpu.memory_space<vmem>>, vector<16x32xf32>
    %2 = arith.addf %0, %1 : vector<16x32xf32>
    %c0_3 = arith.constant 0 : index
    %c0_4 = arith.constant 0 : index
    %3 = vector.load %arg2[%c0_3, %c0_4] : memref<16x16xf32, #tpu.memory_space<vmem>>, vector<16x16xf32>
    %c0_5 = arith.constant 0 : index
    %c0_6 = arith.constant 0 : index
    %c0_7 = arith.constant 0 : index
    %4 = vector.load %arg3[%c0_5, %c0_6, %c0_7] : memref<6x32x32xf32, #tpu.memory_space<vmem>>, vector<1x32x32xf32>
    %5 = vector.shape_cast %4 : vector<1x32x32xf32> to vector<32x32xf32>
    %c0_8 = arith.constant 0 : index
    %c0_9 = arith.constant 0 : index
    %c0_10 = arith.constant 0 : index
    %6 = vector.load %arg4[%c0_8, %c0_9, %c0_10] : memref<6x32x32xf32, #tpu.memory_space<vmem>>, vector<1x32x32xf32>
    %7 = vector.shape_cast %6 : vector<1x32x32xf32> to vector<32x32xf32>
    %c0_11 = arith.constant 0 : index
    %c0_12 = arith.constant 0 : index
    %c0_13 = arith.constant 0 : index
    %8 = vector.load %arg5[%c0_11, %c0_12, %c0_13] : memref<6x32x32xf32, #tpu.memory_space<vmem>>, vector<1x32x32xf32>
    %9 = vector.shape_cast %8 : vector<1x32x32xf32> to vector<32x32xf32>
    %c0_14 = arith.constant 0 : index
    %c0_15 = arith.constant 0 : index
    %c0_16 = arith.constant 0 : index
    %10 = vector.load %arg6[%c0_14, %c0_15, %c0_16] : memref<6x32x32xf32, #tpu.memory_space<vmem>>, vector<1x32x32xf32>
    %11 = vector.shape_cast %10 : vector<1x32x32xf32> to vector<32x32xf32>
    %c0_17 = arith.constant 0 : index
    %c0_18 = arith.constant 0 : index
    %c0_19 = arith.constant 0 : index
    %12 = vector.load %arg7[%c0_17, %c0_18, %c0_19] : memref<6x32x64xf32, #tpu.memory_space<vmem>>, vector<1x32x64xf32>
    %13 = vector.shape_cast %12 : vector<1x32x64xf32> to vector<32x64xf32>
    %c0_20 = arith.constant 0 : index
    %c0_21 = arith.constant 0 : index
    %c0_22 = arith.constant 0 : index
    %14 = vector.load %arg8[%c0_20, %c0_21, %c0_22] : memref<6x64x32xf32, #tpu.memory_space<vmem>>, vector<1x64x32xf32>
    %15 = vector.shape_cast %14 : vector<1x64x32xf32> to vector<64x32xf32>
    %cst = arith.constant dense<0.000000e+00> : vector<16x32xf32>
    %16 = tpu.matmul %2, %5, %cst {dimension_numbers = #tpu.dot_dimension_numbers<[1], [0], [0], [1], [0, 0, 1, 1], [], []>} : vector<16x32xf32>, vector<32x32xf32>, vector<16x32xf32> -> vector<16x32xf32>
    %cst_23 = arith.constant dense<0.000000e+00> : vector<16x32xf32>
    %17 = tpu.matmul %2, %7, %cst_23 {dimension_numbers = #tpu.dot_dimension_numbers<[1], [0], [0], [1], [0, 0, 1, 1], [], []>} : vector<16x32xf32>, vector<32x32xf32>, vector<16x32xf32> -> vector<16x32xf32>
    %cst_24 = arith.constant dense<0.000000e+00> : vector<16x32xf32>
    %18 = tpu.matmul %2, %9, %cst_24 {dimension_numbers = #tpu.dot_dimension_numbers<[1], [0], [0], [1], [0, 0, 1, 1], [], []>} : vector<16x32xf32>, vector<32x32xf32>, vector<16x32xf32> -> vector<16x32xf32>
    %19 = vector.extract_strided_slice %16 {offsets = [0, 0], sizes = [16, 8], strides = [1, 1]} : vector<16x32xf32> to vector<16x8xf32>
    %20 = vector.extract_strided_slice %17 {offsets = [0, 0], sizes = [16, 8], strides = [1, 1]} : vector<16x32xf32> to vector<16x8xf32>
    %21 = vector.extract_strided_slice %18 {offsets = [0, 0], sizes = [16, 8], strides = [1, 1]} : vector<16x32xf32> to vector<16x8xf32>
    "tpu.trace_start"() <{level = 10 : i32, message = "nk,mk->nm"}> : () -> ()
    %cst_25 = arith.constant dense<0.000000e+00> : vector<16x16xf32>
    %22 = tpu.matmul %19, %20, %cst_25 {dimension_numbers = #tpu.dot_dimension_numbers<[1], [1], [0], [0], [0, 0, 1, 0], [], []>} : vector<16x8xf32>, vector<16x8xf32>, vector<16x16xf32> -> vector<16x16xf32>
    "tpu.trace_stop"() : () -> ()
    %cst_26 = arith.constant 0.353553385 : f32
    %23 = vector.broadcast %cst_26 : f32 to vector<16x16xf32>
    %24 = arith.mulf %22, %23 : vector<16x16xf32>
    %25 = arith.addf %24, %3 : vector<16x16xf32>
    %cst_27 = arith.constant dense<0xFF800000> : vector<16xf32>
    %26 = vector.multi_reduction <maximumf>, %25, %cst_27 [1] : vector<16x16xf32> to vector<16xf32>
    %27 = vector.shape_cast %26 : vector<16xf32> to vector<16x1xf32>
    %28 = vector.broadcast %27 : vector<16x1xf32> to vector<16x16xf32>
    %29 = arith.subf %25, %28 : vector<16x16xf32>
    %30 = math.exp %29 : vector<16x16xf32>
    %cst_28 = arith.constant dense<0.000000e+00> : vector<16xf32>
    %31 = vector.multi_reduction <add>, %30, %cst_28 [1] : vector<16x16xf32> to vector<16xf32>
    %32 = vector.shape_cast %31 : vector<16xf32> to vector<16x1xf32>
    %33 = vector.broadcast %32 : vector<16x1xf32> to vector<16x16xf32>
    %34 = arith.divf %30, %33 : vector<16x16xf32>
    %cst_29 = arith.constant dense<0.000000e+00> : vector<16x8xf32>
    %35 = tpu.matmul %34, %21, %cst_29 {dimension_numbers = #tpu.dot_dimension_numbers<[1], [0], [0], [1], [0, 0, 1, 1], [], []>} : vector<16x16xf32>, vector<16x8xf32>, vector<16x8xf32> -> vector<16x8xf32>
    %36 = vector.extract_strided_slice %16 {offsets = [0, 8], sizes = [16, 8], strides = [1, 1]} : vector<16x32xf32> to vector<16x8xf32>
    %37 = vector.extract_strided_slice %17 {offsets = [0, 8], sizes = [16, 8], strides = [1, 1]} : vector<16x32xf32> to vector<16x8xf32>
    %38 = vector.extract_strided_slice %18 {offsets = [0, 8], sizes = [16, 8], strides = [1, 1]} : vector<16x32xf32> to vector<16x8xf32>
    "tpu.trace_start"() <{level = 10 : i32, message = "nk,mk->nm"}> : () -> ()
    %cst_30 = arith.constant dense<0.000000e+00> : vector<16x16xf32>
    %39 = tpu.matmul %36, %37, %cst_30 {dimension_numbers = #tpu.dot_dimension_numbers<[1], [1], [0], [0], [0, 0, 1, 0], [], []>} : vector<16x8xf32>, vector<16x8xf32>, vector<16x16xf32> -> vector<16x16xf32>
    "tpu.trace_stop"() : () -> ()
    %cst_31 = arith.constant 0.353553385 : f32
    %40 = vector.broadcast %cst_31 : f32 to vector<16x16xf32>
    %41 = arith.mulf %39, %40 : vector<16x16xf32>
    %42 = arith.addf %41, %3 : vector<16x16xf32>
    %cst_32 = arith.constant dense<0xFF800000> : vector<16xf32>
    %43 = vector.multi_reduction <maximumf>, %42, %cst_32 [1] : vector<16x16xf32> to vector<16xf32>
    %44 = vector.shape_cast %43 : vector<16xf32> to vector<16x1xf32>
    %45 = vector.broadcast %44 : vector<16x1xf32> to vector<16x16xf32>
    %46 = arith.subf %42, %45 : vector<16x16xf32>
    %47 = math.exp %46 : vector<16x16xf32>
    %cst_33 = arith.constant dense<0.000000e+00> : vector<16xf32>
    %48 = vector.multi_reduction <add>, %47, %cst_33 [1] : vector<16x16xf32> to vector<16xf32>
    %49 = vector.shape_cast %48 : vector<16xf32> to vector<16x1xf32>
    %50 = vector.broadcast %49 : vector<16x1xf32> to vector<16x16xf32>
    %51 = arith.divf %47, %50 : vector<16x16xf32>
    %cst_34 = arith.constant dense<0.000000e+00> : vector<16x8xf32>
    %52 = tpu.matmul %51, %38, %cst_34 {dimension_numbers = #tpu.dot_dimension_numbers<[1], [0], [0], [1], [0, 0, 1, 1], [], []>} : vector<16x16xf32>, vector<16x8xf32>, vector<16x8xf32> -> vector<16x8xf32>
    %53 = vector.extract_strided_slice %16 {offsets = [0, 16], sizes = [16, 8], strides = [1, 1]} : vector<16x32xf32> to vector<16x8xf32>
    %54 = vector.extract_strided_slice %17 {offsets = [0, 16], sizes = [16, 8], strides = [1, 1]} : vector<16x32xf32> to vector<16x8xf32>
    %55 = vector.extract_strided_slice %18 {offsets = [0, 16], sizes = [16, 8], strides = [1, 1]} : vector<16x32xf32> to vector<16x8xf32>
    "tpu.trace_start"() <{level = 10 : i32, message = "nk,mk->nm"}> : () -> ()
    %cst_35 = arith.constant dense<0.000000e+00> : vector<16x16xf32>
    %56 = tpu.matmul %53, %54, %cst_35 {dimension_numbers = #tpu.dot_dimension_numbers<[1], [1], [0], [0], [0, 0, 1, 0], [], []>} : vector<16x8xf32>, vector<16x8xf32>, vector<16x16xf32> -> vector<16x16xf32>
    "tpu.trace_stop"() : () -> ()
    %cst_36 = arith.constant 0.353553385 : f32
    %57 = vector.broadcast %cst_36 : f32 to vector<16x16xf32>
    %58 = arith.mulf %56, %57 : vector<16x16xf32>
    %59 = arith.addf %58, %3 : vector<16x16xf32>
    %cst_37 = arith.constant dense<0xFF800000> : vector<16xf32>
    %60 = vector.multi_reduction <maximumf>, %59, %cst_37 [1] : vector<16x16xf32> to vector<16xf32>
    %61 = vector.shape_cast %60 : vector<16xf32> to vector<16x1xf32>
    %62 = vector.broadcast %61 : vector<16x1xf32> to vector<16x16xf32>
    %63 = arith.subf %59, %62 : vector<16x16xf32>
    %64 = math.exp %63 : vector<16x16xf32>
    %cst_38 = arith.constant dense<0.000000e+00> : vector<16xf32>
    %65 = vector.multi_reduction <add>, %64, %cst_38 [1] : vector<16x16xf32> to vector<16xf32>
    %66 = vector.shape_cast %65 : vector<16xf32> to vector<16x1xf32>
    %67 = vector.broadcast %66 : vector<16x1xf32> to vector<16x16xf32>
    %68 = arith.divf %64, %67 : vector<16x16xf32>
    %cst_39 = arith.constant dense<0.000000e+00> : vector<16x8xf32>
    %69 = tpu.matmul %68, %55, %cst_39 {dimension_numbers = #tpu.dot_dimension_numbers<[1], [0], [0], [1], [0, 0, 1, 1], [], []>} : vector<16x16xf32>, vector<16x8xf32>, vector<16x8xf32> -> vector<16x8xf32>
    %70 = vector.extract_strided_slice %16 {offsets = [0, 24], sizes = [16, 8], strides = [1, 1]} : vector<16x32xf32> to vector<16x8xf32>
    %71 = vector.extract_strided_slice %17 {offsets = [0, 24], sizes = [16, 8], strides = [1, 1]} : vector<16x32xf32> to vector<16x8xf32>
    %72 = vector.extract_strided_slice %18 {offsets = [0, 24], sizes = [16, 8], strides = [1, 1]} : vector<16x32xf32> to vector<16x8xf32>
    "tpu.trace_start"() <{level = 10 : i32, message = "nk,mk->nm"}> : () -> ()
    %cst_40 = arith.constant dense<0.000000e+00> : vector<16x16xf32>
    %73 = tpu.matmul %70, %71, %cst_40 {dimension_numbers = #tpu.dot_dimension_numbers<[1], [1], [0], [0], [0, 0, 1, 0], [], []>} : vector<16x8xf32>, vector<16x8xf32>, vector<16x16xf32> -> vector<16x16xf32>
    "tpu.trace_stop"() : () -> ()
    %cst_41 = arith.constant 0.353553385 : f32
    %74 = vector.broadcast %cst_41 : f32 to vector<16x16xf32>
    %75 = arith.mulf %73, %74 : vector<16x16xf32>
    %76 = arith.addf %75, %3 : vector<16x16xf32>
    %cst_42 = arith.constant dense<0xFF800000> : vector<16xf32>
    %77 = vector.multi_reduction <maximumf>, %76, %cst_42 [1] : vector<16x16xf32> to vector<16xf32>
    %78 = vector.shape_cast %77 : vector<16xf32> to vector<16x1xf32>
    %79 = vector.broadcast %78 : vector<16x1xf32> to vector<16x16xf32>
    %80 = arith.subf %76, %79 : vector<16x16xf32>
    %81 = math.exp %80 : vector<16x16xf32>
    %cst_43 = arith.constant dense<0.000000e+00> : vector<16xf32>
    %82 = vector.multi_reduction <add>, %81, %cst_43 [1] : vector<16x16xf32> to vector<16xf32>
    %83 = vector.shape_cast %82 : vector<16xf32> to vector<16x1xf32>
    %84 = vector.broadcast %83 : vector<16x1xf32> to vector<16x16xf32>
    %85 = arith.divf %81, %84 : vector<16x16xf32>
    %cst_44 = arith.constant dense<0.000000e+00> : vector<16x8xf32>
    %86 = tpu.matmul %85, %72, %cst_44 {dimension_numbers = #tpu.dot_dimension_numbers<[1], [0], [0], [1], [0, 0, 1, 1], [], []>} : vector<16x16xf32>, vector<16x8xf32>, vector<16x8xf32> -> vector<16x8xf32>
    %87 = tpu.concatenate %35, %52, %69, %86 in 1 : vector<16x8xf32>, vector<16x8xf32>, vector<16x8xf32>, vector<16x8xf32> -> vector<16x32xf32>
    %cst_45 = arith.constant dense<0.000000e+00> : vector<16x32xf32>
    %88 = tpu.matmul %87, %11, %cst_45 {dimension_numbers = #tpu.dot_dimension_numbers<[1], [0], [0], [1], [0, 0, 1, 1], [], []>} : vector<16x32xf32>, vector<32x32xf32>, vector<16x32xf32> -> vector<16x32xf32>
    %89 = arith.addf %88, %2 : vector<16x32xf32>
    %cst_46 = arith.constant dense<0.000000e+00> : vector<16xf32>
    %90 = vector.multi_reduction <add>, %89, %cst_46 [1] : vector<16x32xf32> to vector<16xf32>
    %91 = vector.shape_cast %90 : vector<16xf32> to vector<16x1xf32>
    %cst_47 = arith.constant 3.200000e+01 : f32
    %92 = vector.broadcast %cst_47 : f32 to vector<16x1xf32>
    %93 = arith.divf %91, %92 : vector<16x1xf32>
    %94 = vector.broadcast %93 : vector<16x1xf32> to vector<16x32xf32>
    %95 = arith.subf %89, %94 : vector<16x32xf32>
    %96 = arith.mulf %95, %95 : vector<16x32xf32>
    %cst_48 = arith.constant dense<0.000000e+00> : vector<16xf32>
    %97 = vector.multi_reduction <add>, %96, %cst_48 [1] : vector<16x32xf32> to vector<16xf32>
    %98 = vector.shape_cast %97 : vector<16xf32> to vector<16x1xf32>
    %cst_49 = arith.constant 3.200000e+01 : f32
    %99 = vector.broadcast %cst_49 : f32 to vector<16x1xf32>
    %100 = arith.divf %98, %99 : vector<16x1xf32>
    %cst_50 = arith.constant 9.99999974E-6 : f32
    %101 = vector.broadcast %cst_50 : f32 to vector<16x1xf32>
    %102 = arith.addf %100, %101 : vector<16x1xf32>
    %103 = math.rsqrt %102 : vector<16x1xf32>
    %104 = vector.broadcast %103 : vector<16x1xf32> to vector<16x32xf32>
    %105 = arith.mulf %95, %104 : vector<16x32xf32>
    %cst_51 = arith.constant dense<0.000000e+00> : vector<16x64xf32>
    %106 = tpu.matmul %105, %13, %cst_51 {dimension_numbers = #tpu.dot_dimension_numbers<[1], [0], [0], [1], [0, 0, 1, 1], [], []>} : vector<16x32xf32>, vector<32x64xf32>, vector<16x64xf32> -> vector<16x64xf32>
    %cst_52 = arith.constant 0.000000e+00 : f32
    %107 = vector.broadcast %cst_52 : f32 to vector<16x64xf32>
    %108 = arith.maximumf %106, %107 : vector<16x64xf32>
    %cst_53 = arith.constant dense<0.000000e+00> : vector<16x32xf32>
    %109 = tpu.matmul %108, %15, %cst_53 {dimension_numbers = #tpu.dot_dimension_numbers<[1], [0], [0], [1], [0, 0, 1, 1], [], []>} : vector<16x64xf32>, vector<64x32xf32>, vector<16x32xf32> -> vector<16x32xf32>
    %110 = arith.addf %109, %105 : vector<16x32xf32>
    %cst_54 = arith.constant dense<0.000000e+00> : vector<16xf32>
    %111 = vector.multi_reduction <add>, %110, %cst_54 [1] : vector<16x32xf32> to vector<16xf32>
    %112 = vector.shape_cast %111 : vector<16xf32> to vector<16x1xf32>
    %cst_55 = arith.constant 3.200000e+01 : f32
    %113 = vector.broadcast %cst_55 : f32 to vector<16x1xf32>
    %114 = arith.divf %112, %113 : vector<16x1xf32>
    %115 = vector.broadcast %114 : vector<16x1xf32> to vector<16x32xf32>
    %116 = arith.subf %110, %115 : vector<16x32xf32>
    %117 = arith.mulf %116, %116 : vector<16x32xf32>
    %cst_56 = arith.constant dense<0.000000e+00> : vector<16xf32>
    %118 = vector.multi_reduction <add>, %117, %cst_56 [1] : vector<16x32xf32> to vector<16xf32>
    %119 = vector.shape_cast %118 : vector<16xf32> to vector<16x1xf32>
    %cst_57 = arith.constant 3.200000e+01 : f32
    %120 = vector.broadcast %cst_57 : f32 to vector<16x1xf32>
    %121 = arith.divf %119, %120 : vector<16x1xf32>
    %cst_58 = arith.constant 9.99999974E-6 : f32
    %122 = vector.broadcast %cst_58 : f32 to vector<16x1xf32>
    %123 = arith.addf %121, %122 : vector<16x1xf32>
    %124 = math.rsqrt %123 : vector<16x1xf32>
    %125 = vector.broadcast %124 : vector<16x1xf32> to vector<16x32xf32>
    %126 = arith.mulf %116, %125 : vector<16x32xf32>
    %c1 = arith.constant 1 : index
    %c0_59 = arith.constant 0 : index
    %c0_60 = arith.constant 0 : index
    %127 = vector.load %arg3[%c1, %c0_59, %c0_60] : memref<6x32x32xf32, #tpu.memory_space<vmem>>, vector<1x32x32xf32>
    %128 = vector.shape_cast %127 : vector<1x32x32xf32> to vector<32x32xf32>
    %c1_61 = arith.constant 1 : index
    %c0_62 = arith.constant 0 : index
    %c0_63 = arith.constant 0 : index
    %129 = vector.load %arg4[%c1_61, %c0_62, %c0_63] : memref<6x32x32xf32, #tpu.memory_space<vmem>>, vector<1x32x32xf32>
    %130 = vector.shape_cast %129 : vector<1x32x32xf32> to vector<32x32xf32>
    %c1_64 = arith.constant 1 : index
    %c0_65 = arith.constant 0 : index
    %c0_66 = arith.constant 0 : index
    %131 = vector.load %arg5[%c1_64, %c0_65, %c0_66] : memref<6x32x32xf32, #tpu.memory_space<vmem>>, vector<1x32x32xf32>
    %132 = vector.shape_cast %131 : vector<1x32x32xf32> to vector<32x32xf32>
    %c1_67 = arith.constant 1 : index
    %c0_68 = arith.constant 0 : index
    %c0_69 = arith.constant 0 : index
    %133 = vector.load %arg6[%c1_67, %c0_68, %c0_69] : memref<6x32x32xf32, #tpu.memory_space<vmem>>, vector<1x32x32xf32>
    %134 = vector.shape_cast %133 : vector<1x32x32xf32> to vector<32x32xf32>
    %c1_70 = arith.constant 1 : index
    %c0_71 = arith.constant 0 : index
    %c0_72 = arith.constant 0 : index
    %135 = vector.load %arg7[%c1_70, %c0_71, %c0_72] : memref<6x32x64xf32, #tpu.memory_space<vmem>>, vector<1x32x64xf32>
    %136 = vector.shape_cast %135 : vector<1x32x64xf32> to vector<32x64xf32>
    %c1_73 = arith.constant 1 : index
    %c0_74 = arith.constant 0 : index
    %c0_75 = arith.constant 0 : index
    %137 = vector.load %arg8[%c1_73, %c0_74, %c0_75] : memref<6x64x32xf32, #tpu.memory_space<vmem>>, vector<1x64x32xf32>
    %138 = vector.shape_cast %137 : vector<1x64x32xf32> to vector<64x32xf32>
    %cst_76 = arith.constant dense<0.000000e+00> : vector<16x32xf32>
    %139 = tpu.matmul %126, %128, %cst_76 {dimension_numbers = #tpu.dot_dimension_numbers<[1], [0], [0], [1], [0, 0, 1, 1], [], []>} : vector<16x32xf32>, vector<32x32xf32>, vector<16x32xf32> -> vector<16x32xf32>
    %cst_77 = arith.constant dense<0.000000e+00> : vector<16x32xf32>
    %140 = tpu.matmul %126, %130, %cst_77 {dimension_numbers = #tpu.dot_dimension_numbers<[1], [0], [0], [1], [0, 0, 1, 1], [], []>} : vector<16x32xf32>, vector<32x32xf32>, vector<16x32xf32> -> vector<16x32xf32>
    %cst_78 = arith.constant dense<0.000000e+00> : vector<16x32xf32>
    %141 = tpu.matmul %126, %132, %cst_78 {dimension_numbers = #tpu.dot_dimension_numbers<[1], [0], [0], [1], [0, 0, 1, 1], [], []>} : vector<16x32xf32>, vector<32x32xf32>, vector<16x32xf32> -> vector<16x32xf32>
    %142 = vector.extract_strided_slice %139 {offsets = [0, 0], sizes = [16, 8], strides = [1, 1]} : vector<16x32xf32> to vector<16x8xf32>
    %143 = vector.extract_strided_slice %140 {offsets = [0, 0], sizes = [16, 8], strides = [1, 1]} : vector<16x32xf32> to vector<16x8xf32>
    %144 = vector.extract_strided_slice %141 {offsets = [0, 0], sizes = [16, 8], strides = [1, 1]} : vector<16x32xf32> to vector<16x8xf32>
    "tpu.trace_start"() <{level = 10 : i32, message = "nk,mk->nm"}> : () -> ()
    %cst_79 = arith.constant dense<0.000000e+00> : vector<16x16xf32>
    %145 = tpu.matmul %142, %143, %cst_79 {dimension_numbers = #tpu.dot_dimension_numbers<[1], [1], [0], [0], [0, 0, 1, 0], [], []>} : vector<16x8xf32>, vector<16x8xf32>, vector<16x16xf32> -> vector<16x16xf32>
    "tpu.trace_stop"() : () -> ()
    %cst_80 = arith.constant 0.353553385 : f32
    %146 = vector.broadcast %cst_80 : f32 to vector<16x16xf32>
    %147 = arith.mulf %145, %146 : vector<16x16xf32>
    %148 = arith.addf %147, %3 : vector<16x16xf32>
    %cst_81 = arith.constant dense<0xFF800000> : vector<16xf32>
    %149 = vector.multi_reduction <maximumf>, %148, %cst_81 [1] : vector<16x16xf32> to vector<16xf32>
    %150 = vector.shape_cast %149 : vector<16xf32> to vector<16x1xf32>
    %151 = vector.broadcast %150 : vector<16x1xf32> to vector<16x16xf32>
    %152 = arith.subf %148, %151 : vector<16x16xf32>
    %153 = math.exp %152 : vector<16x16xf32>
    %cst_82 = arith.constant dense<0.000000e+00> : vector<16xf32>
    %154 = vector.multi_reduction <add>, %153, %cst_82 [1] : vector<16x16xf32> to vector<16xf32>
    %155 = vector.shape_cast %154 : vector<16xf32> to vector<16x1xf32>
    %156 = vector.broadcast %155 : vector<16x1xf32> to vector<16x16xf32>
    %157 = arith.divf %153, %156 : vector<16x16xf32>
    %cst_83 = arith.constant dense<0.000000e+00> : vector<16x8xf32>
    %158 = tpu.matmul %157, %144, %cst_83 {dimension_numbers = #tpu.dot_dimension_numbers<[1], [0], [0], [1], [0, 0, 1, 1], [], []>} : vector<16x16xf32>, vector<16x8xf32>, vector<16x8xf32> -> vector<16x8xf32>
    %159 = vector.extract_strided_slice %139 {offsets = [0, 8], sizes = [16, 8], strides = [1, 1]} : vector<16x32xf32> to vector<16x8xf32>
    %160 = vector.extract_strided_slice %140 {offsets = [0, 8], sizes = [16, 8], strides = [1, 1]} : vector<16x32xf32> to vector<16x8xf32>
    %161 = vector.extract_strided_slice %141 {offsets = [0, 8], sizes = [16, 8], strides = [1, 1]} : vector<16x32xf32> to vector<16x8xf32>
    "tpu.trace_start"() <{level = 10 : i32, message = "nk,mk->nm"}> : () -> ()
    %cst_84 = arith.constant dense<0.000000e+00> : vector<16x16xf32>
    %162 = tpu.matmul %159, %160, %cst_84 {dimension_numbers = #tpu.dot_dimension_numbers<[1], [1], [0], [0], [0, 0, 1, 0], [], []>} : vector<16x8xf32>, vector<16x8xf32>, vector<16x16xf32> -> vector<16x16xf32>
    "tpu.trace_stop"() : () -> ()
    %cst_85 = arith.constant 0.353553385 : f32
    %163 = vector.broadcast %cst_85 : f32 to vector<16x16xf32>
    %164 = arith.mulf %162, %163 : vector<16x16xf32>
    %165 = arith.addf %164, %3 : vector<16x16xf32>
    %cst_86 = arith.constant dense<0xFF800000> : vector<16xf32>
    %166 = vector.multi_reduction <maximumf>, %165, %cst_86 [1] : vector<16x16xf32> to vector<16xf32>
    %167 = vector.shape_cast %166 : vector<16xf32> to vector<16x1xf32>
    %168 = vector.broadcast %167 : vector<16x1xf32> to vector<16x16xf32>
    %169 = arith.subf %165, %168 : vector<16x16xf32>
    %170 = math.exp %169 : vector<16x16xf32>
    %cst_87 = arith.constant dense<0.000000e+00> : vector<16xf32>
    %171 = vector.multi_reduction <add>, %170, %cst_87 [1] : vector<16x16xf32> to vector<16xf32>
    %172 = vector.shape_cast %171 : vector<16xf32> to vector<16x1xf32>
    %173 = vector.broadcast %172 : vector<16x1xf32> to vector<16x16xf32>
    %174 = arith.divf %170, %173 : vector<16x16xf32>
    %cst_88 = arith.constant dense<0.000000e+00> : vector<16x8xf32>
    %175 = tpu.matmul %174, %161, %cst_88 {dimension_numbers = #tpu.dot_dimension_numbers<[1], [0], [0], [1], [0, 0, 1, 1], [], []>} : vector<16x16xf32>, vector<16x8xf32>, vector<16x8xf32> -> vector<16x8xf32>
    %176 = vector.extract_strided_slice %139 {offsets = [0, 16], sizes = [16, 8], strides = [1, 1]} : vector<16x32xf32> to vector<16x8xf32>
    %177 = vector.extract_strided_slice %140 {offsets = [0, 16], sizes = [16, 8], strides = [1, 1]} : vector<16x32xf32> to vector<16x8xf32>
    %178 = vector.extract_strided_slice %141 {offsets = [0, 16], sizes = [16, 8], strides = [1, 1]} : vector<16x32xf32> to vector<16x8xf32>
    "tpu.trace_start"() <{level = 10 : i32, message = "nk,mk->nm"}> : () -> ()
    %cst_89 = arith.constant dense<0.000000e+00> : vector<16x16xf32>
    %179 = tpu.matmul %176, %177, %cst_89 {dimension_numbers = #tpu.dot_dimension_numbers<[1], [1], [0], [0], [0, 0, 1, 0], [], []>} : vector<16x8xf32>, vector<16x8xf32>, vector<16x16xf32> -> vector<16x16xf32>
    "tpu.trace_stop"() : () -> ()
    %cst_90 = arith.constant 0.353553385 : f32
    %180 = vector.broadcast %cst_90 : f32 to vector<16x16xf32>
    %181 = arith.mulf %179, %180 : vector<16x16xf32>
    %182 = arith.addf %181, %3 : vector<16x16xf32>
    %cst_91 = arith.constant dense<0xFF800000> : vector<16xf32>
    %183 = vector.multi_reduction <maximumf>, %182, %cst_91 [1] : vector<16x16xf32> to vector<16xf32>
    %184 = vector.shape_cast %183 : vector<16xf32> to vector<16x1xf32>
    %185 = vector.broadcast %184 : vector<16x1xf32> to vector<16x16xf32>
    %186 = arith.subf %182, %185 : vector<16x16xf32>
    %187 = math.exp %186 : vector<16x16xf32>
    %cst_92 = arith.constant dense<0.000000e+00> : vector<16xf32>
    %188 = vector.multi_reduction <add>, %187, %cst_92 [1] : vector<16x16xf32> to vector<16xf32>
    %189 = vector.shape_cast %188 : vector<16xf32> to vector<16x1xf32>
    %190 = vector.broadcast %189 : vector<16x1xf32> to vector<16x16xf32>
    %191 = arith.divf %187, %190 : vector<16x16xf32>
    %cst_93 = arith.constant dense<0.000000e+00> : vector<16x8xf32>
    %192 = tpu.matmul %191, %178, %cst_93 {dimension_numbers = #tpu.dot_dimension_numbers<[1], [0], [0], [1], [0, 0, 1, 1], [], []>} : vector<16x16xf32>, vector<16x8xf32>, vector<16x8xf32> -> vector<16x8xf32>
    %193 = vector.extract_strided_slice %139 {offsets = [0, 24], sizes = [16, 8], strides = [1, 1]} : vector<16x32xf32> to vector<16x8xf32>
    %194 = vector.extract_strided_slice %140 {offsets = [0, 24], sizes = [16, 8], strides = [1, 1]} : vector<16x32xf32> to vector<16x8xf32>
    %195 = vector.extract_strided_slice %141 {offsets = [0, 24], sizes = [16, 8], strides = [1, 1]} : vector<16x32xf32> to vector<16x8xf32>
    "tpu.trace_start"() <{level = 10 : i32, message = "nk,mk->nm"}> : () -> ()
    %cst_94 = arith.constant dense<0.000000e+00> : vector<16x16xf32>
    %196 = tpu.matmul %193, %194, %cst_94 {dimension_numbers = #tpu.dot_dimension_numbers<[1], [1], [0], [0], [0, 0, 1, 0], [], []>} : vector<16x8xf32>, vector<16x8xf32>, vector<16x16xf32> -> vector<16x16xf32>
    "tpu.trace_stop"() : () -> ()
    %cst_95 = arith.constant 0.353553385 : f32
    %197 = vector.broadcast %cst_95 : f32 to vector<16x16xf32>
    %198 = arith.mulf %196, %197 : vector<16x16xf32>
    %199 = arith.addf %198, %3 : vector<16x16xf32>
    %cst_96 = arith.constant dense<0xFF800000> : vector<16xf32>
    %200 = vector.multi_reduction <maximumf>, %199, %cst_96 [1] : vector<16x16xf32> to vector<16xf32>
    %201 = vector.shape_cast %200 : vector<16xf32> to vector<16x1xf32>
    %202 = vector.broadcast %201 : vector<16x1xf32> to vector<16x16xf32>
    %203 = arith.subf %199, %202 : vector<16x16xf32>
    %204 = math.exp %203 : vector<16x16xf32>
    %cst_97 = arith.constant dense<0.000000e+00> : vector<16xf32>
    %205 = vector.multi_reduction <add>, %204, %cst_97 [1] : vector<16x16xf32> to vector<16xf32>
    %206 = vector.shape_cast %205 : vector<16xf32> to vector<16x1xf32>
    %207 = vector.broadcast %206 : vector<16x1xf32> to vector<16x16xf32>
    %208 = arith.divf %204, %207 : vector<16x16xf32>
    %cst_98 = arith.constant dense<0.000000e+00> : vector<16x8xf32>
    %209 = tpu.matmul %208, %195, %cst_98 {dimension_numbers = #tpu.dot_dimension_numbers<[1], [0], [0], [1], [0, 0, 1, 1], [], []>} : vector<16x16xf32>, vector<16x8xf32>, vector<16x8xf32> -> vector<16x8xf32>
    %210 = tpu.concatenate %158, %175, %192, %209 in 1 : vector<16x8xf32>, vector<16x8xf32>, vector<16x8xf32>, vector<16x8xf32> -> vector<16x32xf32>
    %cst_99 = arith.constant dense<0.000000e+00> : vector<16x32xf32>
    %211 = tpu.matmul %210, %134, %cst_99 {dimension_numbers = #tpu.dot_dimension_numbers<[1], [0], [0], [1], [0, 0, 1, 1], [], []>} : vector<16x32xf32>, vector<32x32xf32>, vector<16x32xf32> -> vector<16x32xf32>
    %212 = arith.addf %211, %126 : vector<16x32xf32>
    %cst_100 = arith.constant dense<0.000000e+00> : vector<16xf32>
    %213 = vector.multi_reduction <add>, %212, %cst_100 [1] : vector<16x32xf32> to vector<16xf32>
    %214 = vector.shape_cast %213 : vector<16xf32> to vector<16x1xf32>
    %cst_101 = arith.constant 3.200000e+01 : f32
    %215 = vector.broadcast %cst_101 : f32 to vector<16x1xf32>
    %216 = arith.divf %214, %215 : vector<16x1xf32>
    %217 = vector.broadcast %216 : vector<16x1xf32> to vector<16x32xf32>
    %218 = arith.subf %212, %217 : vector<16x32xf32>
    %219 = arith.mulf %218, %218 : vector<16x32xf32>
    %cst_102 = arith.constant dense<0.000000e+00> : vector<16xf32>
    %220 = vector.multi_reduction <add>, %219, %cst_102 [1] : vector<16x32xf32> to vector<16xf32>
    %221 = vector.shape_cast %220 : vector<16xf32> to vector<16x1xf32>
    %cst_103 = arith.constant 3.200000e+01 : f32
    %222 = vector.broadcast %cst_103 : f32 to vector<16x1xf32>
    %223 = arith.divf %221, %222 : vector<16x1xf32>
    %cst_104 = arith.constant 9.99999974E-6 : f32
    %224 = vector.broadcast %cst_104 : f32 to vector<16x1xf32>
    %225 = arith.addf %223, %224 : vector<16x1xf32>
    %226 = math.rsqrt %225 : vector<16x1xf32>
    %227 = vector.broadcast %226 : vector<16x1xf32> to vector<16x32xf32>
    %228 = arith.mulf %218, %227 : vector<16x32xf32>
    %cst_105 = arith.constant dense<0.000000e+00> : vector<16x64xf32>
    %229 = tpu.matmul %228, %136, %cst_105 {dimension_numbers = #tpu.dot_dimension_numbers<[1], [0], [0], [1], [0, 0, 1, 1], [], []>} : vector<16x32xf32>, vector<32x64xf32>, vector<16x64xf32> -> vector<16x64xf32>
    %cst_106 = arith.constant 0.000000e+00 : f32
    %230 = vector.broadcast %cst_106 : f32 to vector<16x64xf32>
    %231 = arith.maximumf %229, %230 : vector<16x64xf32>
    %cst_107 = arith.constant dense<0.000000e+00> : vector<16x32xf32>
    %232 = tpu.matmul %231, %138, %cst_107 {dimension_numbers = #tpu.dot_dimension_numbers<[1], [0], [0], [1], [0, 0, 1, 1], [], []>} : vector<16x64xf32>, vector<64x32xf32>, vector<16x32xf32> -> vector<16x32xf32>
    %233 = arith.addf %232, %228 : vector<16x32xf32>
    %cst_108 = arith.constant dense<0.000000e+00> : vector<16xf32>
    %234 = vector.multi_reduction <add>, %233, %cst_108 [1] : vector<16x32xf32> to vector<16xf32>
    %235 = vector.shape_cast %234 : vector<16xf32> to vector<16x1xf32>
    %cst_109 = arith.constant 3.200000e+01 : f32
    %236 = vector.broadcast %cst_109 : f32 to vector<16x1xf32>
    %237 = arith.divf %235, %236 : vector<16x1xf32>
    %238 = vector.broadcast %237 : vector<16x1xf32> to vector<16x32xf32>
    %239 = arith.subf %233, %238 : vector<16x32xf32>
    %240 = arith.mulf %239, %239 : vector<16x32xf32>
    %cst_110 = arith.constant dense<0.000000e+00> : vector<16xf32>
    %241 = vector.multi_reduction <add>, %240, %cst_110 [1] : vector<16x32xf32> to vector<16xf32>
    %242 = vector.shape_cast %241 : vector<16xf32> to vector<16x1xf32>
    %cst_111 = arith.constant 3.200000e+01 : f32
    %243 = vector.broadcast %cst_111 : f32 to vector<16x1xf32>
    %244 = arith.divf %242, %243 : vector<16x1xf32>
    %cst_112 = arith.constant 9.99999974E-6 : f32
    %245 = vector.broadcast %cst_112 : f32 to vector<16x1xf32>
    %246 = arith.addf %244, %245 : vector<16x1xf32>
    %247 = math.rsqrt %246 : vector<16x1xf32>
    %248 = vector.broadcast %247 : vector<16x1xf32> to vector<16x32xf32>
    %249 = arith.mulf %239, %248 : vector<16x32xf32>
    %c2 = arith.constant 2 : index
    %c0_113 = arith.constant 0 : index
    %c0_114 = arith.constant 0 : index
    %250 = vector.load %arg3[%c2, %c0_113, %c0_114] : memref<6x32x32xf32, #tpu.memory_space<vmem>>, vector<1x32x32xf32>
    %251 = vector.shape_cast %250 : vector<1x32x32xf32> to vector<32x32xf32>
    %c2_115 = arith.constant 2 : index
    %c0_116 = arith.constant 0 : index
    %c0_117 = arith.constant 0 : index
    %252 = vector.load %arg4[%c2_115, %c0_116, %c0_117] : memref<6x32x32xf32, #tpu.memory_space<vmem>>, vector<1x32x32xf32>
    %253 = vector.shape_cast %252 : vector<1x32x32xf32> to vector<32x32xf32>
    %c2_118 = arith.constant 2 : index
    %c0_119 = arith.constant 0 : index
    %c0_120 = arith.constant 0 : index
    %254 = vector.load %arg5[%c2_118, %c0_119, %c0_120] : memref<6x32x32xf32, #tpu.memory_space<vmem>>, vector<1x32x32xf32>
    %255 = vector.shape_cast %254 : vector<1x32x32xf32> to vector<32x32xf32>
    %c2_121 = arith.constant 2 : index
    %c0_122 = arith.constant 0 : index
    %c0_123 = arith.constant 0 : index
    %256 = vector.load %arg6[%c2_121, %c0_122, %c0_123] : memref<6x32x32xf32, #tpu.memory_space<vmem>>, vector<1x32x32xf32>
    %257 = vector.shape_cast %256 : vector<1x32x32xf32> to vector<32x32xf32>
    %c2_124 = arith.constant 2 : index
    %c0_125 = arith.constant 0 : index
    %c0_126 = arith.constant 0 : index
    %258 = vector.load %arg7[%c2_124, %c0_125, %c0_126] : memref<6x32x64xf32, #tpu.memory_space<vmem>>, vector<1x32x64xf32>
    %259 = vector.shape_cast %258 : vector<1x32x64xf32> to vector<32x64xf32>
    %c2_127 = arith.constant 2 : index
    %c0_128 = arith.constant 0 : index
    %c0_129 = arith.constant 0 : index
    %260 = vector.load %arg8[%c2_127, %c0_128, %c0_129] : memref<6x64x32xf32, #tpu.memory_space<vmem>>, vector<1x64x32xf32>
    %261 = vector.shape_cast %260 : vector<1x64x32xf32> to vector<64x32xf32>
    %cst_130 = arith.constant dense<0.000000e+00> : vector<16x32xf32>
    %262 = tpu.matmul %249, %251, %cst_130 {dimension_numbers = #tpu.dot_dimension_numbers<[1], [0], [0], [1], [0, 0, 1, 1], [], []>} : vector<16x32xf32>, vector<32x32xf32>, vector<16x32xf32> -> vector<16x32xf32>
    %cst_131 = arith.constant dense<0.000000e+00> : vector<16x32xf32>
    %263 = tpu.matmul %249, %253, %cst_131 {dimension_numbers = #tpu.dot_dimension_numbers<[1], [0], [0], [1], [0, 0, 1, 1], [], []>} : vector<16x32xf32>, vector<32x32xf32>, vector<16x32xf32> -> vector<16x32xf32>
    %cst_132 = arith.constant dense<0.000000e+00> : vector<16x32xf32>
    %264 = tpu.matmul %249, %255, %cst_132 {dimension_numbers = #tpu.dot_dimension_numbers<[1], [0], [0], [1], [0, 0, 1, 1], [], []>} : vector<16x32xf32>, vector<32x32xf32>, vector<16x32xf32> -> vector<16x32xf32>
    %265 = vector.extract_strided_slice %262 {offsets = [0, 0], sizes = [16, 8], strides = [1, 1]} : vector<16x32xf32> to vector<16x8xf32>
    %266 = vector.extract_strided_slice %263 {offsets = [0, 0], sizes = [16, 8], strides = [1, 1]} : vector<16x32xf32> to vector<16x8xf32>
    %267 = vector.extract_strided_slice %264 {offsets = [0, 0], sizes = [16, 8], strides = [1, 1]} : vector<16x32xf32> to vector<16x8xf32>
    "tpu.trace_start"() <{level = 10 : i32, message = "nk,mk->nm"}> : () -> ()
    %cst_133 = arith.constant dense<0.000000e+00> : vector<16x16xf32>
    %268 = tpu.matmul %265, %266, %cst_133 {dimension_numbers = #tpu.dot_dimension_numbers<[1], [1], [0], [0], [0, 0, 1, 0], [], []>} : vector<16x8xf32>, vector<16x8xf32>, vector<16x16xf32> -> vector<16x16xf32>
    "tpu.trace_stop"() : () -> ()
    %cst_134 = arith.constant 0.353553385 : f32
    %269 = vector.broadcast %cst_134 : f32 to vector<16x16xf32>
    %270 = arith.mulf %268, %269 : vector<16x16xf32>
    %271 = arith.addf %270, %3 : vector<16x16xf32>
    %cst_135 = arith.constant dense<0xFF800000> : vector<16xf32>
    %272 = vector.multi_reduction <maximumf>, %271, %cst_135 [1] : vector<16x16xf32> to vector<16xf32>
    %273 = vector.shape_cast %272 : vector<16xf32> to vector<16x1xf32>
    %274 = vector.broadcast %273 : vector<16x1xf32> to vector<16x16xf32>
    %275 = arith.subf %271, %274 : vector<16x16xf32>
    %276 = math.exp %275 : vector<16x16xf32>
    %cst_136 = arith.constant dense<0.000000e+00> : vector<16xf32>
    %277 = vector.multi_reduction <add>, %276, %cst_136 [1] : vector<16x16xf32> to vector<16xf32>
    %278 = vector.shape_cast %277 : vector<16xf32> to vector<16x1xf32>
    %279 = vector.broadcast %278 : vector<16x1xf32> to vector<16x16xf32>
    %280 = arith.divf %276, %279 : vector<16x16xf32>
    %cst_137 = arith.constant dense<0.000000e+00> : vector<16x8xf32>
    %281 = tpu.matmul %280, %267, %cst_137 {dimension_numbers = #tpu.dot_dimension_numbers<[1], [0], [0], [1], [0, 0, 1, 1], [], []>} : vector<16x16xf32>, vector<16x8xf32>, vector<16x8xf32> -> vector<16x8xf32>
    %282 = vector.extract_strided_slice %262 {offsets = [0, 8], sizes = [16, 8], strides = [1, 1]} : vector<16x32xf32> to vector<16x8xf32>
    %283 = vector.extract_strided_slice %263 {offsets = [0, 8], sizes = [16, 8], strides = [1, 1]} : vector<16x32xf32> to vector<16x8xf32>
    %284 = vector.extract_strided_slice %264 {offsets = [0, 8], sizes = [16, 8], strides = [1, 1]} : vector<16x32xf32> to vector<16x8xf32>
    "tpu.trace_start"() <{level = 10 : i32, message = "nk,mk->nm"}> : () -> ()
    %cst_138 = arith.constant dense<0.000000e+00> : vector<16x16xf32>
    %285 = tpu.matmul %282, %283, %cst_138 {dimension_numbers = #tpu.dot_dimension_numbers<[1], [1], [0], [0], [0, 0, 1, 0], [], []>} : vector<16x8xf32>, vector<16x8xf32>, vector<16x16xf32> -> vector<16x16xf32>
    "tpu.trace_stop"() : () -> ()
    %cst_139 = arith.constant 0.353553385 : f32
    %286 = vector.broadcast %cst_139 : f32 to vector<16x16xf32>
    %287 = arith.mulf %285, %286 : vector<16x16xf32>
    %288 = arith.addf %287, %3 : vector<16x16xf32>
    %cst_140 = arith.constant dense<0xFF800000> : vector<16xf32>
    %289 = vector.multi_reduction <maximumf>, %288, %cst_140 [1] : vector<16x16xf32> to vector<16xf32>
    %290 = vector.shape_cast %289 : vector<16xf32> to vector<16x1xf32>
    %291 = vector.broadcast %290 : vector<16x1xf32> to vector<16x16xf32>
    %292 = arith.subf %288, %291 : vector<16x16xf32>
    %293 = math.exp %292 : vector<16x16xf32>
    %cst_141 = arith.constant dense<0.000000e+00> : vector<16xf32>
    %294 = vector.multi_reduction <add>, %293, %cst_141 [1] : vector<16x16xf32> to vector<16xf32>
    %295 = vector.shape_cast %294 : vector<16xf32> to vector<16x1xf32>
    %296 = vector.broadcast %295 : vector<16x1xf32> to vector<16x16xf32>
    %297 = arith.divf %293, %296 : vector<16x16xf32>
    %cst_142 = arith.constant dense<0.000000e+00> : vector<16x8xf32>
    %298 = tpu.matmul %297, %284, %cst_142 {dimension_numbers = #tpu.dot_dimension_numbers<[1], [0], [0], [1], [0, 0, 1, 1], [], []>} : vector<16x16xf32>, vector<16x8xf32>, vector<16x8xf32> -> vector<16x8xf32>
    %299 = vector.extract_strided_slice %262 {offsets = [0, 16], sizes = [16, 8], strides = [1, 1]} : vector<16x32xf32> to vector<16x8xf32>
    %300 = vector.extract_strided_slice %263 {offsets = [0, 16], sizes = [16, 8], strides = [1, 1]} : vector<16x32xf32> to vector<16x8xf32>
    %301 = vector.extract_strided_slice %264 {offsets = [0, 16], sizes = [16, 8], strides = [1, 1]} : vector<16x32xf32> to vector<16x8xf32>
    "tpu.trace_start"() <{level = 10 : i32, message = "nk,mk->nm"}> : () -> ()
    %cst_143 = arith.constant dense<0.000000e+00> : vector<16x16xf32>
    %302 = tpu.matmul %299, %300, %cst_143 {dimension_numbers = #tpu.dot_dimension_numbers<[1], [1], [0], [0], [0, 0, 1, 0], [], []>} : vector<16x8xf32>, vector<16x8xf32>, vector<16x16xf32> -> vector<16x16xf32>
    "tpu.trace_stop"() : () -> ()
    %cst_144 = arith.constant 0.353553385 : f32
    %303 = vector.broadcast %cst_144 : f32 to vector<16x16xf32>
    %304 = arith.mulf %302, %303 : vector<16x16xf32>
    %305 = arith.addf %304, %3 : vector<16x16xf32>
    %cst_145 = arith.constant dense<0xFF800000> : vector<16xf32>
    %306 = vector.multi_reduction <maximumf>, %305, %cst_145 [1] : vector<16x16xf32> to vector<16xf32>
    %307 = vector.shape_cast %306 : vector<16xf32> to vector<16x1xf32>
    %308 = vector.broadcast %307 : vector<16x1xf32> to vector<16x16xf32>
    %309 = arith.subf %305, %308 : vector<16x16xf32>
    %310 = math.exp %309 : vector<16x16xf32>
    %cst_146 = arith.constant dense<0.000000e+00> : vector<16xf32>
    %311 = vector.multi_reduction <add>, %310, %cst_146 [1] : vector<16x16xf32> to vector<16xf32>
    %312 = vector.shape_cast %311 : vector<16xf32> to vector<16x1xf32>
    %313 = vector.broadcast %312 : vector<16x1xf32> to vector<16x16xf32>
    %314 = arith.divf %310, %313 : vector<16x16xf32>
    %cst_147 = arith.constant dense<0.000000e+00> : vector<16x8xf32>
    %315 = tpu.matmul %314, %301, %cst_147 {dimension_numbers = #tpu.dot_dimension_numbers<[1], [0], [0], [1], [0, 0, 1, 1], [], []>} : vector<16x16xf32>, vector<16x8xf32>, vector<16x8xf32> -> vector<16x8xf32>
    %316 = vector.extract_strided_slice %262 {offsets = [0, 24], sizes = [16, 8], strides = [1, 1]} : vector<16x32xf32> to vector<16x8xf32>
    %317 = vector.extract_strided_slice %263 {offsets = [0, 24], sizes = [16, 8], strides = [1, 1]} : vector<16x32xf32> to vector<16x8xf32>
    %318 = vector.extract_strided_slice %264 {offsets = [0, 24], sizes = [16, 8], strides = [1, 1]} : vector<16x32xf32> to vector<16x8xf32>
    "tpu.trace_start"() <{level = 10 : i32, message = "nk,mk->nm"}> : () -> ()
    %cst_148 = arith.constant dense<0.000000e+00> : vector<16x16xf32>
    %319 = tpu.matmul %316, %317, %cst_148 {dimension_numbers = #tpu.dot_dimension_numbers<[1], [1], [0], [0], [0, 0, 1, 0], [], []>} : vector<16x8xf32>, vector<16x8xf32>, vector<16x16xf32> -> vector<16x16xf32>
    "tpu.trace_stop"() : () -> ()
    %cst_149 = arith.constant 0.353553385 : f32
    %320 = vector.broadcast %cst_149 : f32 to vector<16x16xf32>
    %321 = arith.mulf %319, %320 : vector<16x16xf32>
    %322 = arith.addf %321, %3 : vector<16x16xf32>
    %cst_150 = arith.constant dense<0xFF800000> : vector<16xf32>
    %323 = vector.multi_reduction <maximumf>, %322, %cst_150 [1] : vector<16x16xf32> to vector<16xf32>
    %324 = vector.shape_cast %323 : vector<16xf32> to vector<16x1xf32>
    %325 = vector.broadcast %324 : vector<16x1xf32> to vector<16x16xf32>
    %326 = arith.subf %322, %325 : vector<16x16xf32>
    %327 = math.exp %326 : vector<16x16xf32>
    %cst_151 = arith.constant dense<0.000000e+00> : vector<16xf32>
    %328 = vector.multi_reduction <add>, %327, %cst_151 [1] : vector<16x16xf32> to vector<16xf32>
    %329 = vector.shape_cast %328 : vector<16xf32> to vector<16x1xf32>
    %330 = vector.broadcast %329 : vector<16x1xf32> to vector<16x16xf32>
    %331 = arith.divf %327, %330 : vector<16x16xf32>
    %cst_152 = arith.constant dense<0.000000e+00> : vector<16x8xf32>
    %332 = tpu.matmul %331, %318, %cst_152 {dimension_numbers = #tpu.dot_dimension_numbers<[1], [0], [0], [1], [0, 0, 1, 1], [], []>} : vector<16x16xf32>, vector<16x8xf32>, vector<16x8xf32> -> vector<16x8xf32>
    %333 = tpu.concatenate %281, %298, %315, %332 in 1 : vector<16x8xf32>, vector<16x8xf32>, vector<16x8xf32>, vector<16x8xf32> -> vector<16x32xf32>
    %cst_153 = arith.constant dense<0.000000e+00> : vector<16x32xf32>
    %334 = tpu.matmul %333, %257, %cst_153 {dimension_numbers = #tpu.dot_dimension_numbers<[1], [0], [0], [1], [0, 0, 1, 1], [], []>} : vector<16x32xf32>, vector<32x32xf32>, vector<16x32xf32> -> vector<16x32xf32>
    %335 = arith.addf %334, %249 : vector<16x32xf32>
    %cst_154 = arith.constant dense<0.000000e+00> : vector<16xf32>
    %336 = vector.multi_reduction <add>, %335, %cst_154 [1] : vector<16x32xf32> to vector<16xf32>
    %337 = vector.shape_cast %336 : vector<16xf32> to vector<16x1xf32>
    %cst_155 = arith.constant 3.200000e+01 : f32
    %338 = vector.broadcast %cst_155 : f32 to vector<16x1xf32>
    %339 = arith.divf %337, %338 : vector<16x1xf32>
    %340 = vector.broadcast %339 : vector<16x1xf32> to vector<16x32xf32>
    %341 = arith.subf %335, %340 : vector<16x32xf32>
    %342 = arith.mulf %341, %341 : vector<16x32xf32>
    %cst_156 = arith.constant dense<0.000000e+00> : vector<16xf32>
    %343 = vector.multi_reduction <add>, %342, %cst_156 [1] : vector<16x32xf32> to vector<16xf32>
    %344 = vector.shape_cast %343 : vector<16xf32> to vector<16x1xf32>
    %cst_157 = arith.constant 3.200000e+01 : f32
    %345 = vector.broadcast %cst_157 : f32 to vector<16x1xf32>
    %346 = arith.divf %344, %345 : vector<16x1xf32>
    %cst_158 = arith.constant 9.99999974E-6 : f32
    %347 = vector.broadcast %cst_158 : f32 to vector<16x1xf32>
    %348 = arith.addf %346, %347 : vector<16x1xf32>
    %349 = math.rsqrt %348 : vector<16x1xf32>
    %350 = vector.broadcast %349 : vector<16x1xf32> to vector<16x32xf32>
    %351 = arith.mulf %341, %350 : vector<16x32xf32>
    %cst_159 = arith.constant dense<0.000000e+00> : vector<16x64xf32>
    %352 = tpu.matmul %351, %259, %cst_159 {dimension_numbers = #tpu.dot_dimension_numbers<[1], [0], [0], [1], [0, 0, 1, 1], [], []>} : vector<16x32xf32>, vector<32x64xf32>, vector<16x64xf32> -> vector<16x64xf32>
    %cst_160 = arith.constant 0.000000e+00 : f32
    %353 = vector.broadcast %cst_160 : f32 to vector<16x64xf32>
    %354 = arith.maximumf %352, %353 : vector<16x64xf32>
    %cst_161 = arith.constant dense<0.000000e+00> : vector<16x32xf32>
    %355 = tpu.matmul %354, %261, %cst_161 {dimension_numbers = #tpu.dot_dimension_numbers<[1], [0], [0], [1], [0, 0, 1, 1], [], []>} : vector<16x64xf32>, vector<64x32xf32>, vector<16x32xf32> -> vector<16x32xf32>
    %356 = arith.addf %355, %351 : vector<16x32xf32>
    %cst_162 = arith.constant dense<0.000000e+00> : vector<16xf32>
    %357 = vector.multi_reduction <add>, %356, %cst_162 [1] : vector<16x32xf32> to vector<16xf32>
    %358 = vector.shape_cast %357 : vector<16xf32> to vector<16x1xf32>
    %cst_163 = arith.constant 3.200000e+01 : f32
    %359 = vector.broadcast %cst_163 : f32 to vector<16x1xf32>
    %360 = arith.divf %358, %359 : vector<16x1xf32>
    %361 = vector.broadcast %360 : vector<16x1xf32> to vector<16x32xf32>
    %362 = arith.subf %356, %361 : vector<16x32xf32>
    %363 = arith.mulf %362, %362 : vector<16x32xf32>
    %cst_164 = arith.constant dense<0.000000e+00> : vector<16xf32>
    %364 = vector.multi_reduction <add>, %363, %cst_164 [1] : vector<16x32xf32> to vector<16xf32>
    %365 = vector.shape_cast %364 : vector<16xf32> to vector<16x1xf32>
    %cst_165 = arith.constant 3.200000e+01 : f32
    %366 = vector.broadcast %cst_165 : f32 to vector<16x1xf32>
    %367 = arith.divf %365, %366 : vector<16x1xf32>
    %cst_166 = arith.constant 9.99999974E-6 : f32
    %368 = vector.broadcast %cst_166 : f32 to vector<16x1xf32>
    %369 = arith.addf %367, %368 : vector<16x1xf32>
    %370 = math.rsqrt %369 : vector<16x1xf32>
    %371 = vector.broadcast %370 : vector<16x1xf32> to vector<16x32xf32>
    %372 = arith.mulf %362, %371 : vector<16x32xf32>
    %c3 = arith.constant 3 : index
    %c0_167 = arith.constant 0 : index
    %c0_168 = arith.constant 0 : index
    %373 = vector.load %arg3[%c3, %c0_167, %c0_168] : memref<6x32x32xf32, #tpu.memory_space<vmem>>, vector<1x32x32xf32>
    %374 = vector.shape_cast %373 : vector<1x32x32xf32> to vector<32x32xf32>
    %c3_169 = arith.constant 3 : index
    %c0_170 = arith.constant 0 : index
    %c0_171 = arith.constant 0 : index
    %375 = vector.load %arg4[%c3_169, %c0_170, %c0_171] : memref<6x32x32xf32, #tpu.memory_space<vmem>>, vector<1x32x32xf32>
    %376 = vector.shape_cast %375 : vector<1x32x32xf32> to vector<32x32xf32>
    %c3_172 = arith.constant 3 : index
    %c0_173 = arith.constant 0 : index
    %c0_174 = arith.constant 0 : index
    %377 = vector.load %arg5[%c3_172, %c0_173, %c0_174] : memref<6x32x32xf32, #tpu.memory_space<vmem>>, vector<1x32x32xf32>
    %378 = vector.shape_cast %377 : vector<1x32x32xf32> to vector<32x32xf32>
    %c3_175 = arith.constant 3 : index
    %c0_176 = arith.constant 0 : index
    %c0_177 = arith.constant 0 : index
    %379 = vector.load %arg6[%c3_175, %c0_176, %c0_177] : memref<6x32x32xf32, #tpu.memory_space<vmem>>, vector<1x32x32xf32>
    %380 = vector.shape_cast %379 : vector<1x32x32xf32> to vector<32x32xf32>
    %c3_178 = arith.constant 3 : index
    %c0_179 = arith.constant 0 : index
    %c0_180 = arith.constant 0 : index
    %381 = vector.load %arg7[%c3_178, %c0_179, %c0_180] : memref<6x32x64xf32, #tpu.memory_space<vmem>>, vector<1x32x64xf32>
    %382 = vector.shape_cast %381 : vector<1x32x64xf32> to vector<32x64xf32>
    %c3_181 = arith.constant 3 : index
    %c0_182 = arith.constant 0 : index
    %c0_183 = arith.constant 0 : index
    %383 = vector.load %arg8[%c3_181, %c0_182, %c0_183] : memref<6x64x32xf32, #tpu.memory_space<vmem>>, vector<1x64x32xf32>
    %384 = vector.shape_cast %383 : vector<1x64x32xf32> to vector<64x32xf32>
    %cst_184 = arith.constant dense<0.000000e+00> : vector<16x32xf32>
    %385 = tpu.matmul %372, %374, %cst_184 {dimension_numbers = #tpu.dot_dimension_numbers<[1], [0], [0], [1], [0, 0, 1, 1], [], []>} : vector<16x32xf32>, vector<32x32xf32>, vector<16x32xf32> -> vector<16x32xf32>
    %cst_185 = arith.constant dense<0.000000e+00> : vector<16x32xf32>
    %386 = tpu.matmul %372, %376, %cst_185 {dimension_numbers = #tpu.dot_dimension_numbers<[1], [0], [0], [1], [0, 0, 1, 1], [], []>} : vector<16x32xf32>, vector<32x32xf32>, vector<16x32xf32> -> vector<16x32xf32>
    %cst_186 = arith.constant dense<0.000000e+00> : vector<16x32xf32>
    %387 = tpu.matmul %372, %378, %cst_186 {dimension_numbers = #tpu.dot_dimension_numbers<[1], [0], [0], [1], [0, 0, 1, 1], [], []>} : vector<16x32xf32>, vector<32x32xf32>, vector<16x32xf32> -> vector<16x32xf32>
    %388 = vector.extract_strided_slice %385 {offsets = [0, 0], sizes = [16, 8], strides = [1, 1]} : vector<16x32xf32> to vector<16x8xf32>
    %389 = vector.extract_strided_slice %386 {offsets = [0, 0], sizes = [16, 8], strides = [1, 1]} : vector<16x32xf32> to vector<16x8xf32>
    %390 = vector.extract_strided_slice %387 {offsets = [0, 0], sizes = [16, 8], strides = [1, 1]} : vector<16x32xf32> to vector<16x8xf32>
    "tpu.trace_start"() <{level = 10 : i32, message = "nk,mk->nm"}> : () -> ()
    %cst_187 = arith.constant dense<0.000000e+00> : vector<16x16xf32>
    %391 = tpu.matmul %388, %389, %cst_187 {dimension_numbers = #tpu.dot_dimension_numbers<[1], [1], [0], [0], [0, 0, 1, 0], [], []>} : vector<16x8xf32>, vector<16x8xf32>, vector<16x16xf32> -> vector<16x16xf32>
    "tpu.trace_stop"() : () -> ()
    %cst_188 = arith.constant 0.353553385 : f32
    %392 = vector.broadcast %cst_188 : f32 to vector<16x16xf32>
    %393 = arith.mulf %391, %392 : vector<16x16xf32>
    %394 = arith.addf %393, %3 : vector<16x16xf32>
    %cst_189 = arith.constant dense<0xFF800000> : vector<16xf32>
    %395 = vector.multi_reduction <maximumf>, %394, %cst_189 [1] : vector<16x16xf32> to vector<16xf32>
    %396 = vector.shape_cast %395 : vector<16xf32> to vector<16x1xf32>
    %397 = vector.broadcast %396 : vector<16x1xf32> to vector<16x16xf32>
    %398 = arith.subf %394, %397 : vector<16x16xf32>
    %399 = math.exp %398 : vector<16x16xf32>
    %cst_190 = arith.constant dense<0.000000e+00> : vector<16xf32>
    %400 = vector.multi_reduction <add>, %399, %cst_190 [1] : vector<16x16xf32> to vector<16xf32>
    %401 = vector.shape_cast %400 : vector<16xf32> to vector<16x1xf32>
    %402 = vector.broadcast %401 : vector<16x1xf32> to vector<16x16xf32>
    %403 = arith.divf %399, %402 : vector<16x16xf32>
    %cst_191 = arith.constant dense<0.000000e+00> : vector<16x8xf32>
    %404 = tpu.matmul %403, %390, %cst_191 {dimension_numbers = #tpu.dot_dimension_numbers<[1], [0], [0], [1], [0, 0, 1, 1], [], []>} : vector<16x16xf32>, vector<16x8xf32>, vector<16x8xf32> -> vector<16x8xf32>
    %405 = vector.extract_strided_slice %385 {offsets = [0, 8], sizes = [16, 8], strides = [1, 1]} : vector<16x32xf32> to vector<16x8xf32>
    %406 = vector.extract_strided_slice %386 {offsets = [0, 8], sizes = [16, 8], strides = [1, 1]} : vector<16x32xf32> to vector<16x8xf32>
    %407 = vector.extract_strided_slice %387 {offsets = [0, 8], sizes = [16, 8], strides = [1, 1]} : vector<16x32xf32> to vector<16x8xf32>
    "tpu.trace_start"() <{level = 10 : i32, message = "nk,mk->nm"}> : () -> ()
    %cst_192 = arith.constant dense<0.000000e+00> : vector<16x16xf32>
    %408 = tpu.matmul %405, %406, %cst_192 {dimension_numbers = #tpu.dot_dimension_numbers<[1], [1], [0], [0], [0, 0, 1, 0], [], []>} : vector<16x8xf32>, vector<16x8xf32>, vector<16x16xf32> -> vector<16x16xf32>
    "tpu.trace_stop"() : () -> ()
    %cst_193 = arith.constant 0.353553385 : f32
    %409 = vector.broadcast %cst_193 : f32 to vector<16x16xf32>
    %410 = arith.mulf %408, %409 : vector<16x16xf32>
    %411 = arith.addf %410, %3 : vector<16x16xf32>
    %cst_194 = arith.constant dense<0xFF800000> : vector<16xf32>
    %412 = vector.multi_reduction <maximumf>, %411, %cst_194 [1] : vector<16x16xf32> to vector<16xf32>
    %413 = vector.shape_cast %412 : vector<16xf32> to vector<16x1xf32>
    %414 = vector.broadcast %413 : vector<16x1xf32> to vector<16x16xf32>
    %415 = arith.subf %411, %414 : vector<16x16xf32>
    %416 = math.exp %415 : vector<16x16xf32>
    %cst_195 = arith.constant dense<0.000000e+00> : vector<16xf32>
    %417 = vector.multi_reduction <add>, %416, %cst_195 [1] : vector<16x16xf32> to vector<16xf32>
    %418 = vector.shape_cast %417 : vector<16xf32> to vector<16x1xf32>
    %419 = vector.broadcast %418 : vector<16x1xf32> to vector<16x16xf32>
    %420 = arith.divf %416, %419 : vector<16x16xf32>
    %cst_196 = arith.constant dense<0.000000e+00> : vector<16x8xf32>
    %421 = tpu.matmul %420, %407, %cst_196 {dimension_numbers = #tpu.dot_dimension_numbers<[1], [0], [0], [1], [0, 0, 1, 1], [], []>} : vector<16x16xf32>, vector<16x8xf32>, vector<16x8xf32> -> vector<16x8xf32>
    %422 = vector.extract_strided_slice %385 {offsets = [0, 16], sizes = [16, 8], strides = [1, 1]} : vector<16x32xf32> to vector<16x8xf32>
    %423 = vector.extract_strided_slice %386 {offsets = [0, 16], sizes = [16, 8], strides = [1, 1]} : vector<16x32xf32> to vector<16x8xf32>
    %424 = vector.extract_strided_slice %387 {offsets = [0, 16], sizes = [16, 8], strides = [1, 1]} : vector<16x32xf32> to vector<16x8xf32>
    "tpu.trace_start"() <{level = 10 : i32, message = "nk,mk->nm"}> : () -> ()
    %cst_197 = arith.constant dense<0.000000e+00> : vector<16x16xf32>
    %425 = tpu.matmul %422, %423, %cst_197 {dimension_numbers = #tpu.dot_dimension_numbers<[1], [1], [0], [0], [0, 0, 1, 0], [], []>} : vector<16x8xf32>, vector<16x8xf32>, vector<16x16xf32> -> vector<16x16xf32>
    "tpu.trace_stop"() : () -> ()
    %cst_198 = arith.constant 0.353553385 : f32
    %426 = vector.broadcast %cst_198 : f32 to vector<16x16xf32>
    %427 = arith.mulf %425, %426 : vector<16x16xf32>
    %428 = arith.addf %427, %3 : vector<16x16xf32>
    %cst_199 = arith.constant dense<0xFF800000> : vector<16xf32>
    %429 = vector.multi_reduction <maximumf>, %428, %cst_199 [1] : vector<16x16xf32> to vector<16xf32>
    %430 = vector.shape_cast %429 : vector<16xf32> to vector<16x1xf32>
    %431 = vector.broadcast %430 : vector<16x1xf32> to vector<16x16xf32>
    %432 = arith.subf %428, %431 : vector<16x16xf32>
    %433 = math.exp %432 : vector<16x16xf32>
    %cst_200 = arith.constant dense<0.000000e+00> : vector<16xf32>
    %434 = vector.multi_reduction <add>, %433, %cst_200 [1] : vector<16x16xf32> to vector<16xf32>
    %435 = vector.shape_cast %434 : vector<16xf32> to vector<16x1xf32>
    %436 = vector.broadcast %435 : vector<16x1xf32> to vector<16x16xf32>
    %437 = arith.divf %433, %436 : vector<16x16xf32>
    %cst_201 = arith.constant dense<0.000000e+00> : vector<16x8xf32>
    %438 = tpu.matmul %437, %424, %cst_201 {dimension_numbers = #tpu.dot_dimension_numbers<[1], [0], [0], [1], [0, 0, 1, 1], [], []>} : vector<16x16xf32>, vector<16x8xf32>, vector<16x8xf32> -> vector<16x8xf32>
    %439 = vector.extract_strided_slice %385 {offsets = [0, 24], sizes = [16, 8], strides = [1, 1]} : vector<16x32xf32> to vector<16x8xf32>
    %440 = vector.extract_strided_slice %386 {offsets = [0, 24], sizes = [16, 8], strides = [1, 1]} : vector<16x32xf32> to vector<16x8xf32>
    %441 = vector.extract_strided_slice %387 {offsets = [0, 24], sizes = [16, 8], strides = [1, 1]} : vector<16x32xf32> to vector<16x8xf32>
    "tpu.trace_start"() <{level = 10 : i32, message = "nk,mk->nm"}> : () -> ()
    %cst_202 = arith.constant dense<0.000000e+00> : vector<16x16xf32>
    %442 = tpu.matmul %439, %440, %cst_202 {dimension_numbers = #tpu.dot_dimension_numbers<[1], [1], [0], [0], [0, 0, 1, 0], [], []>} : vector<16x8xf32>, vector<16x8xf32>, vector<16x16xf32> -> vector<16x16xf32>
    "tpu.trace_stop"() : () -> ()
    %cst_203 = arith.constant 0.353553385 : f32
    %443 = vector.broadcast %cst_203 : f32 to vector<16x16xf32>
    %444 = arith.mulf %442, %443 : vector<16x16xf32>
    %445 = arith.addf %444, %3 : vector<16x16xf32>
    %cst_204 = arith.constant dense<0xFF800000> : vector<16xf32>
    %446 = vector.multi_reduction <maximumf>, %445, %cst_204 [1] : vector<16x16xf32> to vector<16xf32>
    %447 = vector.shape_cast %446 : vector<16xf32> to vector<16x1xf32>
    %448 = vector.broadcast %447 : vector<16x1xf32> to vector<16x16xf32>
    %449 = arith.subf %445, %448 : vector<16x16xf32>
    %450 = math.exp %449 : vector<16x16xf32>
    %cst_205 = arith.constant dense<0.000000e+00> : vector<16xf32>
    %451 = vector.multi_reduction <add>, %450, %cst_205 [1] : vector<16x16xf32> to vector<16xf32>
    %452 = vector.shape_cast %451 : vector<16xf32> to vector<16x1xf32>
    %453 = vector.broadcast %452 : vector<16x1xf32> to vector<16x16xf32>
    %454 = arith.divf %450, %453 : vector<16x16xf32>
    %cst_206 = arith.constant dense<0.000000e+00> : vector<16x8xf32>
    %455 = tpu.matmul %454, %441, %cst_206 {dimension_numbers = #tpu.dot_dimension_numbers<[1], [0], [0], [1], [0, 0, 1, 1], [], []>} : vector<16x16xf32>, vector<16x8xf32>, vector<16x8xf32> -> vector<16x8xf32>
    %456 = tpu.concatenate %404, %421, %438, %455 in 1 : vector<16x8xf32>, vector<16x8xf32>, vector<16x8xf32>, vector<16x8xf32> -> vector<16x32xf32>
    %cst_207 = arith.constant dense<0.000000e+00> : vector<16x32xf32>
    %457 = tpu.matmul %456, %380, %cst_207 {dimension_numbers = #tpu.dot_dimension_numbers<[1], [0], [0], [1], [0, 0, 1, 1], [], []>} : vector<16x32xf32>, vector<32x32xf32>, vector<16x32xf32> -> vector<16x32xf32>
    %458 = arith.addf %457, %372 : vector<16x32xf32>
    %cst_208 = arith.constant dense<0.000000e+00> : vector<16xf32>
    %459 = vector.multi_reduction <add>, %458, %cst_208 [1] : vector<16x32xf32> to vector<16xf32>
    %460 = vector.shape_cast %459 : vector<16xf32> to vector<16x1xf32>
    %cst_209 = arith.constant 3.200000e+01 : f32
    %461 = vector.broadcast %cst_209 : f32 to vector<16x1xf32>
    %462 = arith.divf %460, %461 : vector<16x1xf32>
    %463 = vector.broadcast %462 : vector<16x1xf32> to vector<16x32xf32>
    %464 = arith.subf %458, %463 : vector<16x32xf32>
    %465 = arith.mulf %464, %464 : vector<16x32xf32>
    %cst_210 = arith.constant dense<0.000000e+00> : vector<16xf32>
    %466 = vector.multi_reduction <add>, %465, %cst_210 [1] : vector<16x32xf32> to vector<16xf32>
    %467 = vector.shape_cast %466 : vector<16xf32> to vector<16x1xf32>
    %cst_211 = arith.constant 3.200000e+01 : f32
    %468 = vector.broadcast %cst_211 : f32 to vector<16x1xf32>
    %469 = arith.divf %467, %468 : vector<16x1xf32>
    %cst_212 = arith.constant 9.99999974E-6 : f32
    %470 = vector.broadcast %cst_212 : f32 to vector<16x1xf32>
    %471 = arith.addf %469, %470 : vector<16x1xf32>
    %472 = math.rsqrt %471 : vector<16x1xf32>
    %473 = vector.broadcast %472 : vector<16x1xf32> to vector<16x32xf32>
    %474 = arith.mulf %464, %473 : vector<16x32xf32>
    %cst_213 = arith.constant dense<0.000000e+00> : vector<16x64xf32>
    %475 = tpu.matmul %474, %382, %cst_213 {dimension_numbers = #tpu.dot_dimension_numbers<[1], [0], [0], [1], [0, 0, 1, 1], [], []>} : vector<16x32xf32>, vector<32x64xf32>, vector<16x64xf32> -> vector<16x64xf32>
    %cst_214 = arith.constant 0.000000e+00 : f32
    %476 = vector.broadcast %cst_214 : f32 to vector<16x64xf32>
    %477 = arith.maximumf %475, %476 : vector<16x64xf32>
    %cst_215 = arith.constant dense<0.000000e+00> : vector<16x32xf32>
    %478 = tpu.matmul %477, %384, %cst_215 {dimension_numbers = #tpu.dot_dimension_numbers<[1], [0], [0], [1], [0, 0, 1, 1], [], []>} : vector<16x64xf32>, vector<64x32xf32>, vector<16x32xf32> -> vector<16x32xf32>
    %479 = arith.addf %478, %474 : vector<16x32xf32>
    %cst_216 = arith.constant dense<0.000000e+00> : vector<16xf32>
    %480 = vector.multi_reduction <add>, %479, %cst_216 [1] : vector<16x32xf32> to vector<16xf32>
    %481 = vector.shape_cast %480 : vector<16xf32> to vector<16x1xf32>
    %cst_217 = arith.constant 3.200000e+01 : f32
    %482 = vector.broadcast %cst_217 : f32 to vector<16x1xf32>
    %483 = arith.divf %481, %482 : vector<16x1xf32>
    %484 = vector.broadcast %483 : vector<16x1xf32> to vector<16x32xf32>
    %485 = arith.subf %479, %484 : vector<16x32xf32>
    %486 = arith.mulf %485, %485 : vector<16x32xf32>
    %cst_218 = arith.constant dense<0.000000e+00> : vector<16xf32>
    %487 = vector.multi_reduction <add>, %486, %cst_218 [1] : vector<16x32xf32> to vector<16xf32>
    %488 = vector.shape_cast %487 : vector<16xf32> to vector<16x1xf32>
    %cst_219 = arith.constant 3.200000e+01 : f32
    %489 = vector.broadcast %cst_219 : f32 to vector<16x1xf32>
    %490 = arith.divf %488, %489 : vector<16x1xf32>
    %cst_220 = arith.constant 9.99999974E-6 : f32
    %491 = vector.broadcast %cst_220 : f32 to vector<16x1xf32>
    %492 = arith.addf %490, %491 : vector<16x1xf32>
    %493 = math.rsqrt %492 : vector<16x1xf32>
    %494 = vector.broadcast %493 : vector<16x1xf32> to vector<16x32xf32>
    %495 = arith.mulf %485, %494 : vector<16x32xf32>
    %c4 = arith.constant 4 : index
    %c0_221 = arith.constant 0 : index
    %c0_222 = arith.constant 0 : index
    %496 = vector.load %arg3[%c4, %c0_221, %c0_222] : memref<6x32x32xf32, #tpu.memory_space<vmem>>, vector<1x32x32xf32>
    %497 = vector.shape_cast %496 : vector<1x32x32xf32> to vector<32x32xf32>
    %c4_223 = arith.constant 4 : index
    %c0_224 = arith.constant 0 : index
    %c0_225 = arith.constant 0 : index
    %498 = vector.load %arg4[%c4_223, %c0_224, %c0_225] : memref<6x32x32xf32, #tpu.memory_space<vmem>>, vector<1x32x32xf32>
    %499 = vector.shape_cast %498 : vector<1x32x32xf32> to vector<32x32xf32>
    %c4_226 = arith.constant 4 : index
    %c0_227 = arith.constant 0 : index
    %c0_228 = arith.constant 0 : index
    %500 = vector.load %arg5[%c4_226, %c0_227, %c0_228] : memref<6x32x32xf32, #tpu.memory_space<vmem>>, vector<1x32x32xf32>
    %501 = vector.shape_cast %500 : vector<1x32x32xf32> to vector<32x32xf32>
    %c4_229 = arith.constant 4 : index
    %c0_230 = arith.constant 0 : index
    %c0_231 = arith.constant 0 : index
    %502 = vector.load %arg6[%c4_229, %c0_230, %c0_231] : memref<6x32x32xf32, #tpu.memory_space<vmem>>, vector<1x32x32xf32>
    %503 = vector.shape_cast %502 : vector<1x32x32xf32> to vector<32x32xf32>
    %c4_232 = arith.constant 4 : index
    %c0_233 = arith.constant 0 : index
    %c0_234 = arith.constant 0 : index
    %504 = vector.load %arg7[%c4_232, %c0_233, %c0_234] : memref<6x32x64xf32, #tpu.memory_space<vmem>>, vector<1x32x64xf32>
    %505 = vector.shape_cast %504 : vector<1x32x64xf32> to vector<32x64xf32>
    %c4_235 = arith.constant 4 : index
    %c0_236 = arith.constant 0 : index
    %c0_237 = arith.constant 0 : index
    %506 = vector.load %arg8[%c4_235, %c0_236, %c0_237] : memref<6x64x32xf32, #tpu.memory_space<vmem>>, vector<1x64x32xf32>
    %507 = vector.shape_cast %506 : vector<1x64x32xf32> to vector<64x32xf32>
    %cst_238 = arith.constant dense<0.000000e+00> : vector<16x32xf32>
    %508 = tpu.matmul %495, %497, %cst_238 {dimension_numbers = #tpu.dot_dimension_numbers<[1], [0], [0], [1], [0, 0, 1, 1], [], []>} : vector<16x32xf32>, vector<32x32xf32>, vector<16x32xf32> -> vector<16x32xf32>
    %cst_239 = arith.constant dense<0.000000e+00> : vector<16x32xf32>
    %509 = tpu.matmul %495, %499, %cst_239 {dimension_numbers = #tpu.dot_dimension_numbers<[1], [0], [0], [1], [0, 0, 1, 1], [], []>} : vector<16x32xf32>, vector<32x32xf32>, vector<16x32xf32> -> vector<16x32xf32>
    %cst_240 = arith.constant dense<0.000000e+00> : vector<16x32xf32>
    %510 = tpu.matmul %495, %501, %cst_240 {dimension_numbers = #tpu.dot_dimension_numbers<[1], [0], [0], [1], [0, 0, 1, 1], [], []>} : vector<16x32xf32>, vector<32x32xf32>, vector<16x32xf32> -> vector<16x32xf32>
    %511 = vector.extract_strided_slice %508 {offsets = [0, 0], sizes = [16, 8], strides = [1, 1]} : vector<16x32xf32> to vector<16x8xf32>
    %512 = vector.extract_strided_slice %509 {offsets = [0, 0], sizes = [16, 8], strides = [1, 1]} : vector<16x32xf32> to vector<16x8xf32>
    %513 = vector.extract_strided_slice %510 {offsets = [0, 0], sizes = [16, 8], strides = [1, 1]} : vector<16x32xf32> to vector<16x8xf32>
    "tpu.trace_start"() <{level = 10 : i32, message = "nk,mk->nm"}> : () -> ()
    %cst_241 = arith.constant dense<0.000000e+00> : vector<16x16xf32>
    %514 = tpu.matmul %511, %512, %cst_241 {dimension_numbers = #tpu.dot_dimension_numbers<[1], [1], [0], [0], [0, 0, 1, 0], [], []>} : vector<16x8xf32>, vector<16x8xf32>, vector<16x16xf32> -> vector<16x16xf32>
    "tpu.trace_stop"() : () -> ()
    %cst_242 = arith.constant 0.353553385 : f32
    %515 = vector.broadcast %cst_242 : f32 to vector<16x16xf32>
    %516 = arith.mulf %514, %515 : vector<16x16xf32>
    %517 = arith.addf %516, %3 : vector<16x16xf32>
    %cst_243 = arith.constant dense<0xFF800000> : vector<16xf32>
    %518 = vector.multi_reduction <maximumf>, %517, %cst_243 [1] : vector<16x16xf32> to vector<16xf32>
    %519 = vector.shape_cast %518 : vector<16xf32> to vector<16x1xf32>
    %520 = vector.broadcast %519 : vector<16x1xf32> to vector<16x16xf32>
    %521 = arith.subf %517, %520 : vector<16x16xf32>
    %522 = math.exp %521 : vector<16x16xf32>
    %cst_244 = arith.constant dense<0.000000e+00> : vector<16xf32>
    %523 = vector.multi_reduction <add>, %522, %cst_244 [1] : vector<16x16xf32> to vector<16xf32>
    %524 = vector.shape_cast %523 : vector<16xf32> to vector<16x1xf32>
    %525 = vector.broadcast %524 : vector<16x1xf32> to vector<16x16xf32>
    %526 = arith.divf %522, %525 : vector<16x16xf32>
    %cst_245 = arith.constant dense<0.000000e+00> : vector<16x8xf32>
    %527 = tpu.matmul %526, %513, %cst_245 {dimension_numbers = #tpu.dot_dimension_numbers<[1], [0], [0], [1], [0, 0, 1, 1], [], []>} : vector<16x16xf32>, vector<16x8xf32>, vector<16x8xf32> -> vector<16x8xf32>
    %528 = vector.extract_strided_slice %508 {offsets = [0, 8], sizes = [16, 8], strides = [1, 1]} : vector<16x32xf32> to vector<16x8xf32>
    %529 = vector.extract_strided_slice %509 {offsets = [0, 8], sizes = [16, 8], strides = [1, 1]} : vector<16x32xf32> to vector<16x8xf32>
    %530 = vector.extract_strided_slice %510 {offsets = [0, 8], sizes = [16, 8], strides = [1, 1]} : vector<16x32xf32> to vector<16x8xf32>
    "tpu.trace_start"() <{level = 10 : i32, message = "nk,mk->nm"}> : () -> ()
    %cst_246 = arith.constant dense<0.000000e+00> : vector<16x16xf32>
    %531 = tpu.matmul %528, %529, %cst_246 {dimension_numbers = #tpu.dot_dimension_numbers<[1], [1], [0], [0], [0, 0, 1, 0], [], []>} : vector<16x8xf32>, vector<16x8xf32>, vector<16x16xf32> -> vector<16x16xf32>
    "tpu.trace_stop"() : () -> ()
    %cst_247 = arith.constant 0.353553385 : f32
    %532 = vector.broadcast %cst_247 : f32 to vector<16x16xf32>
    %533 = arith.mulf %531, %532 : vector<16x16xf32>
    %534 = arith.addf %533, %3 : vector<16x16xf32>
    %cst_248 = arith.constant dense<0xFF800000> : vector<16xf32>
    %535 = vector.multi_reduction <maximumf>, %534, %cst_248 [1] : vector<16x16xf32> to vector<16xf32>
    %536 = vector.shape_cast %535 : vector<16xf32> to vector<16x1xf32>
    %537 = vector.broadcast %536 : vector<16x1xf32> to vector<16x16xf32>
    %538 = arith.subf %534, %537 : vector<16x16xf32>
    %539 = math.exp %538 : vector<16x16xf32>
    %cst_249 = arith.constant dense<0.000000e+00> : vector<16xf32>
    %540 = vector.multi_reduction <add>, %539, %cst_249 [1] : vector<16x16xf32> to vector<16xf32>
    %541 = vector.shape_cast %540 : vector<16xf32> to vector<16x1xf32>
    %542 = vector.broadcast %541 : vector<16x1xf32> to vector<16x16xf32>
    %543 = arith.divf %539, %542 : vector<16x16xf32>
    %cst_250 = arith.constant dense<0.000000e+00> : vector<16x8xf32>
    %544 = tpu.matmul %543, %530, %cst_250 {dimension_numbers = #tpu.dot_dimension_numbers<[1], [0], [0], [1], [0, 0, 1, 1], [], []>} : vector<16x16xf32>, vector<16x8xf32>, vector<16x8xf32> -> vector<16x8xf32>
    %545 = vector.extract_strided_slice %508 {offsets = [0, 16], sizes = [16, 8], strides = [1, 1]} : vector<16x32xf32> to vector<16x8xf32>
    %546 = vector.extract_strided_slice %509 {offsets = [0, 16], sizes = [16, 8], strides = [1, 1]} : vector<16x32xf32> to vector<16x8xf32>
    %547 = vector.extract_strided_slice %510 {offsets = [0, 16], sizes = [16, 8], strides = [1, 1]} : vector<16x32xf32> to vector<16x8xf32>
    "tpu.trace_start"() <{level = 10 : i32, message = "nk,mk->nm"}> : () -> ()
    %cst_251 = arith.constant dense<0.000000e+00> : vector<16x16xf32>
    %548 = tpu.matmul %545, %546, %cst_251 {dimension_numbers = #tpu.dot_dimension_numbers<[1], [1], [0], [0], [0, 0, 1, 0], [], []>} : vector<16x8xf32>, vector<16x8xf32>, vector<16x16xf32> -> vector<16x16xf32>
    "tpu.trace_stop"() : () -> ()
    %cst_252 = arith.constant 0.353553385 : f32
    %549 = vector.broadcast %cst_252 : f32 to vector<16x16xf32>
    %550 = arith.mulf %548, %549 : vector<16x16xf32>
    %551 = arith.addf %550, %3 : vector<16x16xf32>
    %cst_253 = arith.constant dense<0xFF800000> : vector<16xf32>
    %552 = vector.multi_reduction <maximumf>, %551, %cst_253 [1] : vector<16x16xf32> to vector<16xf32>
    %553 = vector.shape_cast %552 : vector<16xf32> to vector<16x1xf32>
    %554 = vector.broadcast %553 : vector<16x1xf32> to vector<16x16xf32>
    %555 = arith.subf %551, %554 : vector<16x16xf32>
    %556 = math.exp %555 : vector<16x16xf32>
    %cst_254 = arith.constant dense<0.000000e+00> : vector<16xf32>
    %557 = vector.multi_reduction <add>, %556, %cst_254 [1] : vector<16x16xf32> to vector<16xf32>
    %558 = vector.shape_cast %557 : vector<16xf32> to vector<16x1xf32>
    %559 = vector.broadcast %558 : vector<16x1xf32> to vector<16x16xf32>
    %560 = arith.divf %556, %559 : vector<16x16xf32>
    %cst_255 = arith.constant dense<0.000000e+00> : vector<16x8xf32>
    %561 = tpu.matmul %560, %547, %cst_255 {dimension_numbers = #tpu.dot_dimension_numbers<[1], [0], [0], [1], [0, 0, 1, 1], [], []>} : vector<16x16xf32>, vector<16x8xf32>, vector<16x8xf32> -> vector<16x8xf32>
    %562 = vector.extract_strided_slice %508 {offsets = [0, 24], sizes = [16, 8], strides = [1, 1]} : vector<16x32xf32> to vector<16x8xf32>
    %563 = vector.extract_strided_slice %509 {offsets = [0, 24], sizes = [16, 8], strides = [1, 1]} : vector<16x32xf32> to vector<16x8xf32>
    %564 = vector.extract_strided_slice %510 {offsets = [0, 24], sizes = [16, 8], strides = [1, 1]} : vector<16x32xf32> to vector<16x8xf32>
    "tpu.trace_start"() <{level = 10 : i32, message = "nk,mk->nm"}> : () -> ()
    %cst_256 = arith.constant dense<0.000000e+00> : vector<16x16xf32>
    %565 = tpu.matmul %562, %563, %cst_256 {dimension_numbers = #tpu.dot_dimension_numbers<[1], [1], [0], [0], [0, 0, 1, 0], [], []>} : vector<16x8xf32>, vector<16x8xf32>, vector<16x16xf32> -> vector<16x16xf32>
    "tpu.trace_stop"() : () -> ()
    %cst_257 = arith.constant 0.353553385 : f32
    %566 = vector.broadcast %cst_257 : f32 to vector<16x16xf32>
    %567 = arith.mulf %565, %566 : vector<16x16xf32>
    %568 = arith.addf %567, %3 : vector<16x16xf32>
    %cst_258 = arith.constant dense<0xFF800000> : vector<16xf32>
    %569 = vector.multi_reduction <maximumf>, %568, %cst_258 [1] : vector<16x16xf32> to vector<16xf32>
    %570 = vector.shape_cast %569 : vector<16xf32> to vector<16x1xf32>
    %571 = vector.broadcast %570 : vector<16x1xf32> to vector<16x16xf32>
    %572 = arith.subf %568, %571 : vector<16x16xf32>
    %573 = math.exp %572 : vector<16x16xf32>
    %cst_259 = arith.constant dense<0.000000e+00> : vector<16xf32>
    %574 = vector.multi_reduction <add>, %573, %cst_259 [1] : vector<16x16xf32> to vector<16xf32>
    %575 = vector.shape_cast %574 : vector<16xf32> to vector<16x1xf32>
    %576 = vector.broadcast %575 : vector<16x1xf32> to vector<16x16xf32>
    %577 = arith.divf %573, %576 : vector<16x16xf32>
    %cst_260 = arith.constant dense<0.000000e+00> : vector<16x8xf32>
    %578 = tpu.matmul %577, %564, %cst_260 {dimension_numbers = #tpu.dot_dimension_numbers<[1], [0], [0], [1], [0, 0, 1, 1], [], []>} : vector<16x16xf32>, vector<16x8xf32>, vector<16x8xf32> -> vector<16x8xf32>
    %579 = tpu.concatenate %527, %544, %561, %578 in 1 : vector<16x8xf32>, vector<16x8xf32>, vector<16x8xf32>, vector<16x8xf32> -> vector<16x32xf32>
    %cst_261 = arith.constant dense<0.000000e+00> : vector<16x32xf32>
    %580 = tpu.matmul %579, %503, %cst_261 {dimension_numbers = #tpu.dot_dimension_numbers<[1], [0], [0], [1], [0, 0, 1, 1], [], []>} : vector<16x32xf32>, vector<32x32xf32>, vector<16x32xf32> -> vector<16x32xf32>
    %581 = arith.addf %580, %495 : vector<16x32xf32>
    %cst_262 = arith.constant dense<0.000000e+00> : vector<16xf32>
    %582 = vector.multi_reduction <add>, %581, %cst_262 [1] : vector<16x32xf32> to vector<16xf32>
    %583 = vector.shape_cast %582 : vector<16xf32> to vector<16x1xf32>
    %cst_263 = arith.constant 3.200000e+01 : f32
    %584 = vector.broadcast %cst_263 : f32 to vector<16x1xf32>
    %585 = arith.divf %583, %584 : vector<16x1xf32>
    %586 = vector.broadcast %585 : vector<16x1xf32> to vector<16x32xf32>
    %587 = arith.subf %581, %586 : vector<16x32xf32>
    %588 = arith.mulf %587, %587 : vector<16x32xf32>
    %cst_264 = arith.constant dense<0.000000e+00> : vector<16xf32>
    %589 = vector.multi_reduction <add>, %588, %cst_264 [1] : vector<16x32xf32> to vector<16xf32>
    %590 = vector.shape_cast %589 : vector<16xf32> to vector<16x1xf32>
    %cst_265 = arith.constant 3.200000e+01 : f32
    %591 = vector.broadcast %cst_265 : f32 to vector<16x1xf32>
    %592 = arith.divf %590, %591 : vector<16x1xf32>
    %cst_266 = arith.constant 9.99999974E-6 : f32
    %593 = vector.broadcast %cst_266 : f32 to vector<16x1xf32>
    %594 = arith.addf %592, %593 : vector<16x1xf32>
    %595 = math.rsqrt %594 : vector<16x1xf32>
    %596 = vector.broadcast %595 : vector<16x1xf32> to vector<16x32xf32>
    %597 = arith.mulf %587, %596 : vector<16x32xf32>
    %cst_267 = arith.constant dense<0.000000e+00> : vector<16x64xf32>
    %598 = tpu.matmul %597, %505, %cst_267 {dimension_numbers = #tpu.dot_dimension_numbers<[1], [0], [0], [1], [0, 0, 1, 1], [], []>} : vector<16x32xf32>, vector<32x64xf32>, vector<16x64xf32> -> vector<16x64xf32>
    %cst_268 = arith.constant 0.000000e+00 : f32
    %599 = vector.broadcast %cst_268 : f32 to vector<16x64xf32>
    %600 = arith.maximumf %598, %599 : vector<16x64xf32>
    %cst_269 = arith.constant dense<0.000000e+00> : vector<16x32xf32>
    %601 = tpu.matmul %600, %507, %cst_269 {dimension_numbers = #tpu.dot_dimension_numbers<[1], [0], [0], [1], [0, 0, 1, 1], [], []>} : vector<16x64xf32>, vector<64x32xf32>, vector<16x32xf32> -> vector<16x32xf32>
    %602 = arith.addf %601, %597 : vector<16x32xf32>
    %cst_270 = arith.constant dense<0.000000e+00> : vector<16xf32>
    %603 = vector.multi_reduction <add>, %602, %cst_270 [1] : vector<16x32xf32> to vector<16xf32>
    %604 = vector.shape_cast %603 : vector<16xf32> to vector<16x1xf32>
    %cst_271 = arith.constant 3.200000e+01 : f32
    %605 = vector.broadcast %cst_271 : f32 to vector<16x1xf32>
    %606 = arith.divf %604, %605 : vector<16x1xf32>
    %607 = vector.broadcast %606 : vector<16x1xf32> to vector<16x32xf32>
    %608 = arith.subf %602, %607 : vector<16x32xf32>
    %609 = arith.mulf %608, %608 : vector<16x32xf32>
    %cst_272 = arith.constant dense<0.000000e+00> : vector<16xf32>
    %610 = vector.multi_reduction <add>, %609, %cst_272 [1] : vector<16x32xf32> to vector<16xf32>
    %611 = vector.shape_cast %610 : vector<16xf32> to vector<16x1xf32>
    %cst_273 = arith.constant 3.200000e+01 : f32
    %612 = vector.broadcast %cst_273 : f32 to vector<16x1xf32>
    %613 = arith.divf %611, %612 : vector<16x1xf32>
    %cst_274 = arith.constant 9.99999974E-6 : f32
    %614 = vector.broadcast %cst_274 : f32 to vector<16x1xf32>
    %615 = arith.addf %613, %614 : vector<16x1xf32>
    %616 = math.rsqrt %615 : vector<16x1xf32>
    %617 = vector.broadcast %616 : vector<16x1xf32> to vector<16x32xf32>
    %618 = arith.mulf %608, %617 : vector<16x32xf32>
    %c5 = arith.constant 5 : index
    %c0_275 = arith.constant 0 : index
    %c0_276 = arith.constant 0 : index
    %619 = vector.load %arg3[%c5, %c0_275, %c0_276] : memref<6x32x32xf32, #tpu.memory_space<vmem>>, vector<1x32x32xf32>
    %620 = vector.shape_cast %619 : vector<1x32x32xf32> to vector<32x32xf32>
    %c5_277 = arith.constant 5 : index
    %c0_278 = arith.constant 0 : index
    %c0_279 = arith.constant 0 : index
    %621 = vector.load %arg4[%c5_277, %c0_278, %c0_279] : memref<6x32x32xf32, #tpu.memory_space<vmem>>, vector<1x32x32xf32>
    %622 = vector.shape_cast %621 : vector<1x32x32xf32> to vector<32x32xf32>
    %c5_280 = arith.constant 5 : index
    %c0_281 = arith.constant 0 : index
    %c0_282 = arith.constant 0 : index
    %623 = vector.load %arg5[%c5_280, %c0_281, %c0_282] : memref<6x32x32xf32, #tpu.memory_space<vmem>>, vector<1x32x32xf32>
    %624 = vector.shape_cast %623 : vector<1x32x32xf32> to vector<32x32xf32>
    %c5_283 = arith.constant 5 : index
    %c0_284 = arith.constant 0 : index
    %c0_285 = arith.constant 0 : index
    %625 = vector.load %arg6[%c5_283, %c0_284, %c0_285] : memref<6x32x32xf32, #tpu.memory_space<vmem>>, vector<1x32x32xf32>
    %626 = vector.shape_cast %625 : vector<1x32x32xf32> to vector<32x32xf32>
    %c5_286 = arith.constant 5 : index
    %c0_287 = arith.constant 0 : index
    %c0_288 = arith.constant 0 : index
    %627 = vector.load %arg7[%c5_286, %c0_287, %c0_288] : memref<6x32x64xf32, #tpu.memory_space<vmem>>, vector<1x32x64xf32>
    %628 = vector.shape_cast %627 : vector<1x32x64xf32> to vector<32x64xf32>
    %c5_289 = arith.constant 5 : index
    %c0_290 = arith.constant 0 : index
    %c0_291 = arith.constant 0 : index
    %629 = vector.load %arg8[%c5_289, %c0_290, %c0_291] : memref<6x64x32xf32, #tpu.memory_space<vmem>>, vector<1x64x32xf32>
    %630 = vector.shape_cast %629 : vector<1x64x32xf32> to vector<64x32xf32>
    %cst_292 = arith.constant dense<0.000000e+00> : vector<16x32xf32>
    %631 = tpu.matmul %618, %620, %cst_292 {dimension_numbers = #tpu.dot_dimension_numbers<[1], [0], [0], [1], [0, 0, 1, 1], [], []>} : vector<16x32xf32>, vector<32x32xf32>, vector<16x32xf32> -> vector<16x32xf32>
    %cst_293 = arith.constant dense<0.000000e+00> : vector<16x32xf32>
    %632 = tpu.matmul %618, %622, %cst_293 {dimension_numbers = #tpu.dot_dimension_numbers<[1], [0], [0], [1], [0, 0, 1, 1], [], []>} : vector<16x32xf32>, vector<32x32xf32>, vector<16x32xf32> -> vector<16x32xf32>
    %cst_294 = arith.constant dense<0.000000e+00> : vector<16x32xf32>
    %633 = tpu.matmul %618, %624, %cst_294 {dimension_numbers = #tpu.dot_dimension_numbers<[1], [0], [0], [1], [0, 0, 1, 1], [], []>} : vector<16x32xf32>, vector<32x32xf32>, vector<16x32xf32> -> vector<16x32xf32>
    %634 = vector.extract_strided_slice %631 {offsets = [0, 0], sizes = [16, 8], strides = [1, 1]} : vector<16x32xf32> to vector<16x8xf32>
    %635 = vector.extract_strided_slice %632 {offsets = [0, 0], sizes = [16, 8], strides = [1, 1]} : vector<16x32xf32> to vector<16x8xf32>
    %636 = vector.extract_strided_slice %633 {offsets = [0, 0], sizes = [16, 8], strides = [1, 1]} : vector<16x32xf32> to vector<16x8xf32>
    "tpu.trace_start"() <{level = 10 : i32, message = "nk,mk->nm"}> : () -> ()
    %cst_295 = arith.constant dense<0.000000e+00> : vector<16x16xf32>
    %637 = tpu.matmul %634, %635, %cst_295 {dimension_numbers = #tpu.dot_dimension_numbers<[1], [1], [0], [0], [0, 0, 1, 0], [], []>} : vector<16x8xf32>, vector<16x8xf32>, vector<16x16xf32> -> vector<16x16xf32>
    "tpu.trace_stop"() : () -> ()
    %cst_296 = arith.constant 0.353553385 : f32
    %638 = vector.broadcast %cst_296 : f32 to vector<16x16xf32>
    %639 = arith.mulf %637, %638 : vector<16x16xf32>
    %640 = arith.addf %639, %3 : vector<16x16xf32>
    %cst_297 = arith.constant dense<0xFF800000> : vector<16xf32>
    %641 = vector.multi_reduction <maximumf>, %640, %cst_297 [1] : vector<16x16xf32> to vector<16xf32>
    %642 = vector.shape_cast %641 : vector<16xf32> to vector<16x1xf32>
    %643 = vector.broadcast %642 : vector<16x1xf32> to vector<16x16xf32>
    %644 = arith.subf %640, %643 : vector<16x16xf32>
    %645 = math.exp %644 : vector<16x16xf32>
    %cst_298 = arith.constant dense<0.000000e+00> : vector<16xf32>
    %646 = vector.multi_reduction <add>, %645, %cst_298 [1] : vector<16x16xf32> to vector<16xf32>
    %647 = vector.shape_cast %646 : vector<16xf32> to vector<16x1xf32>
    %648 = vector.broadcast %647 : vector<16x1xf32> to vector<16x16xf32>
    %649 = arith.divf %645, %648 : vector<16x16xf32>
    %cst_299 = arith.constant dense<0.000000e+00> : vector<16x8xf32>
    %650 = tpu.matmul %649, %636, %cst_299 {dimension_numbers = #tpu.dot_dimension_numbers<[1], [0], [0], [1], [0, 0, 1, 1], [], []>} : vector<16x16xf32>, vector<16x8xf32>, vector<16x8xf32> -> vector<16x8xf32>
    %651 = vector.extract_strided_slice %631 {offsets = [0, 8], sizes = [16, 8], strides = [1, 1]} : vector<16x32xf32> to vector<16x8xf32>
    %652 = vector.extract_strided_slice %632 {offsets = [0, 8], sizes = [16, 8], strides = [1, 1]} : vector<16x32xf32> to vector<16x8xf32>
    %653 = vector.extract_strided_slice %633 {offsets = [0, 8], sizes = [16, 8], strides = [1, 1]} : vector<16x32xf32> to vector<16x8xf32>
    "tpu.trace_start"() <{level = 10 : i32, message = "nk,mk->nm"}> : () -> ()
    %cst_300 = arith.constant dense<0.000000e+00> : vector<16x16xf32>
    %654 = tpu.matmul %651, %652, %cst_300 {dimension_numbers = #tpu.dot_dimension_numbers<[1], [1], [0], [0], [0, 0, 1, 0], [], []>} : vector<16x8xf32>, vector<16x8xf32>, vector<16x16xf32> -> vector<16x16xf32>
    "tpu.trace_stop"() : () -> ()
    %cst_301 = arith.constant 0.353553385 : f32
    %655 = vector.broadcast %cst_301 : f32 to vector<16x16xf32>
    %656 = arith.mulf %654, %655 : vector<16x16xf32>
    %657 = arith.addf %656, %3 : vector<16x16xf32>
    %cst_302 = arith.constant dense<0xFF800000> : vector<16xf32>
    %658 = vector.multi_reduction <maximumf>, %657, %cst_302 [1] : vector<16x16xf32> to vector<16xf32>
    %659 = vector.shape_cast %658 : vector<16xf32> to vector<16x1xf32>
    %660 = vector.broadcast %659 : vector<16x1xf32> to vector<16x16xf32>
    %661 = arith.subf %657, %660 : vector<16x16xf32>
    %662 = math.exp %661 : vector<16x16xf32>
    %cst_303 = arith.constant dense<0.000000e+00> : vector<16xf32>
    %663 = vector.multi_reduction <add>, %662, %cst_303 [1] : vector<16x16xf32> to vector<16xf32>
    %664 = vector.shape_cast %663 : vector<16xf32> to vector<16x1xf32>
    %665 = vector.broadcast %664 : vector<16x1xf32> to vector<16x16xf32>
    %666 = arith.divf %662, %665 : vector<16x16xf32>
    %cst_304 = arith.constant dense<0.000000e+00> : vector<16x8xf32>
    %667 = tpu.matmul %666, %653, %cst_304 {dimension_numbers = #tpu.dot_dimension_numbers<[1], [0], [0], [1], [0, 0, 1, 1], [], []>} : vector<16x16xf32>, vector<16x8xf32>, vector<16x8xf32> -> vector<16x8xf32>
    %668 = vector.extract_strided_slice %631 {offsets = [0, 16], sizes = [16, 8], strides = [1, 1]} : vector<16x32xf32> to vector<16x8xf32>
    %669 = vector.extract_strided_slice %632 {offsets = [0, 16], sizes = [16, 8], strides = [1, 1]} : vector<16x32xf32> to vector<16x8xf32>
    %670 = vector.extract_strided_slice %633 {offsets = [0, 16], sizes = [16, 8], strides = [1, 1]} : vector<16x32xf32> to vector<16x8xf32>
    "tpu.trace_start"() <{level = 10 : i32, message = "nk,mk->nm"}> : () -> ()
    %cst_305 = arith.constant dense<0.000000e+00> : vector<16x16xf32>
    %671 = tpu.matmul %668, %669, %cst_305 {dimension_numbers = #tpu.dot_dimension_numbers<[1], [1], [0], [0], [0, 0, 1, 0], [], []>} : vector<16x8xf32>, vector<16x8xf32>, vector<16x16xf32> -> vector<16x16xf32>
    "tpu.trace_stop"() : () -> ()
    %cst_306 = arith.constant 0.353553385 : f32
    %672 = vector.broadcast %cst_306 : f32 to vector<16x16xf32>
    %673 = arith.mulf %671, %672 : vector<16x16xf32>
    %674 = arith.addf %673, %3 : vector<16x16xf32>
    %cst_307 = arith.constant dense<0xFF800000> : vector<16xf32>
    %675 = vector.multi_reduction <maximumf>, %674, %cst_307 [1] : vector<16x16xf32> to vector<16xf32>
    %676 = vector.shape_cast %675 : vector<16xf32> to vector<16x1xf32>
    %677 = vector.broadcast %676 : vector<16x1xf32> to vector<16x16xf32>
    %678 = arith.subf %674, %677 : vector<16x16xf32>
    %679 = math.exp %678 : vector<16x16xf32>
    %cst_308 = arith.constant dense<0.000000e+00> : vector<16xf32>
    %680 = vector.multi_reduction <add>, %679, %cst_308 [1] : vector<16x16xf32> to vector<16xf32>
    %681 = vector.shape_cast %680 : vector<16xf32> to vector<16x1xf32>
    %682 = vector.broadcast %681 : vector<16x1xf32> to vector<16x16xf32>
    %683 = arith.divf %679, %682 : vector<16x16xf32>
    %cst_309 = arith.constant dense<0.000000e+00> : vector<16x8xf32>
    %684 = tpu.matmul %683, %670, %cst_309 {dimension_numbers = #tpu.dot_dimension_numbers<[1], [0], [0], [1], [0, 0, 1, 1], [], []>} : vector<16x16xf32>, vector<16x8xf32>, vector<16x8xf32> -> vector<16x8xf32>
    %685 = vector.extract_strided_slice %631 {offsets = [0, 24], sizes = [16, 8], strides = [1, 1]} : vector<16x32xf32> to vector<16x8xf32>
    %686 = vector.extract_strided_slice %632 {offsets = [0, 24], sizes = [16, 8], strides = [1, 1]} : vector<16x32xf32> to vector<16x8xf32>
    %687 = vector.extract_strided_slice %633 {offsets = [0, 24], sizes = [16, 8], strides = [1, 1]} : vector<16x32xf32> to vector<16x8xf32>
    "tpu.trace_start"() <{level = 10 : i32, message = "nk,mk->nm"}> : () -> ()
    %cst_310 = arith.constant dense<0.000000e+00> : vector<16x16xf32>
    %688 = tpu.matmul %685, %686, %cst_310 {dimension_numbers = #tpu.dot_dimension_numbers<[1], [1], [0], [0], [0, 0, 1, 0], [], []>} : vector<16x8xf32>, vector<16x8xf32>, vector<16x16xf32> -> vector<16x16xf32>
    "tpu.trace_stop"() : () -> ()
    %cst_311 = arith.constant 0.353553385 : f32
    %689 = vector.broadcast %cst_311 : f32 to vector<16x16xf32>
    %690 = arith.mulf %688, %689 : vector<16x16xf32>
    %691 = arith.addf %690, %3 : vector<16x16xf32>
    %cst_312 = arith.constant dense<0xFF800000> : vector<16xf32>
    %692 = vector.multi_reduction <maximumf>, %691, %cst_312 [1] : vector<16x16xf32> to vector<16xf32>
    %693 = vector.shape_cast %692 : vector<16xf32> to vector<16x1xf32>
    %694 = vector.broadcast %693 : vector<16x1xf32> to vector<16x16xf32>
    %695 = arith.subf %691, %694 : vector<16x16xf32>
    %696 = math.exp %695 : vector<16x16xf32>
    %cst_313 = arith.constant dense<0.000000e+00> : vector<16xf32>
    %697 = vector.multi_reduction <add>, %696, %cst_313 [1] : vector<16x16xf32> to vector<16xf32>
    %698 = vector.shape_cast %697 : vector<16xf32> to vector<16x1xf32>
    %699 = vector.broadcast %698 : vector<16x1xf32> to vector<16x16xf32>
    %700 = arith.divf %696, %699 : vector<16x16xf32>
    %cst_314 = arith.constant dense<0.000000e+00> : vector<16x8xf32>
    %701 = tpu.matmul %700, %687, %cst_314 {dimension_numbers = #tpu.dot_dimension_numbers<[1], [0], [0], [1], [0, 0, 1, 1], [], []>} : vector<16x16xf32>, vector<16x8xf32>, vector<16x8xf32> -> vector<16x8xf32>
    %702 = tpu.concatenate %650, %667, %684, %701 in 1 : vector<16x8xf32>, vector<16x8xf32>, vector<16x8xf32>, vector<16x8xf32> -> vector<16x32xf32>
    %cst_315 = arith.constant dense<0.000000e+00> : vector<16x32xf32>
    %703 = tpu.matmul %702, %626, %cst_315 {dimension_numbers = #tpu.dot_dimension_numbers<[1], [0], [0], [1], [0, 0, 1, 1], [], []>} : vector<16x32xf32>, vector<32x32xf32>, vector<16x32xf32> -> vector<16x32xf32>
    %704 = arith.addf %703, %618 : vector<16x32xf32>
    %cst_316 = arith.constant dense<0.000000e+00> : vector<16xf32>
    %705 = vector.multi_reduction <add>, %704, %cst_316 [1] : vector<16x32xf32> to vector<16xf32>
    %706 = vector.shape_cast %705 : vector<16xf32> to vector<16x1xf32>
    %cst_317 = arith.constant 3.200000e+01 : f32
    %707 = vector.broadcast %cst_317 : f32 to vector<16x1xf32>
    %708 = arith.divf %706, %707 : vector<16x1xf32>
    %709 = vector.broadcast %708 : vector<16x1xf32> to vector<16x32xf32>
    %710 = arith.subf %704, %709 : vector<16x32xf32>
    %711 = arith.mulf %710, %710 : vector<16x32xf32>
    %cst_318 = arith.constant dense<0.000000e+00> : vector<16xf32>
    %712 = vector.multi_reduction <add>, %711, %cst_318 [1] : vector<16x32xf32> to vector<16xf32>
    %713 = vector.shape_cast %712 : vector<16xf32> to vector<16x1xf32>
    %cst_319 = arith.constant 3.200000e+01 : f32
    %714 = vector.broadcast %cst_319 : f32 to vector<16x1xf32>
    %715 = arith.divf %713, %714 : vector<16x1xf32>
    %cst_320 = arith.constant 9.99999974E-6 : f32
    %716 = vector.broadcast %cst_320 : f32 to vector<16x1xf32>
    %717 = arith.addf %715, %716 : vector<16x1xf32>
    %718 = math.rsqrt %717 : vector<16x1xf32>
    %719 = vector.broadcast %718 : vector<16x1xf32> to vector<16x32xf32>
    %720 = arith.mulf %710, %719 : vector<16x32xf32>
    %cst_321 = arith.constant dense<0.000000e+00> : vector<16x64xf32>
    %721 = tpu.matmul %720, %628, %cst_321 {dimension_numbers = #tpu.dot_dimension_numbers<[1], [0], [0], [1], [0, 0, 1, 1], [], []>} : vector<16x32xf32>, vector<32x64xf32>, vector<16x64xf32> -> vector<16x64xf32>
    %cst_322 = arith.constant 0.000000e+00 : f32
    %722 = vector.broadcast %cst_322 : f32 to vector<16x64xf32>
    %723 = arith.maximumf %721, %722 : vector<16x64xf32>
    %cst_323 = arith.constant dense<0.000000e+00> : vector<16x32xf32>
    %724 = tpu.matmul %723, %630, %cst_323 {dimension_numbers = #tpu.dot_dimension_numbers<[1], [0], [0], [1], [0, 0, 1, 1], [], []>} : vector<16x64xf32>, vector<64x32xf32>, vector<16x32xf32> -> vector<16x32xf32>
    %725 = arith.addf %724, %720 : vector<16x32xf32>
    %cst_324 = arith.constant dense<0.000000e+00> : vector<16xf32>
    %726 = vector.multi_reduction <add>, %725, %cst_324 [1] : vector<16x32xf32> to vector<16xf32>
    %727 = vector.shape_cast %726 : vector<16xf32> to vector<16x1xf32>
    %cst_325 = arith.constant 3.200000e+01 : f32
    %728 = vector.broadcast %cst_325 : f32 to vector<16x1xf32>
    %729 = arith.divf %727, %728 : vector<16x1xf32>
    %730 = vector.broadcast %729 : vector<16x1xf32> to vector<16x32xf32>
    %731 = arith.subf %725, %730 : vector<16x32xf32>
    %732 = arith.mulf %731, %731 : vector<16x32xf32>
    %cst_326 = arith.constant dense<0.000000e+00> : vector<16xf32>
    %733 = vector.multi_reduction <add>, %732, %cst_326 [1] : vector<16x32xf32> to vector<16xf32>
    %734 = vector.shape_cast %733 : vector<16xf32> to vector<16x1xf32>
    %cst_327 = arith.constant 3.200000e+01 : f32
    %735 = vector.broadcast %cst_327 : f32 to vector<16x1xf32>
    %736 = arith.divf %734, %735 : vector<16x1xf32>
    %cst_328 = arith.constant 9.99999974E-6 : f32
    %737 = vector.broadcast %cst_328 : f32 to vector<16x1xf32>
    %738 = arith.addf %736, %737 : vector<16x1xf32>
    %739 = math.rsqrt %738 : vector<16x1xf32>
    %740 = vector.broadcast %739 : vector<16x1xf32> to vector<16x32xf32>
    %741 = arith.mulf %731, %740 : vector<16x32xf32>
    %c0_329 = arith.constant 0 : index
    %c0_330 = arith.constant 0 : index
    %742 = vector.load %arg9[%c0_329, %c0_330] : memref<16x32xf32, #tpu.memory_space<vmem>>, vector<16x32xf32>
    tpu.vector_store %arg9[%c0_329, %c0_330], %741 {strides = array<i32>} : memref<16x32xf32, #tpu.memory_space<vmem>>, vector<16x32xf32>,
    return
  }
}

</mosaic_0001>

<bundles_post_ra>
// kernel: encoder_forward.1
= control target key start
LH: loop header
LB: loop body
LE: loop exit
PB: predicated region body
PF: predicated region fallthrough
CT: control target
= control target key end

     0   :  { %14 = vsyncpa [#allocation3], 0  ;;  %s11810_s0 = inlined_call_operand.vmem [shape: f32[16,32], index: 0, kind: input, shape index: {}, may-alias: {0,9}]   ;;  %s11811_s1 = inlined_call_operand.vmem [shape: f32[16,32], index: 1, kind: input, shape index: {}]   ;;  %s11812_s2 = inlined_call_operand.vmem [shape: f32[16,16], index: 2, kind: input, shape index: {}]   ;;  %s11813_s3 = inlined_call_operand.vmem [shape: f32[6,32,32], index: 3, kind: input, shape index: {}]   ;;  %s11814_s4 = inlined_call_operand.vmem [shape: f32[6,32,32], index: 4, kind: input, shape index: {}]   ;;  %s11815_s5 = inlined_call_operand.vmem [shape: f32[6,32,32], index: 5, kind: input, shape index: {}]   ;;  %s11816_s6 = inlined_call_operand.hbm [shape: f32[6,32,32], index: 6, kind: input, shape index: {}]   ;;  %s11817_s7 = inlined_call_operand.hbm [shape: f32[6,32,64], index: 7, kind: input, shape index: {}]   ;;  %s11818_s8 = inlined_call_operand.vmem [shape: f32[6,64,32], index: 8, kind: input, shape index: {}]   ;;  %s11819_s9 = inlined_call_operand.vmem [shape: f32[16,32], index: 9, kind: output, shape index: {}, may-alias: {0,9}]  }
   0x1   :  { %15 = vsyncpa [#allocation5], 0  ;;  %s10303_s30 = smov [#allocation2]  }
   0x2   :  { %s33_s10 = sshll.u32 %s10303_s30, 4  ;;  %s34_s10 = int_to_ptr.vmem [resolvable:$true] %s33_s10 }
   0x3   :  { %s10267_s11 = scalar_lea.vmem %s34_s10, 3072  ;;  %p10272_p1 = scmp.lt.s32.totalorder %s34_s10, %s34_s10 }
   0x4   :  { %p10268_p0 = scmp.ne.s32.totalorder %s34_s10, %s10267_s11  ;;  %p10273_p2 = scmp.lt.s32.totalorder %s10267_s11, %s10267_s11 }
   0x6   :  { %p10274_p3 = por %p10273_p2, %p10272_p1 }
   0x8   :  { %p10275_p4 = pnand %p10274_p3, %p10268_p0 }
   0xa   :  { %10278 = shalt.err (!%p10275_p4)
}
   0xb   :  { %s10304_s12 = smov 128   ;;  %s10305_s13 = smov 8  }
   0xc   :  { %39 = dma.hbm_to_vmem [thread:$0]  %s11816_s6, 3072, %s34_s10, [#allocation3], %s10304_s12, %s10304_s12, %s10305_s13  }
   0xd   :  { %s10306_s16 = smov [#allocation4]  }
   0xe   :  { %s45_s17 = sshll.u32 %s10306_s16, 4  ;;  %s46_s17 = int_to_ptr.vmem [resolvable:$true] %s45_s17 }
   0xf   :  { %s10287_s18 = scalar_lea.vmem %s46_s17, 3072  ;;  %p10292_p6 = scmp.lt.s32.totalorder %s46_s17, %s46_s17 }
  0x10   :  { %p10288_p5 = scmp.ne.s32.totalorder %s46_s17, %s10287_s18  ;;  %p10293_p7 = scmp.lt.s32.totalorder %s10287_s18, %s10287_s18 }
  0x12   :  { %p10294_p8 = por %p10293_p7, %p10292_p6 }
  0x14   :  { %p10295_p9 = pnand %p10294_p8, %p10288_p5 }
  0x16   :  { %10298 = shalt.err (!%p10295_p9)
}
  0x17   :  { %51 = dma.hbm_to_vmem [thread:$0]  %s11817_s7, 3072, %s46_s17, [#allocation5], %s10304_s12, %s10304_s12, %s10305_s13  }
  0x18   :  { %10299 = dma.done.wait [#allocation3], 3072  }
  0x19   :  { %10300 = vsyncadd [#allocation3], 4294964224 }
  0x1a   :  { %10301 = dma.done.wait [#allocation5], 3072  }
  0x1b   :  { %10302 = vsyncadd [#allocation5], 4294964224  ;;  %v71_v0 = vld [vmem:[%s11813_s3 + $0x18] sm:$0xff]  ;;  %v70_v1 = vld [vmem:[%s11813_s3 + $0x10] sm:$0xff]  ;;  %vm96_vm0 = vcmask 261120   ;;  %vm328_vm1 = vcmask 64512  }
  0x1c   :  { %9224 = vmatprep.subr.mxu1 %v71_v0  ;;  %v60_v2 = vld [vmem:[%s11810_s0] sm:$0xff]  ;;  %v69_v4 = vld [vmem:[%s11813_s3 + $0x8] sm:$0xff]  ;;  %v75_v10 = vld [vmem:[%s11814_s4 + $0x18] sm:$0xff]  ;;  %s10307_s6 = smov 120   ;;  %vm420_vm2 = vcmask 130048   ;;  %s10308_s11 = smov 112  }
  0x1d   :  { %v62_v3 = vld [vmem:[%s11811_s1] sm:$0xff]  ;;  %9225 = vmatpush3.msra.mxu1 %v71_v0  ;;  %v61_v6 = vld [vmem:[%s11810_s0 + $0x8] sm:$0xff]  ;;  %v74_v11 = vld [vmem:[%s11814_s4 + $0x10] sm:$0xff]  ;;  %s10309_s12 = smov 104   ;;  %s10310_s14 = smov 16   ;;  %vm1166_vm3 = vcmask 195584  }
  0x1e   :  { %v10385_v5 = vadd.f32 %v62_v3, %v60_v2  ;;  %v63_v7 = vld [vmem:[%s11811_s1 + $0x8] sm:$0xff]  ;;  %9226 = vmatprep.subr.mxu1 %v70_v1  ;;  %v68_v8 = vld [vmem:[%s11813_s3] sm:$0xff]  ;;  %v79_v16 = vld [vmem:[%s11815_s5 + $0x18] sm:$0xff]  ;;  %s10311_s0 = smov 24   ;;  %vm1360_vm4 = vcmask 523264  }
  0x1f   :  { %9227 = vmatpush3.msra.mxu1 %v70_v1  ;;  %v10398_v9 = vadd.f32 %v63_v7, %v61_v6  ;;  %v73_v12 = vld [vmem:[%s11814_s4 + $0x8] sm:$0xff]  ;;  %v72_v13 = vld [vmem:[%s11814_s4] sm:$0xff]  ;;  %v78_v17 = vld [vmem:[%s11815_s5 + $0x10] sm:$0xff]  ;;  %9246 = vmatprep.subr.mxu0 %v79_v16 }
  0x20   :  { %9232 = vmatprep.mubr.msk.f32.mxu1 %vm96_vm0, %v10385_v5  ;;  %9228 = vmatprep.subr.mxu1 %v69_v4  ;;  %v77_v18 = vld [vmem:[%s11815_s5 + $0x8] sm:$0xff]  ;;  %v76_v20 = vld [vmem:[%s11815_s5] sm:$0xff] }
  0x21   :  { %9254 = vmatprep.mubr.msk.f32.mxu0 %vm96_vm0, %v10385_v5  ;;  %9229 = vmatpush3.msra.mxu1 %v69_v4  ;;  %v10473_v28 = vld [vmem:[%s11812_s2 + $0x8] sm:$0xff]  ;;  %v10480_v31 = vld [vmem:[%s11812_s2] sm:$0xff] }
  0x22   :  { %9230 = vmatprep.subr.mxu1 %v68_v8  ;;  %9247 = vmatpush3.msra.mxu0 %v79_v16 }
  0x23   :  { %9231 = vmatpush3.msra.mxu1 %v68_v8  ;;  %9248 = vmatprep.subr.mxu0 %v78_v17 }
  0x24   :  { %9233 = vmatmul.mubr.msk.f32.vlgmr.msra.gmra.mxu1 %vm96_vm0, %v10398_v9  ;;  %9235 = vmatprep.subr.mxu1 %v75_v10 }
  0x25   :  { %9236 = vmatpush3.msra.mxu1 %v75_v10  ;;  %9243 = vmatprep.mubr.msk.f32.mxu1 %vm96_vm0, %v10385_v5 }
  0x26   :  { %9237 = vmatprep.subr.mxu1 %v74_v11  ;;  %9249 = vmatpush3.msra.mxu0 %v78_v17 }
  0x27   :  { %9238 = vmatpush3.msra.mxu1 %v74_v11  ;;  %9250 = vmatprep.subr.mxu0 %v77_v18 }
  0x28   :  { %9239 = vmatprep.subr.mxu1 %v73_v12  ;;  %9251 = vmatpush3.msra.mxu0 %v77_v18 }
  0x29   :  { %9240 = vmatpush3.msra.mxu1 %v73_v12  ;;  %9252 = vmatprep.subr.mxu0 %v76_v20 }
  0x2a   :  { %9241 = vmatprep.subr.mxu1 %v72_v13  ;;  %9253 = vmatpush3.msra.mxu0 %v76_v20 }
  0x2b   :  { %9242 = vmatpush3.msra.mxu1 %v72_v13  ;;  %9255 = vmatmul.mubr.msk.f32.vlgmr.msra.gmra.mxu0 %vm96_vm0, %v10398_v9 }
  0x2c   :  { %9244 = vmatmul.mubr.msk.f32.vlgmr.msra.gmra.mxu1 %vm96_vm0, %v10398_v9 }
  0xe4   :  { %v10420_v14 = vpop.f32.mrf.mxu1 }
  0xe6   :  { %v10422_v15 = vpop.f32.mrf.mxu1 }
  0xe7   :  { %524 = vrot.lane.b32.xlu1 %v10422_v15, %s10307_s6  ;;  %9261 = vmatprep.mubr.msk.f32.mxu1 %vm328_vm1, %v10422_v15 }
  0xeb   :  { %526 = vrot.lane.b32.xlu1 %v10420_v14, %s10307_s6  ;;  %v10468_v26 = vpop.f32.mrf.mxu0 }
  0xec   :  { %v10439_v19 = vpop.f32.mrf.mxu1  ;;  %9264 = vmatprep.subr.mxu0 %v10468_v26 }
  0xed   :  { %530 = vrot.lane.b32.xlu0 %v10439_v19, %s10307_s6  ;;  %9257 = vmatprep.subr.msk.mxu1 %vm328_vm1, %v10439_v19  ;;  %v10488_v37 = vpop.f32.mrf.mxu0 }
  0xee   :  { %v10448_v21 = vpop.f32.mrf.mxu1  ;;  %9258 = vmatpush3.xpose.msk.msra.mxu1 %vm328_vm1, %v10439_v19  ;;  %9265 = vmatpush3.msra.mxu0 %v10468_v26 }
  0xef   :  { %9259 = vmatprep.subr.msk.mxu1 %vm328_vm1, %v10448_v21  ;;  %9266 = vmatprep.subr.mxu0 %v10488_v37 }
  0xf0   :  { %9267 = vmatpush3.msra.mxu0 %v10488_v37 }
  0xf1   :  { %528 = vrot.lane.b32.xlu0 %v10448_v21, %s10307_s6 }
  0xf2   :  { %9260 = vmatpush3.xpose.msk.msra.mxu1 %vm328_vm1, %v10448_v21 }
  0xf5   :  { %9262 = vmatmul.mubr.msk.f32.vlgmr.msra.gmra.mxu1 %vm328_vm1, %v10420_v14 }
 0x159   :  { %v525_v22 = vpop.permute.xlu1 %524 }
 0x15a   :  { %9275 = vmatprep.mubr.msk.f32.mxu1 %vm328_vm1, %v525_v22 }
 0x15d   :  { %v527_v25 = vpop.permute.xlu1 %526 }
 0x15f   :  { %v531_v23 = vpop.permute.xlu0 %530 }
 0x160   :  { %9271 = vmatprep.subr.msk.mxu1 %vm328_vm1, %v531_v23 }
 0x161   :  { %9272 = vmatpush3.xpose.msk.msra.mxu1 %vm328_vm1, %v531_v23 }
 0x163   :  { %v529_v24 = vpop.permute.xlu0 %528 }
 0x164   :  { %9273 = vmatprep.subr.msk.mxu1 %vm328_vm1, %v529_v24 }
 0x165   :  { %9274 = vmatpush3.xpose.msk.msra.mxu1 %vm328_vm1, %v529_v24 }
 0x168   :  { %9276 = vmatmul.mubr.msk.f32.vlgmr.msra.gmra.mxu1 %vm328_vm1, %v527_v25 }
 0x1b5   :  { %v9263_v27 = vpop.f32.mrf.mxu1 }
 0x1b6   :  { %v417_v29 = vmul.f32 0.35355338, %v9263_v27 }
 0x1b7   :  { %v407_v30 = vpop.f32.mrf.mxu1 }
 0x1b8   :  { %v416_v32 = vmul.f32 0.35355338, %v407_v30  ;;  %v419_v33 = vadd.f32 %v417_v29, %v10473_v28 }
 0x1ba   :  { %v424_v34 = vsel %vm420_vm2, %v419_v33, -inf  ;;  %v418_v35 = vadd.f32 %v416_v32, %v10480_v31 }
 0x1bb   :  { %425 = vmax.xlane.f32.xlu1 %v424_v34 }
 0x1bc   :  { %v421_v36 = vsel %vm420_vm2, %v418_v35, -inf }
 0x1bd   :  { %422 = vmax.xlane.f32.xlu0 %v421_v36 }
 0x1cc   :  { %645 = vrot.lane.b32.xlu1 %v10468_v26, %s10307_s6 }
 0x228   :  { %v9277_v38 = vpop.f32.mrf.mxu1 }
 0x229   :  { %v616_v40 = vmul.f32 0.35355338, %v9277_v38 }
 0x22a   :  { %v606_v39 = vpop.f32.mrf.mxu1 }
 0x22b   :  { %v615_v41 = vmul.f32 0.35355338, %v606_v39  ;;  %v618_v44 = vadd.f32 %v616_v40, %v10473_v28 }
 0x22d   :  { %v617_v42 = vadd.f32 %v615_v41, %v10480_v31  ;;  %v622_v45 = vsel %vm420_vm2, %v618_v44, -inf }
 0x22f   :  { %v619_v43 = vsel %vm420_vm2, %v617_v42, -inf }
 0x230   :  { %620 = vmax.xlane.f32.xlu0 %v619_v43 }
 0x234   :  { %623 = vmax.xlane.f32.xlu0 %v622_v45 }
 0x244   :  { %v426_v46 = vpop.xlane.xlu1 %425 }
 0x245   :  { %v428_v47 = vsub.f32 %v419_v33, %v426_v46 }
 0x246   :  { %v423_v48 = vpop.xlane.xlu0 %422 }
 0x247   :  { %v431_v49 = vmul.f32 1.442695, %v428_v47  ;;  %v427_v50 = vsub.f32 %v418_v35, %v423_v48 }
 0x248   :  { %v646_v56 = vpop.permute.xlu1 %645 }
 0x249   :  { %10013 = vpow2.f32 %v431_v49  ;;  %v429_v51 = vmul.f32 1.442695, %v427_v50  ;;  %9278 = vmatprep.subr.mxu0 %v646_v56 }
 0x24b   :  { %10015 = vpow2.f32 %v429_v51 }
 0x256   :  { %v10014_v52 = vpop.eup %10013 }
 0x257   :  { %v436_v53 = vsel %vm420_vm2, %v10014_v52, 0.0 }
 0x258   :  { %v10016_v54 = vpop.eup %10015  ;;  %437 = vadd.xlane.f32.xlu0 %v436_v53 }
 0x259   :  { %v433_v55 = vsel %vm420_vm2, %v10016_v54, 0.0 }
 0x25a   :  { %434 = vadd.xlane.f32.xlu1 %v433_v55 }
 0x26b   :  { %736 = vrot.lane.b32.xlu1 %v10439_v19, %s10308_s11 }
 0x26f   :  { %734 = vrot.lane.b32.xlu1 %v10448_v21, %s10308_s11 }
 0x2b9   :  { %v621_v57 = vpop.xlane.xlu0 %620 }
 0x2ba   :  { %v625_v58 = vsub.f32 %v617_v42, %v621_v57 }
 0x2bc   :  { %v627_v59 = vmul.f32 1.442695, %v625_v58 }
 0x2bd   :  { %v624_v60 = vpop.xlane.xlu0 %623 }
 0x2be   :  { %10017 = vpow2.f32 %v627_v59  ;;  %v626_v61 = vsub.f32 %v618_v44, %v624_v60 }
 0x2c0   :  { %v629_v62 = vmul.f32 1.442695, %v626_v61 }
 0x2c2   :  { %10019 = vpow2.f32 %v629_v62 }
 0x2cb   :  { %v10018_v63 = vpop.eup %10017 }
 0x2cc   :  { %v631_v0 = vsel %vm420_vm2, %v10018_v63, 0.0 }
 0x2cd   :  { %632 = vadd.xlane.f32.xlu1 %v631_v0 }
 0x2cf   :  { %v10020_v1 = vpop.eup %10019 }
 0x2d0   :  { %v634_v2 = vsel %vm420_vm2, %v10020_v1, 0.0 }
 0x2d1   :  { %635 = vadd.xlane.f32.xlu0 %v634_v2 }
 0x2de   :  { %732 = vrot.lane.b32.xlu1 %v10420_v14, %s10308_s11 }
 0x2e1   :  { %v438_v3 = vpop.xlane.xlu0 %437 }
 0x2e2   :  { %10021 = vrcp.f32 %v438_v3 }
 0x2e3   :  { %v435_v4 = vpop.xlane.xlu1 %434 }
 0x2e4   :  { %10023 = vrcp.f32 %v435_v4 }
 0x2e7   :  { %643 = vrot.lane.b32.xlu0 %v10488_v37, %s10307_s6  ;;  %v737_v11 = vpop.permute.xlu1 %736 }
 0x2eb   :  { %730 = vrot.lane.b32.xlu0 %v10422_v15, %s10308_s11  ;;  %v735_v12 = vpop.permute.xlu1 %734 }
 0x2ef   :  { %v10022_v6 = vpop.eup %10021 }
 0x2f0   :  { %v442_v10 = vmul.f32 %v10022_v6, %v10014_v52 }
 0x2f1   :  { %v10024_v7 = vpop.eup %10023 }
 0x2f2   :  { %v440_v8 = vmul.f32 %v10024_v7, %v10016_v54 }
 0x2f4   :  { %9268 = vmatprep.mubr.msk.f32.mxu0 %vm420_vm2, %v440_v8 }
 0x2f5   :  { %9269 = vmatmul.mubr.msk.f32.vlgmr.msra.gmra.mxu0 %vm420_vm2, %v442_v10 }
 0x2f6   :  { %9279 = vmatpush3.msra.mxu0 %v646_v56 }
 0x356   :  { %v633_v13 = vpop.xlane.xlu1 %632 }
 0x357   :  { %10025 = vrcp.f32 %v633_v13 }
 0x35a   :  { %v636_v16 = vpop.xlane.xlu0 %635  ;;  %v733_v25 = vpop.permute.xlu1 %732 }
 0x35b   :  { %10027 = vrcp.f32 %v636_v16 }
 0x35e   :  { %v644_v17 = vpop.permute.xlu0 %643 }
 0x35f   :  { %9280 = vmatprep.subr.mxu0 %v644_v17 }
 0x360   :  { %9281 = vmatpush3.msra.mxu0 %v644_v17 }
 0x361   :  { %9285 = vmatprep.subr.msk.mxu0 %vm328_vm1, %v737_v11 }
 0x362   :  { %v731_v24 = vpop.permute.xlu0 %730 }
 0x364   :  { %v10026_v18 = vpop.eup %10025 }
 0x365   :  { %v638_v20 = vmul.f32 %v10026_v18, %v10018_v63 }
 0x367   :  { %9282 = vmatprep.mubr.msk.f32.mxu0 %vm420_vm2, %v638_v20 }
 0x368   :  { %v10028_v22 = vpop.eup %10027 }
 0x369   :  { %v640_v23 = vmul.f32 %v10028_v22, %v10020_v1 }
 0x36b   :  { %9283 = vmatmul.mubr.msk.f32.vlgmr.msra.gmra.mxu0 %vm420_vm2, %v640_v23 }
 0x36c   :  { %9286 = vmatpush3.xpose.msk.msra.mxu0 %vm328_vm1, %v737_v11  ;;  %9289 = vmatprep.mubr.msk.f32.mxu0 %vm328_vm1, %v731_v24 }
 0x36d   :  { %9287 = vmatprep.subr.msk.mxu0 %vm328_vm1, %v735_v12 }
 0x370   :  { %9288 = vmatpush3.xpose.msk.msra.mxu0 %vm328_vm1, %v735_v12 }
 0x373   :  { %9290 = vmatmul.mubr.msk.f32.vlgmr.msra.gmra.mxu0 %vm328_vm1, %v733_v25 }
 0x3b5   :  { %v10520_v27 = vpop.f32.mrf.mxu0 }
 0x3b7   :  { %v10522_v29 = vpop.f32.mrf.mxu0 }
 0x42b   :  { %v10524_v30 = vpop.f32.mrf.mxu0 }
 0x42d   :  { %v10526_v32 = vpop.f32.mrf.mxu0 }
 0x433   :  { %v9291_v33 = vpop.f32.mrf.mxu0 }
 0x434   :  { %v822_v34 = vmul.f32 0.35355338, %v9291_v33 }
 0x435   :  { %v812_v35 = vpop.f32.mrf.mxu0 }
 0x436   :  { %v821_v36 = vmul.f32 0.35355338, %v812_v35  ;;  %v824_v38 = vadd.f32 %v822_v34, %v10473_v28  ;;  %v83_v34 = vld [vmem:[#allocation2 + $0x18] sm:$0xff]  ;;  %v82_v35 = vld [vmem:[#allocation2 + $0x10] sm:$0xff] }
 0x438   :  { %v828_v39 = vsel %vm420_vm2, %v824_v38, -inf  ;;  %v823_v40 = vadd.f32 %v821_v36, %v10480_v31  ;;  %v80_v36 = vld [vmem:[#allocation2] sm:$0xff] }
 0x439   :  { %829 = vmax.xlane.f32.xlu1 %v828_v39 }
 0x43a   :  { %v825_v41 = vsel %vm420_vm2, %v823_v40, -inf }
 0x43b   :  { %826 = vmax.xlane.f32.xlu0 %v825_v41 }
 0x44a   :  { %849 = vrot.lane.b32.xlu1 %v10468_v26, %s10308_s11 }
 0x44e   :  { %940 = vrot.lane.b32.xlu1 %v10439_v19, %s10309_s12 }
 0x452   :  { %938 = vrot.lane.b32.xlu1 %v10448_v21, %s10309_s12 }
 0x456   :  { %936 = vrot.lane.b32.xlu1 %v10420_v14, %s10309_s12 }
 0x4c2   :  { %v830_v42 = vpop.xlane.xlu1 %829 }
 0x4c3   :  { %v832_v43 = vsub.f32 %v824_v38, %v830_v42 }
 0x4c4   :  { %v827_v44 = vpop.xlane.xlu0 %826 }
 0x4c5   :  { %v835_v45 = vmul.f32 1.442695, %v832_v43  ;;  %v831_v46 = vsub.f32 %v823_v40, %v827_v44 }
 0x4c6   :  { %v850_v47 = vpop.permute.xlu1 %849 }
 0x4c7   :  { %10029 = vpow2.f32 %v835_v45  ;;  %v833_v48 = vmul.f32 1.442695, %v831_v46  ;;  %9292 = vmatprep.subr.mxu1 %v850_v47 }
 0x4c8   :  { %9293 = vmatpush3.msra.mxu1 %v850_v47 }
 0x4c9   :  { %10031 = vpow2.f32 %v833_v48 }
 0x4ca   :  { %v941_v53 = vpop.permute.xlu1 %940 }
 0x4d4   :  { %v10030_v49 = vpop.eup %10029 }
 0x4d5   :  { %v840_v19 = vsel %vm420_vm2, %v10030_v49, 0.0 }
 0x4d6   :  { %v10032_v50 = vpop.eup %10031  ;;  %841 = vadd.xlane.f32.xlu0 %v840_v19 }
 0x4d7   :  { %v837_v21 = vsel %vm420_vm2, %v10032_v50, 0.0 }
 0x4da   :  { %838 = vadd.xlane.f32.xlu0 %v837_v21 }
 0x4f0   :  { %847 = vrot.lane.b32.xlu0 %v10488_v37, %s10308_s11 }
 0x4f4   :  { %934 = vrot.lane.b32.xlu0 %v10422_v15, %s10309_s12  ;;  %v939_v15 = vpop.permute.xlu1 %938 }
 0x4f8   :  { %v937_v59 = vpop.permute.xlu1 %936 }
 0x55f   :  { %v842_v14 = vpop.xlane.xlu0 %841 }
 0x560   :  { %10033 = vrcp.f32 %v842_v14 }
 0x563   :  { %v839_v51 = vpop.xlane.xlu0 %838 }
 0x564   :  { %10035 = vrcp.f32 %v839_v51 }
 0x567   :  { %v848_v52 = vpop.permute.xlu0 %847 }
 0x568   :  { %9294 = vmatprep.subr.mxu1 %v848_v52 }
 0x569   :  { %9295 = vmatpush3.msra.mxu1 %v848_v52 }
 0x56a   :  { %9299 = vmatprep.subr.msk.mxu1 %vm328_vm1, %v941_v53 }
 0x56b   :  { %v935_v58 = vpop.permute.xlu0 %934 }
 0x56d   :  { %v10034_v54 = vpop.eup %10033 }
 0x56e   :  { %v846_v57 = vmul.f32 %v10034_v54, %v10030_v49 }
 0x571   :  { %v10036_v55 = vpop.eup %10035 }
 0x572   :  { %v844_v56 = vmul.f32 %v10036_v55, %v10032_v50 }
 0x574   :  { %9296 = vmatprep.mubr.msk.f32.mxu1 %vm420_vm2, %v844_v56 }
 0x575   :  { %9297 = vmatmul.mubr.msk.f32.vlgmr.msra.gmra.mxu1 %vm420_vm2, %v846_v57 }
 0x576   :  { %9300 = vmatpush3.xpose.msk.msra.mxu1 %vm328_vm1, %v941_v53  ;;  %9303 = vmatprep.mubr.msk.f32.mxu1 %vm328_vm1, %v935_v58 }
 0x577   :  { %9301 = vmatprep.subr.msk.mxu1 %vm328_vm1, %v939_v15 }
 0x57a   :  { %9302 = vmatpush3.xpose.msk.msra.mxu1 %vm328_vm1, %v939_v15 }
 0x57d   :  { %9304 = vmatmul.mubr.msk.f32.vlgmr.msra.gmra.mxu1 %vm328_vm1, %v937_v59 }
 0x635   :  { %v9298_v60 = vpop.f32.mrf.mxu1 }
 0x637   :  { %v925_v61 = vpop.f32.mrf.mxu1 }
 0x63d   :  { %v9305_v62 = vpop.f32.mrf.mxu1 }
 0x63e   :  { %v1026_v63 = vmul.f32 0.35355338, %v9305_v62  ;;  %v85_v62 = vld [vmem:[#allocation4 + $0x8] sm:$0xff] }
 0x63f   :  { %v1016_v0 = vpop.f32.mrf.mxu1 }
 0x640   :  { %v1025_v1 = vmul.f32 0.35355338, %v1016_v0  ;;  %v1028_v2 = vadd.f32 %v1026_v63, %v10473_v28  ;;  %v84_v63 = vld [vmem:[#allocation4] sm:$0xff]  ;;  %v95_v0 = vld [vmem:[%s11818_s8 + $0x38] sm:$0xff] }
 0x642   :  { %v1032_v3 = vsel %vm420_vm2, %v1028_v2, -inf  ;;  %v1027_v4 = vadd.f32 %v1025_v1, %v10480_v31  ;;  %v94_v1 = vld [vmem:[%s11818_s8 + $0x30] sm:$0xff] }
 0x643   :  { %1033 = vmax.xlane.f32.xlu1 %v1032_v3  ;;  %v92_v3 = vld [vmem:[%s11818_s8 + $0x20] sm:$0xff] }
 0x644   :  { %v1029_v6 = vsel %vm420_vm2, %v1027_v4, -inf }
 0x645   :  { %1030 = vmax.xlane.f32.xlu0 %v1029_v6 }
 0x654   :  { %1053 = vrot.lane.b32.xlu1 %v10468_v26, %s10309_s12 }
 0x658   :  { %1140 = vrot.lane.b32.xlu1 %v10526_v32, %s10305_s13 }
 0x65c   :  { %1142 = vrot.lane.b32.xlu1 %v10524_v30, %s10305_s13 }
 0x660   :  { %1150 = vrot.lane.b32.xlu1 %v9298_v60, %s10310_s14 }
 0x6cc   :  { %v1034_v7 = vpop.xlane.xlu1 %1033 }
 0x6cd   :  { %v1036_v8 = vsub.f32 %v1028_v2, %v1034_v7  ;;  %v93_v2 = vld [vmem:[%s11818_s8 + $0x28] sm:$0xff] }
 0x6ce   :  { %v1031_v10 = vpop.xlane.xlu0 %1030 }
 0x6cf   :  { %v1039_v11 = vmul.f32 1.442695, %v1036_v8  ;;  %v1035_v12 = vsub.f32 %v1027_v4, %v1031_v10  ;;  %v91_v4 = vld [vmem:[%s11818_s8 + $0x18] sm:$0xff] }
 0x6d0   :  { %v1054_v13 = vpop.permute.xlu1 %1053 }
 0x6d1   :  { %10037 = vpow2.f32 %v1039_v11  ;;  %v1037_v16 = vmul.f32 1.442695, %v1035_v12  ;;  %9306 = vmatprep.subr.mxu0 %v1054_v13 }
 0x6d2   :  { %9307 = vmatpush3.msra.mxu0 %v1054_v13 }
 0x6d3   :  { %10039 = vpow2.f32 %v1037_v16 }
 0x6d4   :  { %v1141_v40 = vpop.permute.xlu1 %1140 }
 0x6d5   :  { %v1162_v44 = vsel %vm328_vm1, %v10522_v29, %v1141_v40 }
 0x6d8   :  { %v1143_v41 = vpop.permute.xlu1 %1142 }
 0x6d9   :  { %v1163_v46 = vsel %vm328_vm1, %v10520_v27, %v1143_v41 }
 0x6dc   :  { %v1151_v42 = vpop.permute.xlu1 %1150 }
 0x6dd   :  { %v1165_v49 = vsel %vm420_vm2, %v1163_v46, %v1151_v42 }
 0x6de   :  { %v10038_v26 = vpop.eup %10037 }
 0x6df   :  { %v1044_v17 = vsel %vm420_vm2, %v10038_v26, 0.0 }
 0x6e0   :  { %v10040_v18 = vpop.eup %10039  ;;  %1045 = vadd.xlane.f32.xlu0 %v1044_v17 }
 0x6e1   :  { %v1041_v20 = vsel %vm420_vm2, %v10040_v18, 0.0 }
 0x6e4   :  { %1042 = vadd.xlane.f32.xlu0 %v1041_v20  ;;  %v89_v20 = vld [vmem:[%s11818_s8 + $0x8] sm:$0xff] }
 0x6fa   :  { %1051 = vrot.lane.b32.xlu0 %v10488_v37, %s10309_s12  ;;  %v81_v37 = vld [vmem:[#allocation2 + $0x8] sm:$0xff] }
 0x6fe   :  { %1148 = vrot.lane.b32.xlu0 %v925_v61, %s10310_s14  ;;  %v86_v61 = vld [vmem:[#allocation4 + $0x10] sm:$0xff] }
 0x769   :  { %v1046_v22 = vpop.xlane.xlu0 %1045 }
 0x76a   :  { %10041 = vrcp.f32 %v1046_v22  ;;  %v88_v22 = vld [vmem:[%s11818_s8] sm:$0xff] }
 0x76d   :  { %v1043_v23 = vpop.xlane.xlu0 %1042 }
 0x76e   :  { %10043 = vrcp.f32 %v1043_v23 }
 0x771   :  { %v1052_v24 = vpop.permute.xlu0 %1051 }
 0x772   :  { %9308 = vmatprep.subr.mxu0 %v1052_v24 }
 0x773   :  { %9309 = vmatpush3.msra.mxu0 %v1052_v24 }
 0x774   :  { %9313 = vmatprep.subr.mxu0 %v83_v34 }
 0x775   :  { %v1149_v43 = vpop.permute.xlu0 %1148 }
 0x776   :  { %v1164_v47 = vsel %vm420_vm2, %v1162_v44, %v1149_v43 }
 0x777   :  { %v10042_v25 = vpop.eup %10041 }
 0x778   :  { %v1050_v33 = vmul.f32 %v10042_v25, %v10038_v26 }
 0x77b   :  { %v10044_v30 = vpop.eup %10043 }
 0x77c   :  { %v1048_v32 = vmul.f32 %v10044_v30, %v10040_v18  ;;  %v90_v18 = vld [vmem:[%s11818_s8 + $0x10] sm:$0xff] }
 0x77e   :  { %9310 = vmatprep.mubr.msk.f32.mxu0 %vm420_vm2, %v1048_v32 }
 0x77f   :  { %9311 = vmatmul.mubr.msk.f32.vlgmr.msra.gmra.mxu0 %vm420_vm2, %v1050_v33 }
 0x780   :  { %9314 = vmatpush3.msra.mxu0 %v83_v34 }
 0x781   :  { %9315 = vmatprep.subr.mxu0 %v82_v35 }
 0x782   :  { %9316 = vmatpush3.msra.mxu0 %v82_v35 }
 0x783   :  { %9317 = vmatprep.subr.mxu0 %v81_v37 }
 0x784   :  { %9318 = vmatpush3.msra.mxu0 %v81_v37 }
 0x785   :  { %9319 = vmatprep.subr.mxu0 %v80_v36 }
 0x786   :  { %9320 = vmatpush3.msra.mxu0 %v80_v36 }
 0x787   :  { %9335 = vmatprep.subr.mxu0 %v95_v0 }
 0x83f   :  { %v9312_v38 = vpop.f32.mrf.mxu0 }
 0x840   :  { %1158 = vrot.lane.b32.xlu1 %v9312_v38, %s10311_s0 }
 0x841   :  { %v1129_v39 = vpop.f32.mrf.mxu0 }
 0x842   :  { %1156 = vrot.lane.b32.xlu0 %v1129_v39, %s10311_s0 }
 0x8b2   :  { %v1159_v45 = vpop.permute.xlu1 %1158 }
 0x8b3   :  { %v1168_v50 = vsel %vm1166_vm3, %v1165_v49, %v1159_v45  ;;  %v8523_v49 = vld [vmem:[%s11815_s5 + $0x38] sm:$0xff] }
 0x8b4   :  { %v1157_v48 = vpop.permute.xlu0 %1156 }
 0x8b5   :  { %v1167_v19 = vsel %vm1166_vm3, %v1164_v47, %v1157_v48  ;;  %v8515_v48 = vld [vmem:[%s11813_s3 + $0x38] sm:$0xff] }
 0x8b6   :  { %9321 = vmatprep.mubr.msk.f32.mxu0 %vm96_vm0, %v1167_v19  ;;  %v8514_v19 = vld [vmem:[%s11813_s3 + $0x30] sm:$0xff] }
 0x8b7   :  { %9322 = vmatmul.mubr.msk.f32.vlgmr.msra.gmra.mxu0 %vm96_vm0, %v1168_v50  ;;  %v8522_v50 = vld [vmem:[%s11815_s5 + $0x30] sm:$0xff] }
 0x8b8   :  { %9336 = vmatpush3.msra.mxu0 %v95_v0 }
 0x8b9   :  { %9337 = vmatprep.subr.mxu0 %v94_v1 }
 0x8ba   :  { %9338 = vmatpush3.msra.mxu0 %v94_v1 }
 0x8bb   :  { %9339 = vmatprep.subr.mxu0 %v93_v2 }
 0x8bc   :  { %9340 = vmatpush3.msra.mxu0 %v93_v2 }
 0x8bd   :  { %9341 = vmatprep.subr.mxu0 %v92_v3 }
 0x8be   :  { %9342 = vmatpush3.msra.mxu0 %v92_v3 }
 0x8bf   :  { %9343 = vmatprep.subr.mxu0 %v91_v4 }
 0x8c0   :  { %9344 = vmatpush3.msra.mxu0 %v91_v4 }
 0x8c1   :  { %9345 = vmatprep.subr.mxu0 %v90_v18 }
 0x8c2   :  { %9346 = vmatpush3.msra.mxu0 %v90_v18 }
 0x8c3   :  { %9347 = vmatprep.subr.mxu0 %v89_v20 }
 0x8c4   :  { %9348 = vmatpush3.msra.mxu0 %v89_v20 }
 0x8c5   :  { %9349 = vmatprep.subr.mxu0 %v88_v22 }
 0x8c6   :  { %9350 = vmatpush3.msra.mxu0 %v88_v22 }
 0x8c7   :  { %9376 = vmatprep.subr.mxu0 %v8523_v49 }
 0x977   :  { %v9323_v21 = vpop.f32.mrf.mxu0 }
 0x978   :  { %v1247_v29 = vadd.f32 %v9323_v21, %v10398_v9  ;;  %v8513_v21 = vld [vmem:[%s11813_s3 + $0x28] sm:$0xff] }
 0x979   :  { %v1241_v14 = vpop.f32.mrf.mxu0 }
 0x97a   :  { %v1242_v51 = vadd.f32 %v1241_v14, %v10385_v5  ;;  %v1253_v27 = vsel %vm96_vm0, %v1247_v29, 0.0  ;;  %v87_v5 = vld [vmem:[#allocation4 + $0x18] sm:$0xff]  ;;  %v8512_v14 = vld [vmem:[%s11813_s3 + $0x20] sm:$0xff] }
 0x97b   :  { %1254 = vadd.xlane.f32.xlu1 %v1253_v27  ;;  %9324 = vmatprep.subr.mxu1 %v87_v5  ;;  %v8519_v27 = vld [vmem:[%s11814_s4 + $0x38] sm:$0xff] }
 0x97c   :  { %v1250_v52 = vsel %vm96_vm0, %v1242_v51, 0.0  ;;  %9325 = vmatpush3.msra.mxu1 %v87_v5  ;;  %v8517_v5 = vld [vmem:[%s11814_s4 + $0x28] sm:$0xff] }
 0x97d   :  { %1251 = vadd.xlane.f32.xlu0 %v1250_v52  ;;  %9326 = vmatprep.subr.mxu1 %v86_v61 }
 0x97e   :  { %9327 = vmatpush3.msra.mxu1 %v86_v61  ;;  %v8516_v61 = vld [vmem:[%s11814_s4 + $0x20] sm:$0xff] }
 0x97f   :  { %9328 = vmatprep.subr.mxu1 %v85_v62 }
 0x980   :  { %9329 = vmatpush3.msra.mxu1 %v85_v62 }
 0x981   :  { %9330 = vmatprep.subr.mxu1 %v84_v63 }
 0x982   :  { %9331 = vmatpush3.msra.mxu1 %v84_v63 }
 0x983   :  { %9354 = vmatprep.subr.mxu1 %v8515_v48 }
 0xa04   :  { %v1255_v53 = vpop.xlane.xlu1 %1254 }
 0xa05   :  { %v1258_v54 = vmul.f32 0.03125, %v1255_v53 }
 0xa06   :  { %v1252_v55 = vpop.xlane.xlu0 %1251 }
 0xa07   :  { %v1257_v56 = vmul.f32 0.03125, %v1252_v55  ;;  %v1260_v57 = vsub.f32 %v1247_v29, %v1258_v54  ;;  %v8521_v29 = vld [vmem:[%s11815_s5 + $0x28] sm:$0xff] }
 0xa09   :  { %v1259_v58 = vsub.f32 %v1242_v51, %v1257_v56  ;;  %v1262_v60 = vmul.f32 %v1260_v57, %v1260_v57  ;;  %v8520_v51 = vld [vmem:[%s11815_s5 + $0x20] sm:$0xff] }
 0xa0b   :  { %v1261_v15 = vmul.f32 %v1259_v58, %v1259_v58  ;;  %v1266_v9 = vsel %vm96_vm0, %v1262_v60, 0.0 }
 0xa0d   :  { %v1263_v59 = vsel %vm96_vm0, %v1261_v15, 0.0 }
 0xa0e   :  { %1264 = vadd.xlane.f32.xlu0 %v1263_v59 }
 0xa12   :  { %1267 = vadd.xlane.f32.xlu0 %v1266_v9  ;;  %v8518_v9 = vld [vmem:[%s11814_s4 + $0x30] sm:$0xff] }
 0xa97   :  { %v1265_v6 = vpop.xlane.xlu0 %1264 }
 0xa98   :  { %v1269_v7 = vmul.f32 0.03125, %v1265_v6 }
 0xa9a   :  { %v1271_v8 = vadd.f32 1e-05, %v1269_v7 }
 0xa9b   :  { %v1268_v10 = vpop.xlane.xlu0 %1267 }
 0xa9c   :  { %10045 = vrsqrt.f32 %v1271_v8  ;;  %v1270_v11 = vmul.f32 0.03125, %v1268_v10 }
 0xa9e   :  { %v1272_v12 = vadd.f32 1e-05, %v1270_v11 }
 0xaa0   :  { %10047 = vrsqrt.f32 %v1272_v12 }
 0xaa9   :  { %v10046_v13 = vpop.eup %10045 }
 0xaaa   :  { %v1275_v16 = vmul.f32 %v10046_v13, %v1259_v58 }
 0xaac   :  { %9332 = vmatprep.mubr.msk.f32.mxu1 %vm96_vm0, %v1275_v16 }
 0xaad   :  { %v10048_v26 = vpop.eup %10047 }
 0xaae   :  { %v1276_v17 = vmul.f32 %v10048_v26, %v1260_v57 }
 0xab0   :  { %9333 = vmatmul.mubr.msk.f32.vlgmr.msra.gmra.mxu1 %vm96_vm0, %v1276_v17 }
 0xab1   :  { %9355 = vmatpush3.msra.mxu1 %v8515_v48 }
 0xab2   :  { %9356 = vmatprep.subr.mxu1 %v8514_v19 }
 0xab3   :  { %9357 = vmatpush3.msra.mxu1 %v8514_v19 }
 0xab4   :  { %9358 = vmatprep.subr.mxu1 %v8513_v21 }
 0xab5   :  { %9359 = vmatpush3.msra.mxu1 %v8513_v21 }
 0xab6   :  { %9360 = vmatprep.subr.mxu1 %v8512_v14 }
 0xab7   :  { %9361 = vmatpush3.msra.mxu1 %v8512_v14 }
 0xab8   :  { %9365 = vmatprep.subr.mxu1 %v8519_v27 }
 0xb70   :  { %v9334_v23 = vpop.f32.mrf.mxu1 }
 0xb71   :  { %v1359_v30 = vmax.f32 %v9334_v23, 0.0 }
 0xb72   :  { %v1349_v24 = vpop.f32.mrf.mxu1 }
 0xb73   :  { %v1358_v25 = vmax.f32 %v1349_v24, 0.0 }
 0xb75   :  { %9351 = vmatprep.mubr.msk.f32.mxu0 %vm1360_vm4, %v1358_v25 }
 0xb76   :  { %9352 = vmatmul.mubr.msk.f32.vlgmr.msra.gmra.mxu0 %vm1360_vm4, %v1359_v30 }
 0xb77   :  { %9377 = vmatpush3.msra.mxu0 %v8523_v49 }
 0xb78   :  { %9378 = vmatprep.subr.mxu0 %v8522_v50 }
 0xb79   :  { %9379 = vmatpush3.msra.mxu0 %v8522_v50 }
 0xb7a   :  { %9380 = vmatprep.subr.mxu0 %v8521_v29 }
 0xb7b   :  { %9381 = vmatpush3.msra.mxu0 %v8521_v29 }
 0xb7c   :  { %9382 = vmatprep.subr.mxu0 %v8520_v51 }
 0xb7d   :  { %9383 = vmatpush3.msra.mxu0 %v8520_v51 }
 0xc36   :  { %v9353_v32 = vpop.f32.mrf.mxu0 }
 0xc37   :  { %v1439_v33 = vadd.f32 %v9353_v32, %v1276_v17 }
 0xc38   :  { %v1433_v34 = vpop.f32.mrf.mxu0 }
 0xc39   :  { %v1434_v35 = vadd.f32 %v1433_v34, %v1275_v16  ;;  %v1445_v37 = vsel %vm96_vm0, %v1439_v33, 0.0 }
 0xc3a   :  { %1446 = vadd.xlane.f32.xlu0 %v1445_v37 }
 0xc3b   :  { %v1442_v36 = vsel %vm96_vm0, %v1434_v35, 0.0 }
 0xc3c   :  { %1443 = vadd.xlane.f32.xlu1 %v1442_v36 }
 0xcc3   :  { %v1447_v38 = vpop.xlane.xlu0 %1446 }
 0xcc4   :  { %v1449_v39 = vmul.f32 0.03125, %v1447_v38 }
 0xcc5   :  { %v1444_v40 = vpop.xlane.xlu1 %1443 }
 0xcc6   :  { %v1451_v41 = vsub.f32 %v1439_v33, %v1449_v39  ;;  %v1448_v42 = vmul.f32 0.03125, %v1444_v40 }
 0xcc8   :  { %v1450_v43 = vsub.f32 %v1434_v35, %v1448_v42  ;;  %v1453_v44 = vmul.f32 %v1451_v41, %v1451_v41 }
 0xcca   :  { %v1457_v45 = vsel %vm96_vm0, %v1453_v44, 0.0  ;;  %v1452_v46 = vmul.f32 %v1450_v43, %v1450_v43 }
 0xccb   :  { %1458 = vadd.xlane.f32.xlu0 %v1457_v45 }
 0xccc   :  { %v1454_v47 = vsel %vm96_vm0, %v1452_v46, 0.0 }
 0xccd   :  { %1455 = vadd.xlane.f32.xlu1 %v1454_v47 }
 0xd54   :  { %v1459_v52 = vpop.xlane.xlu0 %1458 }
 0xd55   :  { %v1461_v53 = vmul.f32 0.03125, %v1459_v52 }
 0xd56   :  { %v1456_v54 = vpop.xlane.xlu1 %1455 }
 0xd57   :  { %v1463_v55 = vadd.f32 1e-05, %v1461_v53  ;;  %v1460_v56 = vmul.f32 0.03125, %v1456_v54 }
 0xd59   :  { %v1462_v57 = vadd.f32 1e-05, %v1460_v56  ;;  %10049 = vrsqrt.f32 %v1463_v55 }
 0xd5b   :  { %10051 = vrsqrt.f32 %v1462_v57 }
 0xd66   :  { %v10050_v58 = vpop.eup %10049 }
 0xd67   :  { %v10651_v60 = vmul.f32 %v10050_v58, %v1451_v41 }
 0xd68   :  { %v10052_v15 = vpop.eup %10051 }
 0xd69   :  { %v10649_v59 = vmul.f32 %v10052_v15, %v1450_v43 }
 0xd6b   :  { %9362 = vmatprep.mubr.msk.f32.mxu1 %vm96_vm0, %v10649_v59  ;;  %9384 = vmatprep.mubr.msk.f32.mxu0 %vm96_vm0, %v10649_v59 }
 0xd6c   :  { %9363 = vmatmul.mubr.msk.f32.vlgmr.msra.gmra.mxu1 %vm96_vm0, %v10651_v60  ;;  %9385 = vmatmul.mubr.msk.f32.vlgmr.msra.gmra.mxu0 %vm96_vm0, %v10651_v60 }
 0xd6d   :  { %9366 = vmatpush3.msra.mxu1 %v8519_v27  ;;  %9373 = vmatprep.mubr.msk.f32.mxu1 %vm96_vm0, %v10649_v59 }
 0xd6e   :  { %9367 = vmatprep.subr.mxu1 %v8518_v9 }
 0xd6f   :  { %9368 = vmatpush3.msra.mxu1 %v8518_v9 }
 0xd70   :  { %9369 = vmatprep.subr.mxu1 %v8517_v5 }
 0xd71   :  { %9370 = vmatpush3.msra.mxu1 %v8517_v5 }
 0xd72   :  { %9371 = vmatprep.subr.mxu1 %v8516_v61 }
 0xd73   :  { %9372 = vmatpush3.msra.mxu1 %v8516_v61 }
 0xd74   :  { %9374 = vmatmul.mubr.msk.f32.vlgmr.msra.gmra.mxu1 %vm96_vm0, %v10651_v60 }
 0xe2c   :  { %v10674_v62 = vpop.f32.mrf.mxu1  ;;  %v10676_v63 = vpop.f32.mrf.mxu0 }
 0xe2d   :  { %9394 = vmatprep.subr.mxu0 %v10676_v63 }
 0xe2e   :  { %v10679_v0 = vpop.f32.mrf.mxu1  ;;  %v10681_v1 = vpop.f32.mrf.mxu0  ;;  %9395 = vmatpush3.msra.mxu0 %v10676_v63 }
 0xe2f   :  { %9391 = vmatprep.mubr.msk.f32.mxu1 %vm328_vm1, %v10679_v0  ;;  %9396 = vmatprep.subr.mxu0 %v10681_v1 }
 0xe30   :  { %9397 = vmatpush3.msra.mxu0 %v10681_v1 }
 0xe34   :  { %v10688_v2 = vpop.f32.mrf.mxu1 }
 0xe35   :  { %1933 = vrot.lane.b32.xlu1 %v10688_v2, %s10307_s6  ;;  %9387 = vmatprep.subr.msk.mxu1 %vm328_vm1, %v10688_v2 }
 0xe36   :  { %v10694_v3 = vpop.f32.mrf.mxu1  ;;  %9388 = vmatpush3.xpose.msk.msra.mxu1 %vm328_vm1, %v10688_v2 }
 0xe37   :  { %1931 = vrot.lane.b32.xlu0 %v10694_v3, %s10307_s6  ;;  %9389 = vmatprep.subr.msk.mxu1 %vm328_vm1, %v10694_v3 }
 0xe39   :  { %1927 = vrot.lane.b32.xlu1 %v10679_v0, %s10307_s6 }
 0xe3a   :  { %9390 = vmatpush3.xpose.msk.msra.mxu1 %vm328_vm1, %v10694_v3 }
 0xe3d   :  { %1929 = vrot.lane.b32.xlu1 %v10674_v62, %s10307_s6  ;;  %9392 = vmatmul.mubr.msk.f32.vlgmr.msra.gmra.mxu1 %vm328_vm1, %v10674_v62 }
 0xea7   :  { %v1934_v4 = vpop.permute.xlu1 %1933 }
 0xea8   :  { %9401 = vmatprep.subr.msk.mxu1 %vm328_vm1, %v1934_v4 }
 0xea9   :  { %v1932_v6 = vpop.permute.xlu0 %1931  ;;  %9402 = vmatpush3.xpose.msk.msra.mxu1 %vm328_vm1, %v1934_v4 }
 0xeaa   :  { %9403 = vmatprep.subr.msk.mxu1 %vm328_vm1, %v1932_v6 }
 0xeab   :  { %v1928_v7 = vpop.permute.xlu1 %1927 }
 0xeac   :  { %9405 = vmatprep.mubr.msk.f32.mxu1 %vm328_vm1, %v1928_v7 }
 0xead   :  { %9404 = vmatpush3.xpose.msk.msra.mxu1 %vm328_vm1, %v1932_v6 }
 0xeaf   :  { %v1930_v8 = vpop.permute.xlu1 %1929 }
 0xeb0   :  { %9406 = vmatmul.mubr.msk.f32.vlgmr.msra.gmra.mxu1 %vm328_vm1, %v1930_v8 }
 0xefd   :  { %v9393_v10 = vpop.f32.mrf.mxu1 }
 0xefe   :  { %v1821_v11 = vmul.f32 0.35355338, %v9393_v10 }
 0xeff   :  { %v1811_v12 = vpop.f32.mrf.mxu1 }
 0xf00   :  { %v1820_v13 = vmul.f32 0.35355338, %v1811_v12  ;;  %v1823_v16 = vadd.f32 %v1821_v11, %v10473_v28 }
 0xf02   :  { %v1827_v26 = vsel %vm420_vm2, %v1823_v16, -inf  ;;  %v1822_v17 = vadd.f32 %v1820_v13, %v10480_v31 }
 0xf03   :  { %1828 = vmax.xlane.f32.xlu1 %v1827_v26 }
 0xf04   :  { %v1824_v18 = vsel %vm420_vm2, %v1822_v17, -inf }
 0xf05   :  { %1825 = vmax.xlane.f32.xlu0 %v1824_v18 }
 0xf14   :  { %2048 = vrot.lane.b32.xlu1 %v10676_v63, %s10307_s6 }
 0xf70   :  { %v9407_v20 = vpop.f32.mrf.mxu1 }
 0xf71   :  { %v2019_v23 = vmul.f32 0.35355338, %v9407_v20 }
 0xf72   :  { %v2009_v22 = vpop.f32.mrf.mxu1 }
 0xf73   :  { %v2018_v24 = vmul.f32 0.35355338, %v2009_v22  ;;  %v2021_v32 = vadd.f32 %v2019_v23, %v10473_v28  ;;  %v10768_v22 = vld [vmem:[%s11812_s2] sm:$0xff] }
 0xf75   :  { %v2020_v25 = vadd.f32 %v2018_v24, %v10480_v31  ;;  %v2025_v33 = vsel %vm420_vm2, %v2021_v32, -inf }
 0xf77   :  { %v2022_v30 = vsel %vm420_vm2, %v2020_v25, -inf }
 0xf78   :  { %2023 = vmax.xlane.f32.xlu0 %v2022_v30 }
 0xf7c   :  { %2026 = vmax.xlane.f32.xlu0 %v2025_v33 }
 0xf8c   :  { %v1829_v34 = vpop.xlane.xlu1 %1828 }
 0xf8d   :  { %v1831_v35 = vsub.f32 %v1823_v16, %v1829_v34 }
 0xf8e   :  { %v1826_v37 = vpop.xlane.xlu0 %1825 }
 0xf8f   :  { %v1834_v36 = vmul.f32 1.442695, %v1831_v35  ;;  %v1830_v38 = vsub.f32 %v1822_v17, %v1826_v37  ;;  %v10761_v17 = vld [vmem:[%s11812_s2 + $0x8] sm:$0xff] }
 0xf90   :  { %v2049_v39 = vpop.permute.xlu1 %2048 }
 0xf91   :  { %10053 = vpow2.f32 %v1834_v36  ;;  %v1832_v40 = vmul.f32 1.442695, %v1830_v38  ;;  %9408 = vmatprep.subr.mxu0 %v2049_v39 }
 0xf93   :  { %10055 = vpow2.f32 %v1832_v40 }
 0xf9e   :  { %v10054_v41 = vpop.eup %10053 }
 0xf9f   :  { %v1839_v31 = vsel %vm420_vm2, %v10054_v41, 0.0 }
 0xfa0   :  { %v10056_v42 = vpop.eup %10055  ;;  %1840 = vadd.xlane.f32.xlu0 %v1839_v31 }
 0xfa1   :  { %v1836_v28 = vsel %vm420_vm2, %v10056_v42, 0.0 }
 0xfa2   :  { %1837 = vadd.xlane.f32.xlu1 %v1836_v28 }
 0xfb3   :  { %2139 = vrot.lane.b32.xlu1 %v10688_v2, %s10308_s11 }
 0xfb7   :  { %2137 = vrot.lane.b32.xlu1 %v10694_v3, %s10308_s11 }
0x1001   :  { %v2024_v43 = vpop.xlane.xlu0 %2023 }
0x1002   :  { %v2028_v44 = vsub.f32 %v2020_v25, %v2024_v43 }
0x1004   :  { %v2030_v45 = vmul.f32 1.442695, %v2028_v44 }
0x1005   :  { %v2027_v46 = vpop.xlane.xlu0 %2026 }
0x1006   :  { %10057 = vpow2.f32 %v2030_v45  ;;  %v2029_v47 = vsub.f32 %v2021_v32, %v2027_v46 }
0x1008   :  { %v2032_v48 = vmul.f32 1.442695, %v2029_v47 }
0x100a   :  { %10059 = vpow2.f32 %v2032_v48 }
0x1013   :  { %v10058_v49 = vpop.eup %10057 }
0x1014   :  { %v2034_v19 = vsel %vm420_vm2, %v10058_v49, 0.0 }
0x1015   :  { %2035 = vadd.xlane.f32.xlu1 %v2034_v19 }
0x1017   :  { %v10060_v50 = vpop.eup %10059 }
0x1018   :  { %v2037_v21 = vsel %vm420_vm2, %v10060_v50, 0.0 }
0x1019   :  { %2038 = vadd.xlane.f32.xlu0 %v2037_v21 }
0x1026   :  { %2135 = vrot.lane.b32.xlu1 %v10674_v62, %s10308_s11 }
0x1029   :  { %v1841_v29 = vpop.xlane.xlu0 %1840 }
0x102a   :  { %10061 = vrcp.f32 %v1841_v29 }
0x102b   :  { %v1838_v14 = vpop.xlane.xlu1 %1837 }
0x102c   :  { %10063 = vrcp.f32 %v1838_v14 }
0x102f   :  { %2046 = vrot.lane.b32.xlu0 %v10681_v1, %s10307_s6  ;;  %v2140_v54 = vpop.permute.xlu1 %2139 }
0x1033   :  { %2133 = vrot.lane.b32.xlu0 %v10679_v0, %s10308_s11  ;;  %v2138_v55 = vpop.permute.xlu1 %2137 }
0x1037   :  { %v10062_v51 = vpop.eup %10061 }
0x1038   :  { %v1845_v53 = vmul.f32 %v10062_v51, %v10054_v41 }
0x1039   :  { %v10064_v27 = vpop.eup %10063 }
0x103a   :  { %v1843_v52 = vmul.f32 %v10064_v27, %v10056_v42 }
0x103c   :  { %9398 = vmatprep.mubr.msk.f32.mxu0 %vm420_vm2, %v1843_v52 }
0x103d   :  { %9399 = vmatmul.mubr.msk.f32.vlgmr.msra.gmra.mxu0 %vm420_vm2, %v1845_v53 }
0x103e   :  { %9409 = vmatpush3.msra.mxu0 %v2049_v39 }
0x109e   :  { %v2036_v56 = vpop.xlane.xlu1 %2035 }
0x109f   :  { %10065 = vrcp.f32 %v2036_v56 }
0x10a2   :  { %v2039_v57 = vpop.xlane.xlu0 %2038  ;;  %v2136_v6 = vpop.permute.xlu1 %2135 }
0x10a3   :  { %10067 = vrcp.f32 %v2039_v57 }
0x10a6   :  { %v2047_v58 = vpop.permute.xlu0 %2046 }
0x10a7   :  { %9410 = vmatprep.subr.mxu0 %v2047_v58 }
0x10a8   :  { %9411 = vmatpush3.msra.mxu0 %v2047_v58 }
0x10a9   :  { %9415 = vmatprep.subr.msk.mxu0 %vm328_vm1, %v2140_v54 }
0x10aa   :  { %v2134_v4 = vpop.permute.xlu0 %2133 }
0x10ac   :  { %v10066_v15 = vpop.eup %10065 }
0x10ad   :  { %v2041_v9 = vmul.f32 %v10066_v15, %v10058_v49 }
0x10af   :  { %9412 = vmatprep.mubr.msk.f32.mxu0 %vm420_vm2, %v2041_v9 }
0x10b0   :  { %v10068_v5 = vpop.eup %10067 }
0x10b1   :  { %v2043_v61 = vmul.f32 %v10068_v5, %v10060_v50 }
0x10b3   :  { %9413 = vmatmul.mubr.msk.f32.vlgmr.msra.gmra.mxu0 %vm420_vm2, %v2043_v61 }
0x10b4   :  { %9416 = vmatpush3.xpose.msk.msra.mxu0 %vm328_vm1, %v2140_v54  ;;  %9419 = vmatprep.mubr.msk.f32.mxu0 %vm328_vm1, %v2134_v4 }
0x10b5   :  { %9417 = vmatprep.subr.msk.mxu0 %vm328_vm1, %v2138_v55 }
0x10b8   :  { %9418 = vmatpush3.xpose.msk.msra.mxu0 %vm328_vm1, %v2138_v55 }
0x10bb   :  { %9420 = vmatmul.mubr.msk.f32.vlgmr.msra.gmra.mxu0 %vm328_vm1, %v2136_v6 }
0x10fd   :  { %v10750_v7 = vpop.f32.mrf.mxu0 }
0x10ff   :  { %v10752_v8 = vpop.f32.mrf.mxu0 }
0x1173   :  { %v10754_v10 = vpop.f32.mrf.mxu0 }
0x1175   :  { %v10756_v11 = vpop.f32.mrf.mxu0 }
0x117b   :  { %v9421_v12 = vpop.f32.mrf.mxu0 }
0x117c   :  { %v2225_v13 = vmul.f32 0.35355338, %v9421_v12 }
0x117d   :  { %v2215_v16 = vpop.f32.mrf.mxu0 }
0x117e   :  { %v2224_v26 = vmul.f32 0.35355338, %v2215_v16  ;;  %v2227_v18 = vadd.f32 %v10761_v17, %v2225_v13  ;;  %v1487_v13 = vld [vmem:[#allocation2 + $0x38] sm:$0xff]  ;;  %v1486_v16 = vld [vmem:[#allocation2 + $0x30] sm:$0xff] }
0x1180   :  { %v2231_v20 = vsel %vm420_vm2, %v2227_v18, -inf  ;;  %v2226_v23 = vadd.f32 %v10768_v22, %v2224_v26  ;;  %v1484_v26 = vld [vmem:[#allocation2 + $0x20] sm:$0xff] }
0x1181   :  { %2232 = vmax.xlane.f32.xlu1 %v2231_v20 }
0x1182   :  { %v2228_v24 = vsel %vm420_vm2, %v2226_v23, -inf }
0x1183   :  { %2229 = vmax.xlane.f32.xlu0 %v2228_v24 }
0x1192   :  { %2252 = vrot.lane.b32.xlu1 %v10676_v63, %s10308_s11 }
0x1196   :  { %2343 = vrot.lane.b32.xlu1 %v10688_v2, %s10309_s12 }
0x119a   :  { %2341 = vrot.lane.b32.xlu1 %v10694_v3, %s10309_s12 }
0x119e   :  { %2339 = vrot.lane.b32.xlu1 %v10674_v62, %s10309_s12 }
0x120a   :  { %v2233_v25 = vpop.xlane.xlu1 %2232 }
0x120b   :  { %v2235_v30 = vsub.f32 %v2227_v18, %v2233_v25 }
0x120c   :  { %v2230_v32 = vpop.xlane.xlu0 %2229 }
0x120d   :  { %v2238_v33 = vmul.f32 1.442695, %v2235_v30  ;;  %v2234_v34 = vsub.f32 %v2226_v23, %v2230_v32 }
0x120e   :  { %v2253_v35 = vpop.permute.xlu1 %2252 }
0x120f   :  { %10069 = vpow2.f32 %v2238_v33  ;;  %v2236_v37 = vmul.f32 1.442695, %v2234_v34  ;;  %9422 = vmatprep.subr.mxu1 %v2253_v35 }
0x1210   :  { %9423 = vmatpush3.msra.mxu1 %v2253_v35 }
0x1211   :  { %10071 = vpow2.f32 %v2236_v37 }
0x1212   :  { %v2344_v41 = vpop.permute.xlu1 %2343 }
0x121c   :  { %v10070_v36 = vpop.eup %10069 }
0x121d   :  { %v2243_v2 = vsel %vm420_vm2, %v10070_v36, 0.0 }
0x121e   :  { %v10072_v38 = vpop.eup %10071  ;;  %2244 = vadd.xlane.f32.xlu0 %v2243_v2 }
0x121f   :  { %v2240_v3 = vsel %vm420_vm2, %v10072_v38, 0.0 }
0x1222   :  { %2241 = vadd.xlane.f32.xlu0 %v2240_v3 }
0x1238   :  { %2250 = vrot.lane.b32.xlu0 %v10681_v1, %s10308_s11 }
0x123c   :  { %2337 = vrot.lane.b32.xlu0 %v10679_v0, %s10309_s12  ;;  %v2342_v0 = vpop.permute.xlu1 %2341 }
0x1240   :  { %v2340_v45 = vpop.permute.xlu1 %2339 }
0x12a7   :  { %v2245_v62 = vpop.xlane.xlu0 %2244 }
0x12a8   :  { %10073 = vrcp.f32 %v2245_v62 }
0x12ab   :  { %v2242_v39 = vpop.xlane.xlu0 %2241 }
0x12ac   :  { %10075 = vrcp.f32 %v2242_v39 }
0x12af   :  { %v2251_v40 = vpop.permute.xlu0 %2250 }
0x12b0   :  { %9424 = vmatprep.subr.mxu1 %v2251_v40 }
0x12b1   :  { %9425 = vmatpush3.msra.mxu1 %v2251_v40 }
0x12b2   :  { %9429 = vmatprep.subr.msk.mxu1 %vm328_vm1, %v2344_v41 }
0x12b3   :  { %v2338_v44 = vpop.permute.xlu0 %2337 }
0x12b5   :  { %v10074_v31 = vpop.eup %10073 }
0x12b6   :  { %v2249_v43 = vmul.f32 %v10074_v31, %v10070_v36 }
0x12b9   :  { %v10076_v42 = vpop.eup %10075 }
0x12ba   :  { %v2247_v28 = vmul.f32 %v10076_v42, %v10072_v38 }
0x12bc   :  { %9426 = vmatprep.mubr.msk.f32.mxu1 %vm420_vm2, %v2247_v28 }
0x12bd   :  { %9427 = vmatmul.mubr.msk.f32.vlgmr.msra.gmra.mxu1 %vm420_vm2, %v2249_v43 }
0x12be   :  { %9430 = vmatpush3.xpose.msk.msra.mxu1 %vm328_vm1, %v2344_v41  ;;  %9433 = vmatprep.mubr.msk.f32.mxu1 %vm328_vm1, %v2338_v44 }
0x12bf   :  { %9431 = vmatprep.subr.msk.mxu1 %vm328_vm1, %v2342_v0 }
0x12c2   :  { %9432 = vmatpush3.xpose.msk.msra.mxu1 %vm328_vm1, %v2342_v0 }
0x12c5   :  { %9434 = vmatmul.mubr.msk.f32.vlgmr.msra.gmra.mxu1 %vm328_vm1, %v2340_v45 }
0x137d   :  { %v9428_v46 = vpop.f32.mrf.mxu1 }
0x137f   :  { %v2328_v47 = vpop.f32.mrf.mxu1 }
0x1385   :  { %v9435_v48 = vpop.f32.mrf.mxu1 }
0x1386   :  { %v2429_v49 = vmul.f32 0.35355338, %v9435_v48  ;;  %v1490_v48 = vld [vmem:[#allocation4 + $0x28] sm:$0xff] }
0x1387   :  { %v2419_v19 = vpop.f32.mrf.mxu1 }
0x1388   :  { %v2428_v50 = vmul.f32 0.35355338, %v2419_v19  ;;  %v2431_v21 = vadd.f32 %v10761_v17, %v2429_v49  ;;  %v1489_v49 = vld [vmem:[#allocation4 + $0x20] sm:$0xff]  ;;  %v8531_v19 = vld [vmem:[%s11818_s8 + $0x78] sm:$0xff] }
0x138a   :  { %v2435_v29 = vsel %vm420_vm2, %v2431_v21, -inf  ;;  %v2430_v14 = vadd.f32 %v10768_v22, %v2428_v50  ;;  %v8530_v50 = vld [vmem:[%s11818_s8 + $0x70] sm:$0xff] }
0x138b   :  { %2436 = vmax.xlane.f32.xlu1 %v2435_v29  ;;  %v8528_v29 = vld [vmem:[%s11818_s8 + $0x60] sm:$0xff] }
0x138c   :  { %v2432_v51 = vsel %vm420_vm2, %v2430_v14, -inf }
0x138d   :  { %2433 = vmax.xlane.f32.xlu0 %v2432_v51 }
0x139c   :  { %2456 = vrot.lane.b32.xlu1 %v10676_v63, %s10309_s12 }
0x13a0   :  { %2543 = vrot.lane.b32.xlu1 %v10756_v11, %s10305_s13 }
0x13a4   :  { %2545 = vrot.lane.b32.xlu1 %v10754_v10, %s10305_s13 }
0x13a8   :  { %2553 = vrot.lane.b32.xlu1 %v9428_v46, %s10310_s14 }
0x1414   :  { %v2437_v27 = vpop.xlane.xlu1 %2436 }
0x1415   :  { %v2439_v52 = vsub.f32 %v2431_v21, %v2437_v27  ;;  %v8529_v21 = vld [vmem:[%s11818_s8 + $0x68] sm:$0xff] }
0x1416   :  { %v2434_v53 = vpop.xlane.xlu0 %2433 }
0x1417   :  { %v2442_v54 = vmul.f32 1.442695, %v2439_v52  ;;  %v2438_v55 = vsub.f32 %v2430_v14, %v2434_v53  ;;  %v8527_v14 = vld [vmem:[%s11818_s8 + $0x58] sm:$0xff] }
0x1418   :  { %v2457_v56 = vpop.permute.xlu1 %2456 }
0x1419   :  { %10077 = vpow2.f32 %v2442_v54  ;;  %v2440_v57 = vmul.f32 1.442695, %v2438_v55  ;;  %9436 = vmatprep.subr.mxu0 %v2457_v56 }
0x141a   :  { %9437 = vmatpush3.msra.mxu0 %v2457_v56 }
0x141b   :  { %10079 = vpow2.f32 %v2440_v57 }
0x141c   :  { %v2544_v23 = vpop.permute.xlu1 %2543 }
0x141d   :  { %v2565_v32 = vsel %vm328_vm1, %v10752_v8, %v2544_v23 }
0x1420   :  { %v2546_v24 = vpop.permute.xlu1 %2545 }
0x1421   :  { %v2566_v34 = vsel %vm328_vm1, %v10750_v7, %v2546_v24 }
0x1424   :  { %v2554_v25 = vpop.permute.xlu1 %2553 }
0x1425   :  { %v2568_v36 = vsel %vm420_vm2, %v2566_v34, %v2554_v25 }
0x1426   :  { %v10078_v63 = vpop.eup %10077 }
0x1427   :  { %v2447_v58 = vsel %vm420_vm2, %v10078_v63, 0.0 }
0x1428   :  { %v10080_v15 = vpop.eup %10079  ;;  %2448 = vadd.xlane.f32.xlu0 %v2447_v58 }
0x1429   :  { %v2444_v9 = vsel %vm420_vm2, %v10080_v15, 0.0 }
0x142c   :  { %2445 = vadd.xlane.f32.xlu0 %v2444_v9  ;;  %v8525_v9 = vld [vmem:[%s11818_s8 + $0x48] sm:$0xff] }
0x1442   :  { %2454 = vrot.lane.b32.xlu0 %v10681_v1, %s10309_s12  ;;  %v1485_v1 = vld [vmem:[#allocation2 + $0x28] sm:$0xff] }
0x1446   :  { %2551 = vrot.lane.b32.xlu0 %v2328_v47, %s10310_s14  ;;  %v1491_v47 = vld [vmem:[#allocation4 + $0x30] sm:$0xff] }
0x14b1   :  { %v2449_v5 = vpop.xlane.xlu0 %2448 }
0x14b2   :  { %10081 = vrcp.f32 %v2449_v5  ;;  %v8524_v5 = vld [vmem:[%s11818_s8 + $0x40] sm:$0xff] }
0x14b5   :  { %v2446_v61 = vpop.xlane.xlu0 %2445 }
0x14b6   :  { %10083 = vrcp.f32 %v2446_v61 }
0x14b9   :  { %v2455_v4 = vpop.permute.xlu0 %2454 }
0x14ba   :  { %9438 = vmatprep.subr.mxu0 %v2455_v4 }
0x14bb   :  { %9439 = vmatpush3.msra.mxu0 %v2455_v4 }
0x14bc   :  { %9443 = vmatprep.subr.mxu0 %v1487_v13 }
0x14bd   :  { %v2552_v30 = vpop.permute.xlu0 %2551 }
0x14be   :  { %v2567_v35 = vsel %vm420_vm2, %v2565_v32, %v2552_v30 }
0x14bf   :  { %v10082_v6 = vpop.eup %10081 }
0x14c0   :  { %v2453_v12 = vmul.f32 %v10082_v6, %v10078_v63 }
0x14c3   :  { %v10084_v10 = vpop.eup %10083 }
0x14c4   :  { %v2451_v11 = vmul.f32 %v10084_v10, %v10080_v15  ;;  %v8526_v15 = vld [vmem:[%s11818_s8 + $0x50] sm:$0xff] }
0x14c6   :  { %9440 = vmatprep.mubr.msk.f32.mxu0 %vm420_vm2, %v2451_v11 }
0x14c7   :  { %9441 = vmatmul.mubr.msk.f32.vlgmr.msra.gmra.mxu0 %vm420_vm2, %v2453_v12 }
0x14c8   :  { %9444 = vmatpush3.msra.mxu0 %v1487_v13 }
0x14c9   :  { %9445 = vmatprep.subr.mxu0 %v1486_v16 }
0x14ca   :  { %9446 = vmatpush3.msra.mxu0 %v1486_v16 }
0x14cb   :  { %9447 = vmatprep.subr.mxu0 %v1485_v1 }
0x14cc   :  { %9448 = vmatpush3.msra.mxu0 %v1485_v1 }
0x14cd   :  { %9449 = vmatprep.subr.mxu0 %v1484_v26 }
0x14ce   :  { %9450 = vmatpush3.msra.mxu0 %v1484_v26 }
0x14cf   :  { %9465 = vmatprep.subr.mxu0 %v8531_v19 }
0x1587   :  { %v9442_v18 = vpop.f32.mrf.mxu0 }
0x1588   :  { %2561 = vrot.lane.b32.xlu1 %v9442_v18, %s10311_s0 }
0x1589   :  { %v2532_v20 = vpop.f32.mrf.mxu0 }
0x158a   :  { %2559 = vrot.lane.b32.xlu0 %v2532_v20, %s10311_s0 }
0x15fa   :  { %v2562_v33 = vpop.permute.xlu1 %2561 }
0x15fb   :  { %v2570_v38 = vsel %vm1166_vm3, %v2568_v36, %v2562_v33  ;;  %v8579_v36 = vld [vmem:[%s11815_s5 + $0x58] sm:$0xff] }
0x15fc   :  { %v2560_v37 = vpop.permute.xlu0 %2559 }
0x15fd   :  { %v2569_v2 = vsel %vm1166_vm3, %v2567_v35, %v2560_v37  ;;  %v8571_v37 = vld [vmem:[%s11813_s3 + $0x58] sm:$0xff] }
0x15fe   :  { %9451 = vmatprep.mubr.msk.f32.mxu0 %vm96_vm0, %v2569_v2  ;;  %v8570_v2 = vld [vmem:[%s11813_s3 + $0x50] sm:$0xff] }
0x15ff   :  { %9452 = vmatmul.mubr.msk.f32.vlgmr.msra.gmra.mxu0 %vm96_vm0, %v2570_v38  ;;  %v8578_v38 = vld [vmem:[%s11815_s5 + $0x50] sm:$0xff] }
0x1600   :  { %9466 = vmatpush3.msra.mxu0 %v8531_v19 }
0x1601   :  { %9467 = vmatprep.subr.mxu0 %v8530_v50 }
0x1602   :  { %9468 = vmatpush3.msra.mxu0 %v8530_v50 }
0x1603   :  { %9469 = vmatprep.subr.mxu0 %v8529_v21 }
0x1604   :  { %9470 = vmatpush3.msra.mxu0 %v8529_v21 }
0x1605   :  { %9471 = vmatprep.subr.mxu0 %v8528_v29 }
0x1606   :  { %9472 = vmatpush3.msra.mxu0 %v8528_v29 }
0x1607   :  { %9473 = vmatprep.subr.mxu0 %v8527_v14 }
0x1608   :  { %9474 = vmatpush3.msra.mxu0 %v8527_v14 }
0x1609   :  { %9475 = vmatprep.subr.mxu0 %v8526_v15 }
0x160a   :  { %9476 = vmatpush3.msra.mxu0 %v8526_v15 }
0x160b   :  { %9477 = vmatprep.subr.mxu0 %v8525_v9 }
0x160c   :  { %9478 = vmatpush3.msra.mxu0 %v8525_v9 }
0x160d   :  { %9479 = vmatprep.subr.mxu0 %v8524_v5 }
0x160e   :  { %9480 = vmatpush3.msra.mxu0 %v8524_v5 }
0x160f   :  { %9506 = vmatprep.subr.mxu0 %v8579_v36 }
0x16bf   :  { %v9453_v3 = vpop.f32.mrf.mxu0 }
0x16c0   :  { %v2649_v8 = vadd.f32 %v9453_v3, %v10651_v60  ;;  %v8569_v3 = vld [vmem:[%s11813_s3 + $0x48] sm:$0xff] }
0x16c1   :  { %v2643_v62 = vpop.f32.mrf.mxu0 }
0x16c2   :  { %v2644_v39 = vadd.f32 %v2643_v62, %v10649_v59  ;;  %v2655_v7 = vsel %vm96_vm0, %v2649_v8, 0.0  ;;  %v1492_v59 = vld [vmem:[#allocation4 + $0x38] sm:$0xff]  ;;  %v8568_v62 = vld [vmem:[%s11813_s3 + $0x40] sm:$0xff] }
0x16c3   :  { %2656 = vadd.xlane.f32.xlu1 %v2655_v7  ;;  %9454 = vmatprep.subr.mxu1 %v1492_v59  ;;  %v8575_v7 = vld [vmem:[%s11814_s4 + $0x58] sm:$0xff] }
0x16c4   :  { %v2652_v40 = vsel %vm96_vm0, %v2644_v39, 0.0  ;;  %9455 = vmatpush3.msra.mxu1 %v1492_v59  ;;  %v8573_v59 = vld [vmem:[%s11814_s4 + $0x48] sm:$0xff] }
0x16c5   :  { %2653 = vadd.xlane.f32.xlu0 %v2652_v40  ;;  %9456 = vmatprep.subr.mxu1 %v1491_v47 }
0x16c6   :  { %9457 = vmatpush3.msra.mxu1 %v1491_v47  ;;  %v8572_v47 = vld [vmem:[%s11814_s4 + $0x40] sm:$0xff] }
0x16c7   :  { %9458 = vmatprep.subr.mxu1 %v1490_v48 }
0x16c8   :  { %9459 = vmatpush3.msra.mxu1 %v1490_v48 }
0x16c9   :  { %9460 = vmatprep.subr.mxu1 %v1489_v49 }
0x16ca   :  { %9461 = vmatpush3.msra.mxu1 %v1489_v49 }
0x16cb   :  { %9484 = vmatprep.subr.mxu1 %v8571_v37 }
0x174c   :  { %v2657_v41 = vpop.xlane.xlu1 %2656 }
0x174d   :  { %v2659_v31 = vmul.f32 0.03125, %v2657_v41 }
0x174e   :  { %v2654_v42 = vpop.xlane.xlu0 %2653 }
0x174f   :  { %v2658_v28 = vmul.f32 0.03125, %v2654_v42  ;;  %v2661_v43 = vsub.f32 %v2649_v8, %v2659_v31  ;;  %v8577_v8 = vld [vmem:[%s11815_s5 + $0x48] sm:$0xff] }
0x1751   :  { %v2660_v44 = vsub.f32 %v2644_v39, %v2658_v28  ;;  %v2663_v46 = vmul.f32 %v2661_v43, %v2661_v43  ;;  %v8576_v39 = vld [vmem:[%s11815_s5 + $0x40] sm:$0xff] }
0x1753   :  { %v2662_v0 = vmul.f32 %v2660_v44, %v2660_v44  ;;  %v2667_v60 = vsel %vm96_vm0, %v2663_v46, 0.0 }
0x1755   :  { %v2664_v45 = vsel %vm96_vm0, %v2662_v0, 0.0 }
0x1756   :  { %2665 = vadd.xlane.f32.xlu0 %v2664_v45 }
0x175a   :  { %2668 = vadd.xlane.f32.xlu0 %v2667_v60  ;;  %v8574_v60 = vld [vmem:[%s11814_s4 + $0x50] sm:$0xff] }
0x17df   :  { %v2666_v51 = vpop.xlane.xlu0 %2665 }
0x17e0   :  { %v2670_v27 = vmul.f32 0.03125, %v2666_v51 }
0x17e2   :  { %v2672_v52 = vadd.f32 1e-05, %v2670_v27 }
0x17e3   :  { %v2669_v53 = vpop.xlane.xlu0 %2668 }
0x17e4   :  { %10085 = vrsqrt.f32 %v2672_v52  ;;  %v2671_v54 = vmul.f32 0.03125, %v2669_v53 }
0x17e6   :  { %v2673_v55 = vadd.f32 1e-05, %v2671_v54 }
0x17e8   :  { %10087 = vrsqrt.f32 %v2673_v55 }
0x17f1   :  { %v10086_v56 = vpop.eup %10085 }
0x17f2   :  { %v2676_v57 = vmul.f32 %v10086_v56, %v2660_v44 }
0x17f4   :  { %9462 = vmatprep.mubr.msk.f32.mxu1 %vm96_vm0, %v2676_v57 }
0x17f5   :  { %v10088_v63 = vpop.eup %10087 }
0x17f6   :  { %v2677_v58 = vmul.f32 %v10088_v63, %v2661_v43 }
0x17f8   :  { %9463 = vmatmul.mubr.msk.f32.vlgmr.msra.gmra.mxu1 %vm96_vm0, %v2677_v58 }
0x17f9   :  { %9485 = vmatpush3.msra.mxu1 %v8571_v37 }
0x17fa   :  { %9486 = vmatprep.subr.mxu1 %v8570_v2 }
0x17fb   :  { %9487 = vmatpush3.msra.mxu1 %v8570_v2 }
0x17fc   :  { %9488 = vmatprep.subr.mxu1 %v8569_v3 }
0x17fd   :  { %9489 = vmatpush3.msra.mxu1 %v8569_v3 }
0x17fe   :  { %9490 = vmatprep.subr.mxu1 %v8568_v62 }
0x17ff   :  { %9491 = vmatpush3.msra.mxu1 %v8568_v62 }
0x1800   :  { %9495 = vmatprep.subr.mxu1 %v8575_v7 }
0x18b8   :  { %v9464_v61 = vpop.f32.mrf.mxu1 }
0x18b9   :  { %v2760_v10 = vmax.f32 %v9464_v61, 0.0 }
0x18ba   :  { %v2750_v4 = vpop.f32.mrf.mxu1 }
0x18bb   :  { %v2759_v6 = vmax.f32 %v2750_v4, 0.0 }
0x18bd   :  { %9481 = vmatprep.mubr.msk.f32.mxu0 %vm1360_vm4, %v2759_v6 }
0x18be   :  { %9482 = vmatmul.mubr.msk.f32.vlgmr.msra.gmra.mxu0 %vm1360_vm4, %v2760_v10 }
0x18bf   :  { %9507 = vmatpush3.msra.mxu0 %v8579_v36 }
0x18c0   :  { %9508 = vmatprep.subr.mxu0 %v8578_v38 }
0x18c1   :  { %9509 = vmatpush3.msra.mxu0 %v8578_v38 }
0x18c2   :  { %9510 = vmatprep.subr.mxu0 %v8577_v8 }
0x18c3   :  { %9511 = vmatpush3.msra.mxu0 %v8577_v8 }
0x18c4   :  { %9512 = vmatprep.subr.mxu0 %v8576_v39 }
0x18c5   :  { %9513 = vmatpush3.msra.mxu0 %v8576_v39 }
0x197e   :  { %v9483_v11 = vpop.f32.mrf.mxu0 }
0x197f   :  { %v2839_v12 = vadd.f32 %v9483_v11, %v2677_v58 }
0x1980   :  { %v2833_v13 = vpop.f32.mrf.mxu0 }
0x1981   :  { %v2834_v16 = vadd.f32 %v2833_v13, %v2676_v57  ;;  %v2845_v1 = vsel %vm96_vm0, %v2839_v12, 0.0 }
0x1982   :  { %2846 = vadd.xlane.f32.xlu0 %v2845_v1 }
0x1983   :  { %v2842_v26 = vsel %vm96_vm0, %v2834_v16, 0.0 }
0x1984   :  { %2843 = vadd.xlane.f32.xlu1 %v2842_v26 }
0x1a0b   :  { %v2847_v18 = vpop.xlane.xlu0 %2846 }
0x1a0c   :  { %v2849_v20 = vmul.f32 0.03125, %v2847_v18 }
0x1a0d   :  { %v2844_v23 = vpop.xlane.xlu1 %2843 }
0x1a0e   :  { %v2851_v24 = vsub.f32 %v2839_v12, %v2849_v20  ;;  %v2848_v25 = vmul.f32 0.03125, %v2844_v23 }
0x1a10   :  { %v2850_v30 = vsub.f32 %v2834_v16, %v2848_v25  ;;  %v2853_v32 = vmul.f32 %v2851_v24, %v2851_v24 }
0x1a12   :  { %v2857_v33 = vsel %vm96_vm0, %v2853_v32, 0.0  ;;  %v2852_v34 = vmul.f32 %v2850_v30, %v2850_v30 }
0x1a13   :  { %2858 = vadd.xlane.f32.xlu0 %v2857_v33 }
0x1a14   :  { %v2854_v35 = vsel %vm96_vm0, %v2852_v34, 0.0 }
0x1a15   :  { %2855 = vadd.xlane.f32.xlu1 %v2854_v35 }
0x1a9c   :  { %v2859_v40 = vpop.xlane.xlu0 %2858 }
0x1a9d   :  { %v2861_v41 = vmul.f32 0.03125, %v2859_v40 }
0x1a9e   :  { %v2856_v31 = vpop.xlane.xlu1 %2855 }
0x1a9f   :  { %v2863_v42 = vadd.f32 1e-05, %v2861_v41  ;;  %v2860_v28 = vmul.f32 0.03125, %v2856_v31 }
0x1aa1   :  { %v2862_v43 = vadd.f32 1e-05, %v2860_v28  ;;  %10089 = vrsqrt.f32 %v2863_v42 }
0x1aa3   :  { %10091 = vrsqrt.f32 %v2862_v43 }
0x1aae   :  { %v10090_v44 = vpop.eup %10089 }
0x1aaf   :  { %v10891_v46 = vmul.f32 %v10090_v44, %v2851_v24 }
0x1ab0   :  { %v10092_v0 = vpop.eup %10091 }
0x1ab1   :  { %v10889_v45 = vmul.f32 %v10092_v0, %v2850_v30 }
0x1ab3   :  { %9492 = vmatprep.mubr.msk.f32.mxu1 %vm96_vm0, %v10889_v45  ;;  %9514 = vmatprep.mubr.msk.f32.mxu0 %vm96_vm0, %v10889_v45 }
0x1ab4   :  { %9493 = vmatmul.mubr.msk.f32.vlgmr.msra.gmra.mxu1 %vm96_vm0, %v10891_v46  ;;  %9515 = vmatmul.mubr.msk.f32.vlgmr.msra.gmra.mxu0 %vm96_vm0, %v10891_v46 }
0x1ab5   :  { %9496 = vmatpush3.msra.mxu1 %v8575_v7  ;;  %9503 = vmatprep.mubr.msk.f32.mxu1 %vm96_vm0, %v10889_v45 }
0x1ab6   :  { %9497 = vmatprep.subr.mxu1 %v8574_v60 }
0x1ab7   :  { %9498 = vmatpush3.msra.mxu1 %v8574_v60 }
0x1ab8   :  { %9499 = vmatprep.subr.mxu1 %v8573_v59 }
0x1ab9   :  { %9500 = vmatpush3.msra.mxu1 %v8573_v59 }
0x1aba   :  { %9501 = vmatprep.subr.mxu1 %v8572_v47 }
0x1abb   :  { %9502 = vmatpush3.msra.mxu1 %v8572_v47 }
0x1abc   :  { %9504 = vmatmul.mubr.msk.f32.vlgmr.msra.gmra.mxu1 %vm96_vm0, %v10891_v46 }
0x1b74   :  { %v10914_v48 = vpop.f32.mrf.mxu1  ;;  %v10916_v49 = vpop.f32.mrf.mxu0 }
0x1b75   :  { %9524 = vmatprep.subr.mxu0 %v10916_v49 }
0x1b76   :  { %v10919_v19 = vpop.f32.mrf.mxu1  ;;  %v10921_v50 = vpop.f32.mrf.mxu0  ;;  %9525 = vmatpush3.msra.mxu0 %v10916_v49 }
0x1b77   :  { %9521 = vmatprep.mubr.msk.f32.mxu1 %vm328_vm1, %v10919_v19  ;;  %9526 = vmatprep.subr.mxu0 %v10921_v50 }
0x1b78   :  { %9527 = vmatpush3.msra.mxu0 %v10921_v50 }
0x1b7c   :  { %v10928_v21 = vpop.f32.mrf.mxu1 }
0x1b7d   :  { %3333 = vrot.lane.b32.xlu1 %v10928_v21, %s10307_s6  ;;  %9517 = vmatprep.subr.msk.mxu1 %vm328_vm1, %v10928_v21 }
0x1b7e   :  { %v10934_v29 = vpop.f32.mrf.mxu1  ;;  %9518 = vmatpush3.xpose.msk.msra.mxu1 %vm328_vm1, %v10928_v21 }
0x1b7f   :  { %3331 = vrot.lane.b32.xlu0 %v10934_v29, %s10307_s6  ;;  %9519 = vmatprep.subr.msk.mxu1 %vm328_vm1, %v10934_v29 }
0x1b81   :  { %3327 = vrot.lane.b32.xlu1 %v10919_v19, %s10307_s6 }
0x1b82   :  { %9520 = vmatpush3.xpose.msk.msra.mxu1 %vm328_vm1, %v10934_v29 }
0x1b85   :  { %3329 = vrot.lane.b32.xlu1 %v10914_v48, %s10307_s6  ;;  %9522 = vmatmul.mubr.msk.f32.vlgmr.msra.gmra.mxu1 %vm328_vm1, %v10914_v48 }
0x1bef   :  { %v3334_v14 = vpop.permute.xlu1 %3333 }
0x1bf0   :  { %9531 = vmatprep.subr.msk.mxu1 %vm328_vm1, %v3334_v14 }
0x1bf1   :  { %v3332_v51 = vpop.permute.xlu0 %3331  ;;  %9532 = vmatpush3.xpose.msk.msra.mxu1 %vm328_vm1, %v3334_v14 }
0x1bf2   :  { %9533 = vmatprep.subr.msk.mxu1 %vm328_vm1, %v3332_v51 }
0x1bf3   :  { %v3328_v27 = vpop.permute.xlu1 %3327 }
0x1bf4   :  { %9535 = vmatprep.mubr.msk.f32.mxu1 %vm328_vm1, %v3328_v27 }
0x1bf5   :  { %9534 = vmatpush3.xpose.msk.msra.mxu1 %vm328_vm1, %v3332_v51 }
0x1bf7   :  { %v3330_v52 = vpop.permute.xlu1 %3329 }
0x1bf8   :  { %9536 = vmatmul.mubr.msk.f32.vlgmr.msra.gmra.mxu1 %vm328_vm1, %v3330_v52 }
0x1c45   :  { %v9523_v53 = vpop.f32.mrf.mxu1 }
0x1c46   :  { %v3221_v54 = vmul.f32 0.35355338, %v9523_v53 }
0x1c47   :  { %v3211_v55 = vpop.f32.mrf.mxu1 }
0x1c48   :  { %v3223_v56 = vadd.f32 %v10761_v17, %v3221_v54  ;;  %v3220_v57 = vmul.f32 0.35355338, %v3211_v55 }
0x1c4a   :  { %v3222_v63 = vadd.f32 %v10768_v22, %v3220_v57  ;;  %v3227_v58 = vsel %vm420_vm2, %v3223_v56, -inf }
0x1c4b   :  { %3228 = vmax.xlane.f32.xlu1 %v3227_v58 }
0x1c4c   :  { %v3224_v15 = vsel %vm420_vm2, %v3222_v63, -inf }
0x1c4d   :  { %3225 = vmax.xlane.f32.xlu0 %v3224_v15 }
0x1c5c   :  { %3448 = vrot.lane.b32.xlu1 %v10916_v49, %s10307_s6 }
0x1cb8   :  { %v9537_v9 = vpop.f32.mrf.mxu1 }
0x1cb9   :  { %v3419_v61 = vmul.f32 0.35355338, %v9537_v9 }
0x1cba   :  { %v3409_v5 = vpop.f32.mrf.mxu1 }
0x1cbb   :  { %v3418_v4 = vmul.f32 0.35355338, %v3409_v5  ;;  %v3421_v10 = vadd.f32 %v10761_v17, %v3419_v61 }
0x1cbd   :  { %v3420_v6 = vadd.f32 %v10768_v22, %v3418_v4  ;;  %v3425_v12 = vsel %vm420_vm2, %v3421_v10, -inf }
0x1cbf   :  { %v3422_v11 = vsel %vm420_vm2, %v3420_v6, -inf }
0x1cc0   :  { %3423 = vmax.xlane.f32.xlu0 %v3422_v11 }
0x1cc4   :  { %3426 = vmax.xlane.f32.xlu0 %v3425_v12 }
0x1cd4   :  { %v3229_v13 = vpop.xlane.xlu1 %3228 }
0x1cd5   :  { %v3231_v16 = vsub.f32 %v3223_v56, %v3229_v13 }
0x1cd6   :  { %v3226_v1 = vpop.xlane.xlu0 %3225 }
0x1cd7   :  { %v3234_v26 = vmul.f32 1.442695, %v3231_v16  ;;  %v3230_v18 = vsub.f32 %v3222_v63, %v3226_v1 }
0x1cd8   :  { %v3449_v20 = vpop.permute.xlu1 %3448 }
0x1cd9   :  { %10093 = vpow2.f32 %v3234_v26  ;;  %v3232_v23 = vmul.f32 1.442695, %v3230_v18  ;;  %9538 = vmatprep.subr.mxu0 %v3449_v20 }
0x1cdb   :  { %10095 = vpow2.f32 %v3232_v23 }
0x1ce6   :  { %v10094_v24 = vpop.eup %10093 }
0x1ce7   :  { %v3239_v25 = vsel %vm420_vm2, %v10094_v24, 0.0 }
0x1ce8   :  { %v10096_v30 = vpop.eup %10095  ;;  %3240 = vadd.xlane.f32.xlu0 %v3239_v25 }
0x1ce9   :  { %v3236_v32 = vsel %vm420_vm2, %v10096_v30, 0.0 }
0x1cea   :  { %3237 = vadd.xlane.f32.xlu1 %v3236_v32 }
0x1cfb   :  { %3539 = vrot.lane.b32.xlu1 %v10928_v21, %s10308_s11 }
0x1cff   :  { %3537 = vrot.lane.b32.xlu1 %v10934_v29, %s10308_s11 }
0x1d49   :  { %v3424_v33 = vpop.xlane.xlu0 %3423 }
0x1d4a   :  { %v3428_v34 = vsub.f32 %v3420_v6, %v3424_v33 }
0x1d4c   :  { %v3430_v35 = vmul.f32 1.442695, %v3428_v34 }
0x1d4d   :  { %v3427_v37 = vpop.xlane.xlu0 %3426 }
0x1d4e   :  { %10097 = vpow2.f32 %v3430_v35  ;;  %v3429_v36 = vsub.f32 %v3421_v10, %v3427_v37 }
0x1d50   :  { %v3432_v2 = vmul.f32 1.442695, %v3429_v36 }
0x1d52   :  { %10099 = vpow2.f32 %v3432_v2 }
0x1d5b   :  { %v10098_v38 = vpop.eup %10097 }
0x1d5c   :  { %v3434_v3 = vsel %vm420_vm2, %v10098_v38, 0.0 }
0x1d5d   :  { %3435 = vadd.xlane.f32.xlu1 %v3434_v3 }
0x1d5f   :  { %v10100_v8 = vpop.eup %10099 }
0x1d60   :  { %v3437_v62 = vsel %vm420_vm2, %v10100_v8, 0.0 }
0x1d61   :  { %3438 = vadd.xlane.f32.xlu0 %v3437_v62 }
0x1d6e   :  { %3535 = vrot.lane.b32.xlu1 %v10914_v48, %s10308_s11 }
0x1d71   :  { %v3241_v39 = vpop.xlane.xlu0 %3240 }
0x1d72   :  { %10101 = vrcp.f32 %v3241_v39 }
0x1d73   :  { %v3238_v7 = vpop.xlane.xlu1 %3237 }
0x1d74   :  { %10103 = vrcp.f32 %v3238_v7 }
0x1d77   :  { %3446 = vrot.lane.b32.xlu0 %v10921_v50, %s10307_s6  ;;  %v3540_v28 = vpop.permute.xlu1 %3539 }
0x1d7b   :  { %3533 = vrot.lane.b32.xlu0 %v10919_v19, %s10308_s11  ;;  %v3538_v43 = vpop.permute.xlu1 %3537 }
0x1d7f   :  { %v10102_v40 = vpop.eup %10101 }
0x1d80   :  { %v3245_v42 = vmul.f32 %v10102_v40, %v10094_v24 }
0x1d81   :  { %v10104_v41 = vpop.eup %10103 }
0x1d82   :  { %v3243_v31 = vmul.f32 %v10104_v41, %v10096_v30 }
0x1d84   :  { %9528 = vmatprep.mubr.msk.f32.mxu0 %vm420_vm2, %v3243_v31 }
0x1d85   :  { %9529 = vmatmul.mubr.msk.f32.vlgmr.msra.gmra.mxu0 %vm420_vm2, %v3245_v42 }
0x1d86   :  { %9539 = vmatpush3.msra.mxu0 %v3449_v20 }
0x1de6   :  { %v3436_v44 = vpop.xlane.xlu1 %3435 }
0x1de7   :  { %10105 = vrcp.f32 %v3436_v44 }
0x1dea   :  { %v3439_v0 = vpop.xlane.xlu0 %3438  ;;  %v3536_v52 = vpop.permute.xlu1 %3535 }
0x1deb   :  { %10107 = vrcp.f32 %v3439_v0 }
0x1dee   :  { %v3447_v60 = vpop.permute.xlu0 %3446 }
0x1def   :  { %9540 = vmatprep.subr.mxu0 %v3447_v60 }
0x1df0   :  { %9541 = vmatpush3.msra.mxu0 %v3447_v60 }
0x1df1   :  { %9545 = vmatprep.subr.msk.mxu0 %vm328_vm1, %v3540_v28 }
0x1df2   :  { %v3534_v27 = vpop.permute.xlu0 %3533 }
0x1df4   :  { %v10106_v59 = vpop.eup %10105 }
0x1df5   :  { %v3441_v47 = vmul.f32 %v10106_v59, %v10098_v38 }
0x1df7   :  { %9542 = vmatprep.mubr.msk.f32.mxu0 %vm420_vm2, %v3441_v47 }
0x1df8   :  { %v10108_v14 = vpop.eup %10107 }
0x1df9   :  { %v3443_v51 = vmul.f32 %v10108_v14, %v10100_v8 }
0x1dfb   :  { %9543 = vmatmul.mubr.msk.f32.vlgmr.msra.gmra.mxu0 %vm420_vm2, %v3443_v51 }
0x1dfc   :  { %9546 = vmatpush3.xpose.msk.msra.mxu0 %vm328_vm1, %v3540_v28  ;;  %9549 = vmatprep.mubr.msk.f32.mxu0 %vm328_vm1, %v3534_v27 }
0x1dfd   :  { %9547 = vmatprep.subr.msk.mxu0 %vm328_vm1, %v3538_v43 }
0x1e00   :  { %9548 = vmatpush3.xpose.msk.msra.mxu0 %vm328_vm1, %v3538_v43 }
0x1e03   :  { %9550 = vmatmul.mubr.msk.f32.vlgmr.msra.gmra.mxu0 %vm328_vm1, %v3536_v52 }
0x1e45   :  { %v10990_v53 = vpop.f32.mrf.mxu0 }
0x1e47   :  { %v10992_v54 = vpop.f32.mrf.mxu0 }
0x1ebb   :  { %v10994_v55 = vpop.f32.mrf.mxu0 }
0x1ebd   :  { %v10996_v56 = vpop.f32.mrf.mxu0 }
0x1ec3   :  { %v9551_v57 = vpop.f32.mrf.mxu0 }
0x1ec4   :  { %v3625_v63 = vmul.f32 0.35355338, %v9551_v57  ;;  %v2886_v57 = vld [vmem:[#allocation2 + $0x50] sm:$0xff] }
0x1ec5   :  { %v3615_v58 = vpop.f32.mrf.mxu0 }
0x1ec6   :  { %v3627_v15 = vadd.f32 %v10761_v17, %v3625_v63  ;;  %v3624_v9 = vmul.f32 0.35355338, %v3615_v58  ;;  %v2884_v63 = vld [vmem:[#allocation2 + $0x40] sm:$0xff] }
0x1ec8   :  { %v3626_v5 = vadd.f32 %v10768_v22, %v3624_v9  ;;  %v3631_v61 = vsel %vm420_vm2, %v3627_v15, -inf }
0x1ec9   :  { %3632 = vmax.xlane.f32.xlu1 %v3631_v61 }
0x1eca   :  { %v3628_v4 = vsel %vm420_vm2, %v3626_v5, -inf }
0x1ecb   :  { %3629 = vmax.xlane.f32.xlu0 %v3628_v4 }
0x1eda   :  { %3652 = vrot.lane.b32.xlu1 %v10916_v49, %s10308_s11 }
0x1ede   :  { %3743 = vrot.lane.b32.xlu1 %v10928_v21, %s10309_s12 }
0x1ee2   :  { %3741 = vrot.lane.b32.xlu1 %v10934_v29, %s10309_s12 }
0x1ee6   :  { %3739 = vrot.lane.b32.xlu1 %v10914_v48, %s10309_s12 }
0x1f52   :  { %v3633_v6 = vpop.xlane.xlu1 %3632 }
0x1f53   :  { %v3635_v10 = vsub.f32 %v3627_v15, %v3633_v6 }
0x1f54   :  { %v3630_v11 = vpop.xlane.xlu0 %3629 }
0x1f55   :  { %v3638_v12 = vmul.f32 1.442695, %v3635_v10  ;;  %v3634_v13 = vsub.f32 %v3626_v5, %v3630_v11 }
0x1f56   :  { %v3653_v16 = vpop.permute.xlu1 %3652 }
0x1f57   :  { %10109 = vpow2.f32 %v3638_v12  ;;  %v3636_v1 = vmul.f32 1.442695, %v3634_v13  ;;  %9552 = vmatprep.subr.mxu1 %v3653_v16 }
0x1f58   :  { %9553 = vmatpush3.msra.mxu1 %v3653_v16 }
0x1f59   :  { %10111 = vpow2.f32 %v3636_v1 }
0x1f5a   :  { %v3744_v24 = vpop.permute.xlu1 %3743 }
0x1f64   :  { %v10110_v26 = vpop.eup %10109 }
0x1f65   :  { %v3643_v21 = vsel %vm420_vm2, %v10110_v26, 0.0 }
0x1f66   :  { %v10112_v18 = vpop.eup %10111  ;;  %3644 = vadd.xlane.f32.xlu0 %v3643_v21 }
0x1f67   :  { %v3640_v29 = vsel %vm420_vm2, %v10112_v18, 0.0 }
0x1f6a   :  { %3641 = vadd.xlane.f32.xlu0 %v3640_v29 }
0x1f80   :  { %3650 = vrot.lane.b32.xlu0 %v10921_v50, %s10308_s11 }
0x1f84   :  { %3737 = vrot.lane.b32.xlu0 %v10919_v19, %s10309_s12  ;;  %v3742_v19 = vpop.permute.xlu1 %3741 }
0x1f88   :  { %v3740_v35 = vpop.permute.xlu1 %3739 }
0x1fef   :  { %v3645_v48 = vpop.xlane.xlu0 %3644 }
0x1ff0   :  { %10113 = vrcp.f32 %v3645_v48 }
0x1ff3   :  { %v3642_v20 = vpop.xlane.xlu0 %3641 }
0x1ff4   :  { %10115 = vrcp.f32 %v3642_v20 }
0x1ff7   :  { %v3651_v23 = vpop.permute.xlu0 %3650 }
0x1ff8   :  { %9554 = vmatprep.subr.mxu1 %v3651_v23 }
0x1ff9   :  { %9555 = vmatpush3.msra.mxu1 %v3651_v23 }
0x1ffa   :  { %9559 = vmatprep.subr.msk.mxu1 %vm328_vm1, %v3744_v24 }
0x1ffb   :  { %v3738_v34 = vpop.permute.xlu0 %3737 }
0x1ffd   :  { %v10114_v25 = vpop.eup %10113 }
0x1ffe   :  { %v3649_v33 = vmul.f32 %v10114_v25, %v10110_v26 }
0x2001   :  { %v10116_v30 = vpop.eup %10115 }
0x2002   :  { %v3647_v32 = vmul.f32 %v10116_v30, %v10112_v18 }
0x2004   :  { %9556 = vmatprep.mubr.msk.f32.mxu1 %vm420_vm2, %v3647_v32 }
0x2005   :  { %9557 = vmatmul.mubr.msk.f32.vlgmr.msra.gmra.mxu1 %vm420_vm2, %v3649_v33 }
0x2006   :  { %9560 = vmatpush3.xpose.msk.msra.mxu1 %vm328_vm1, %v3744_v24  ;;  %9563 = vmatprep.mubr.msk.f32.mxu1 %vm328_vm1, %v3738_v34 }
0x2007   :  { %9561 = vmatprep.subr.msk.mxu1 %vm328_vm1, %v3742_v19 }
0x200a   :  { %9562 = vmatpush3.xpose.msk.msra.mxu1 %vm328_vm1, %v3742_v19 }
0x200d   :  { %9564 = vmatmul.mubr.msk.f32.vlgmr.msra.gmra.mxu1 %vm328_vm1, %v3740_v35  ;;  %v2891_v35 = vld [vmem:[#allocation4 + $0x50] sm:$0xff] }
0x20c5   :  { %v9558_v37 = vpop.f32.mrf.mxu1 }
0x20c7   :  { %v3728_v36 = vpop.f32.mrf.mxu1 }
0x20cd   :  { %v9565_v2 = vpop.f32.mrf.mxu1 }
0x20ce   :  { %v3829_v38 = vmul.f32 0.35355338, %v9565_v2  ;;  %v8587_v2 = vld [vmem:[%s11818_s8 + $0xb8] sm:$0xff] }
0x20cf   :  { %v3819_v3 = vpop.f32.mrf.mxu1 }
0x20d0   :  { %v3831_v8 = vadd.f32 %v10761_v17, %v3829_v38  ;;  %v3828_v62 = vmul.f32 0.35355338, %v3819_v3  ;;  %v8586_v38 = vld [vmem:[%s11818_s8 + $0xb0] sm:$0xff]  ;;  %v8585_v3 = vld [vmem:[%s11818_s8 + $0xa8] sm:$0xff] }
0x20d2   :  { %v3830_v39 = vadd.f32 %v10768_v22, %v3828_v62  ;;  %v3835_v7 = vsel %vm420_vm2, %v3831_v8, -inf  ;;  %v8583_v62 = vld [vmem:[%s11818_s8 + $0x98] sm:$0xff] }
0x20d3   :  { %3836 = vmax.xlane.f32.xlu1 %v3835_v7 }
0x20d4   :  { %v3832_v40 = vsel %vm420_vm2, %v3830_v39, -inf }
0x20d5   :  { %3833 = vmax.xlane.f32.xlu0 %v3832_v40 }
0x20e4   :  { %3856 = vrot.lane.b32.xlu1 %v10916_v49, %s10309_s12 }
0x20e8   :  { %3943 = vrot.lane.b32.xlu1 %v10996_v56, %s10305_s13  ;;  %v2887_v56 = vld [vmem:[#allocation2 + $0x58] sm:$0xff] }
0x20ec   :  { %3945 = vrot.lane.b32.xlu1 %v10994_v55, %s10305_s13 }
0x20f0   :  { %3953 = vrot.lane.b32.xlu1 %v9558_v37, %s10310_s14  ;;  %v2890_v37 = vld [vmem:[#allocation4 + $0x48] sm:$0xff] }
0x215c   :  { %v3837_v17 = vpop.xlane.xlu1 %3836 }
0x215d   :  { %v3839_v41 = vsub.f32 %v3831_v8, %v3837_v17  ;;  %v8584_v8 = vld [vmem:[%s11818_s8 + $0xa0] sm:$0xff] }
0x215e   :  { %v3834_v22 = vpop.xlane.xlu0 %3833 }
0x215f   :  { %v3842_v31 = vmul.f32 1.442695, %v3839_v41  ;;  %v3838_v42 = vsub.f32 %v3830_v39, %v3834_v22 }
0x2160   :  { %v3857_v28 = vpop.permute.xlu1 %3856 }
0x2161   :  { %10117 = vpow2.f32 %v3842_v31  ;;  %v3840_v43 = vmul.f32 1.442695, %v3838_v42  ;;  %9566 = vmatprep.subr.mxu0 %v3857_v28 }
0x2162   :  { %9567 = vmatpush3.msra.mxu0 %v3857_v28 }
0x2163   :  { %10119 = vpow2.f32 %v3840_v43 }
0x2164   :  { %v3944_v9 = vpop.permute.xlu1 %3943 }
0x2165   :  { %v3965_v6 = vsel %vm328_vm1, %v10992_v54, %v3944_v9 }
0x2168   :  { %v3946_v5 = vpop.permute.xlu1 %3945 }
0x2169   :  { %v3966_v11 = vsel %vm328_vm1, %v10990_v53, %v3946_v5 }
0x216c   :  { %v3954_v61 = vpop.permute.xlu1 %3953 }
0x216d   :  { %v3968_v16 = vsel %vm420_vm2, %v3966_v11, %v3954_v61  ;;  %v8627_v11 = vld [vmem:[%s11813_s3 + $0x78] sm:$0xff] }
0x216e   :  { %v10118_v49 = vpop.eup %10117 }
0x216f   :  { %v3847_v44 = vsel %vm420_vm2, %v10118_v49, 0.0 }
0x2170   :  { %v10120_v0 = vpop.eup %10119  ;;  %3848 = vadd.xlane.f32.xlu0 %v3847_v44  ;;  %v8581_v44 = vld [vmem:[%s11818_s8 + $0x88] sm:$0xff] }
0x2171   :  { %v3844_v60 = vsel %vm420_vm2, %v10120_v0, 0.0 }
0x2174   :  { %3845 = vadd.xlane.f32.xlu0 %v3844_v60 }
0x218a   :  { %3854 = vrot.lane.b32.xlu0 %v10921_v50, %s10309_s12  ;;  %v2885_v50 = vld [vmem:[#allocation2 + $0x48] sm:$0xff] }
0x218e   :  { %3951 = vrot.lane.b32.xlu0 %v3728_v36, %s10310_s14  ;;  %v2889_v36 = vld [vmem:[#allocation4 + $0x40] sm:$0xff] }
0x21f9   :  { %v3849_v59 = vpop.xlane.xlu0 %3848 }
0x21fa   :  { %10121 = vrcp.f32 %v3849_v59 }
0x21fd   :  { %v3846_v47 = vpop.xlane.xlu0 %3845 }
0x21fe   :  { %10123 = vrcp.f32 %v3846_v47 }
0x2201   :  { %v3855_v14 = vpop.permute.xlu0 %3854 }
0x2202   :  { %9568 = vmatprep.subr.mxu0 %v3855_v14 }
0x2203   :  { %9569 = vmatpush3.msra.mxu0 %v3855_v14 }
0x2204   :  { %9573 = vmatprep.subr.mxu0 %v2887_v56 }
0x2205   :  { %v3952_v4 = vpop.permute.xlu0 %3951 }
0x2206   :  { %v3967_v12 = vsel %vm420_vm2, %v3965_v6, %v3952_v4 }
0x2207   :  { %v10122_v51 = vpop.eup %10121 }
0x2208   :  { %v3853_v55 = vmul.f32 %v10122_v51, %v10118_v49  ;;  %v8582_v49 = vld [vmem:[%s11818_s8 + $0x90] sm:$0xff] }
0x220b   :  { %v10124_v27 = vpop.eup %10123 }
0x220c   :  { %v3851_v52 = vmul.f32 %v10124_v27, %v10120_v0  ;;  %v8580_v0 = vld [vmem:[%s11818_s8 + $0x80] sm:$0xff] }
0x220e   :  { %9570 = vmatprep.mubr.msk.f32.mxu0 %vm420_vm2, %v3851_v52 }
0x220f   :  { %9571 = vmatmul.mubr.msk.f32.vlgmr.msra.gmra.mxu0 %vm420_vm2, %v3853_v55 }
0x2210   :  { %9574 = vmatpush3.msra.mxu0 %v2887_v56 }
0x2211   :  { %9575 = vmatprep.subr.mxu0 %v2886_v57 }
0x2212   :  { %9576 = vmatpush3.msra.mxu0 %v2886_v57 }
0x2213   :  { %9577 = vmatprep.subr.mxu0 %v2885_v50 }
0x2214   :  { %9578 = vmatpush3.msra.mxu0 %v2885_v50 }
0x2215   :  { %9579 = vmatprep.subr.mxu0 %v2884_v63 }
0x2216   :  { %9580 = vmatpush3.msra.mxu0 %v2884_v63 }
0x2217   :  { %9595 = vmatprep.subr.mxu0 %v8587_v2 }
0x22cf   :  { %v9572_v58 = vpop.f32.mrf.mxu0 }
0x22d0   :  { %3961 = vrot.lane.b32.xlu1 %v9572_v58, %s10311_s0 }
0x22d1   :  { %v3932_v15 = vpop.f32.mrf.mxu0 }
0x22d2   :  { %3959 = vrot.lane.b32.xlu0 %v3932_v15, %s10311_s0 }
0x2342   :  { %v3962_v10 = vpop.permute.xlu1 %3961 }
0x2343   :  { %v3970_v26 = vsel %vm1166_vm3, %v3968_v16, %v3962_v10  ;;  %v8634_v16 = vld [vmem:[%s11815_s5 + $0x70] sm:$0xff] }
0x2344   :  { %v3960_v13 = vpop.permute.xlu0 %3959 }
0x2345   :  { %v3969_v1 = vsel %vm1166_vm3, %v3967_v12, %v3960_v13  ;;  %v8635_v12 = vld [vmem:[%s11815_s5 + $0x78] sm:$0xff]  ;;  %v8626_v13 = vld [vmem:[%s11813_s3 + $0x70] sm:$0xff] }
0x2346   :  { %9581 = vmatprep.mubr.msk.f32.mxu0 %vm96_vm0, %v3969_v1  ;;  %v8625_v1 = vld [vmem:[%s11813_s3 + $0x68] sm:$0xff] }
0x2347   :  { %9582 = vmatmul.mubr.msk.f32.vlgmr.msra.gmra.mxu0 %vm96_vm0, %v3970_v26  ;;  %v8633_v26 = vld [vmem:[%s11815_s5 + $0x68] sm:$0xff] }
0x2348   :  { %9596 = vmatpush3.msra.mxu0 %v8587_v2 }
0x2349   :  { %9597 = vmatprep.subr.mxu0 %v8586_v38 }
0x234a   :  { %9598 = vmatpush3.msra.mxu0 %v8586_v38 }
0x234b   :  { %9599 = vmatprep.subr.mxu0 %v8585_v3 }
0x234c   :  { %9600 = vmatpush3.msra.mxu0 %v8585_v3 }
0x234d   :  { %9601 = vmatprep.subr.mxu0 %v8584_v8 }
0x234e   :  { %9602 = vmatpush3.msra.mxu0 %v8584_v8 }
0x234f   :  { %9603 = vmatprep.subr.mxu0 %v8583_v62 }
0x2350   :  { %9604 = vmatpush3.msra.mxu0 %v8583_v62 }
0x2351   :  { %9605 = vmatprep.subr.mxu0 %v8582_v49 }
0x2352   :  { %9606 = vmatpush3.msra.mxu0 %v8582_v49 }
0x2353   :  { %9607 = vmatprep.subr.mxu0 %v8581_v44 }
0x2354   :  { %9608 = vmatpush3.msra.mxu0 %v8581_v44 }
0x2355   :  { %9609 = vmatprep.subr.mxu0 %v8580_v0 }
0x2356   :  { %9610 = vmatpush3.msra.mxu0 %v8580_v0 }
0x2357   :  { %9636 = vmatprep.subr.mxu0 %v8635_v12 }
0x2407   :  { %v9583_v21 = vpop.f32.mrf.mxu0 }
0x2408   :  { %v4049_v54 = vadd.f32 %v9583_v21, %v10891_v46  ;;  %v8624_v21 = vld [vmem:[%s11813_s3 + $0x60] sm:$0xff] }
0x2409   :  { %v4043_v18 = vpop.f32.mrf.mxu0 }
0x240a   :  { %v4044_v29 = vadd.f32 %v4043_v18, %v10889_v45  ;;  %v4055_v53 = vsel %vm96_vm0, %v4049_v54, 0.0  ;;  %v2892_v45 = vld [vmem:[#allocation4 + $0x58] sm:$0xff] }
0x240b   :  { %4056 = vadd.xlane.f32.xlu1 %v4055_v53  ;;  %9584 = vmatprep.subr.mxu1 %v2892_v45  ;;  %v8631_v18 = vld [vmem:[%s11814_s4 + $0x78] sm:$0xff] }
0x240c   :  { %v4052_v48 = vsel %vm96_vm0, %v4044_v29, 0.0  ;;  %9585 = vmatpush3.msra.mxu1 %v2892_v45 }
0x240d   :  { %4053 = vadd.xlane.f32.xlu0 %v4052_v48  ;;  %9586 = vmatprep.subr.mxu1 %v2891_v35 }
0x240e   :  { %9587 = vmatpush3.msra.mxu1 %v2891_v35 }
0x240f   :  { %9588 = vmatprep.subr.mxu1 %v2890_v37 }
0x2410   :  { %9589 = vmatpush3.msra.mxu1 %v2890_v37 }
0x2411   :  { %9590 = vmatprep.subr.mxu1 %v2889_v36 }
0x2412   :  { %9591 = vmatpush3.msra.mxu1 %v2889_v36 }
0x2413   :  { %9614 = vmatprep.subr.mxu1 %v8627_v11 }
0x2494   :  { %v4057_v20 = vpop.xlane.xlu1 %4056 }
0x2495   :  { %v4059_v23 = vmul.f32 0.03125, %v4057_v20 }
0x2496   :  { %v4054_v24 = vpop.xlane.xlu0 %4053 }
0x2497   :  { %v4058_v25 = vmul.f32 0.03125, %v4054_v24  ;;  %v4061_v30 = vsub.f32 %v4049_v54, %v4059_v23  ;;  %v8632_v54 = vld [vmem:[%s11815_s5 + $0x60] sm:$0xff] }
0x2499   :  { %v4060_v32 = vsub.f32 %v4044_v29, %v4058_v25  ;;  %v4063_v19 = vmul.f32 %v4061_v30, %v4061_v30 }
0x249b   :  { %v4062_v33 = vmul.f32 %v4060_v32, %v4060_v32  ;;  %v4067_v46 = vsel %vm96_vm0, %v4063_v19, 0.0  ;;  %v8629_v19 = vld [vmem:[%s11814_s4 + $0x68] sm:$0xff] }
0x249d   :  { %v4064_v34 = vsel %vm96_vm0, %v4062_v33, 0.0 }
0x249e   :  { %4065 = vadd.xlane.f32.xlu0 %v4064_v34  ;;  %v8630_v34 = vld [vmem:[%s11814_s4 + $0x70] sm:$0xff] }
0x24a2   :  { %4068 = vadd.xlane.f32.xlu0 %v4067_v46  ;;  %v8628_v46 = vld [vmem:[%s11814_s4 + $0x60] sm:$0xff] }
0x2527   :  { %v4066_v39 = vpop.xlane.xlu0 %4065 }
0x2528   :  { %v4070_v7 = vmul.f32 0.03125, %v4066_v39 }
0x252a   :  { %v4072_v40 = vadd.f32 1e-05, %v4070_v7 }
0x252b   :  { %v4069_v17 = vpop.xlane.xlu0 %4068 }
0x252c   :  { %10125 = vrsqrt.f32 %v4072_v40  ;;  %v4071_v41 = vmul.f32 0.03125, %v4069_v17 }
0x252e   :  { %v4073_v22 = vadd.f32 1e-05, %v4071_v41  ;;  %v11189_v41 = vld [vmem:[%s11812_s2 + $0x8] sm:$0xff] }
0x2530   :  { %10127 = vrsqrt.f32 %v4073_v22 }
0x2539   :  { %v10126_v31 = vpop.eup %10125 }
0x253a   :  { %v4076_v42 = vmul.f32 %v10126_v31, %v4060_v32 }
0x253c   :  { %9592 = vmatprep.mubr.msk.f32.mxu1 %vm96_vm0, %v4076_v42 }
0x253d   :  { %v10128_v28 = vpop.eup %10127 }
0x253e   :  { %v4077_v43 = vmul.f32 %v10128_v28, %v4061_v30 }
0x2540   :  { %9593 = vmatmul.mubr.msk.f32.vlgmr.msra.gmra.mxu1 %vm96_vm0, %v4077_v43 }
0x2541   :  { %9615 = vmatpush3.msra.mxu1 %v8627_v11 }
0x2542   :  { %9616 = vmatprep.subr.mxu1 %v8626_v13 }
0x2543   :  { %9617 = vmatpush3.msra.mxu1 %v8626_v13 }
0x2544   :  { %9618 = vmatprep.subr.mxu1 %v8625_v1 }
0x2545   :  { %9619 = vmatpush3.msra.mxu1 %v8625_v1 }
0x2546   :  { %9620 = vmatprep.subr.mxu1 %v8624_v21 }
0x2547   :  { %9621 = vmatpush3.msra.mxu1 %v8624_v21 }
0x2548   :  { %9625 = vmatprep.subr.mxu1 %v8631_v18 }
0x2600   :  { %v9594_v60 = vpop.f32.mrf.mxu1 }
0x2601   :  { %v4160_v14 = vmax.f32 %v9594_v60, 0.0 }
0x2602   :  { %v4150_v59 = vpop.f32.mrf.mxu1 }
0x2603   :  { %v4159_v47 = vmax.f32 %v4150_v59, 0.0 }
0x2605   :  { %9611 = vmatprep.mubr.msk.f32.mxu0 %vm1360_vm4, %v4159_v47 }
0x2606   :  { %9612 = vmatmul.mubr.msk.f32.vlgmr.msra.gmra.mxu0 %vm1360_vm4, %v4160_v14 }
0x2607   :  { %9637 = vmatpush3.msra.mxu0 %v8635_v12 }
0x2608   :  { %9638 = vmatprep.subr.mxu0 %v8634_v16 }
0x2609   :  { %9639 = vmatpush3.msra.mxu0 %v8634_v16 }
0x260a   :  { %9640 = vmatprep.subr.mxu0 %v8633_v26 }
0x260b   :  { %9641 = vmatpush3.msra.mxu0 %v8633_v26 }
0x260c   :  { %9642 = vmatprep.subr.mxu0 %v8632_v54 }
0x260d   :  { %9643 = vmatpush3.msra.mxu0 %v8632_v54 }
0x26c6   :  { %v9613_v51 = vpop.f32.mrf.mxu0 }
0x26c7   :  { %v4239_v27 = vadd.f32 %v9613_v51, %v4077_v43 }
0x26c8   :  { %v4233_v52 = vpop.f32.mrf.mxu0 }
0x26c9   :  { %v4234_v55 = vadd.f32 %v4233_v52, %v4076_v42  ;;  %v4245_v56 = vsel %vm96_vm0, %v4239_v27, 0.0  ;;  %v11195_v42 = vld [vmem:[%s11812_s2] sm:$0xff] }
0x26ca   :  { %4246 = vadd.xlane.f32.xlu0 %v4245_v56 }
0x26cb   :  { %v4242_v57 = vsel %vm96_vm0, %v4234_v55, 0.0 }
0x26cc   :  { %4243 = vadd.xlane.f32.xlu1 %v4242_v57 }
0x2753   :  { %v4247_v50 = vpop.xlane.xlu0 %4246 }
0x2754   :  { %v4249_v63 = vmul.f32 0.03125, %v4247_v50 }
0x2755   :  { %v4244_v58 = vpop.xlane.xlu1 %4243 }
0x2756   :  { %v4251_v15 = vsub.f32 %v4239_v27, %v4249_v63  ;;  %v4248_v9 = vmul.f32 0.03125, %v4244_v58 }
0x2758   :  { %v4250_v5 = vsub.f32 %v4234_v55, %v4248_v9  ;;  %v4253_v61 = vmul.f32 %v4251_v15, %v4251_v15 }
0x275a   :  { %v4257_v4 = vsel %vm96_vm0, %v4253_v61, 0.0  ;;  %v4252_v6 = vmul.f32 %v4250_v5, %v4250_v5 }
0x275b   :  { %4258 = vadd.xlane.f32.xlu0 %v4257_v4 }
0x275c   :  { %v4254_v10 = vsel %vm96_vm0, %v4252_v6, 0.0 }
0x275d   :  { %4255 = vadd.xlane.f32.xlu1 %v4254_v10 }
0x27e4   :  { %v4259_v29 = vpop.xlane.xlu0 %4258 }
0x27e5   :  { %v4261_v53 = vmul.f32 0.03125, %v4259_v29 }
0x27e6   :  { %v4256_v48 = vpop.xlane.xlu1 %4255 }
0x27e7   :  { %v4263_v20 = vadd.f32 1e-05, %v4261_v53  ;;  %v4260_v23 = vmul.f32 0.03125, %v4256_v48 }
0x27e9   :  { %v4262_v24 = vadd.f32 1e-05, %v4260_v23  ;;  %10129 = vrsqrt.f32 %v4263_v20 }
0x27eb   :  { %10131 = vrsqrt.f32 %v4262_v24 }
0x27f6   :  { %v10130_v25 = vpop.eup %10129 }
0x27f7   :  { %v11121_v33 = vmul.f32 %v10130_v25, %v4251_v15 }
0x27f8   :  { %v10132_v30 = vpop.eup %10131 }
0x27f9   :  { %v11119_v32 = vmul.f32 %v10132_v30, %v4250_v5 }
0x27fb   :  { %9622 = vmatprep.mubr.msk.f32.mxu1 %vm96_vm0, %v11119_v32  ;;  %9644 = vmatprep.mubr.msk.f32.mxu0 %vm96_vm0, %v11119_v32 }
0x27fc   :  { %9623 = vmatmul.mubr.msk.f32.vlgmr.msra.gmra.mxu1 %vm96_vm0, %v11121_v33  ;;  %9645 = vmatmul.mubr.msk.f32.vlgmr.msra.gmra.mxu0 %vm96_vm0, %v11121_v33 }
0x27fd   :  { %9626 = vmatpush3.msra.mxu1 %v8631_v18  ;;  %9633 = vmatprep.mubr.msk.f32.mxu1 %vm96_vm0, %v11119_v32 }
0x27fe   :  { %9627 = vmatprep.subr.mxu1 %v8630_v34 }
0x27ff   :  { %9628 = vmatpush3.msra.mxu1 %v8630_v34 }
0x2800   :  { %9629 = vmatprep.subr.mxu1 %v8629_v19 }
0x2801   :  { %9630 = vmatpush3.msra.mxu1 %v8629_v19 }
0x2802   :  { %9631 = vmatprep.subr.mxu1 %v8628_v46 }
0x2803   :  { %9632 = vmatpush3.msra.mxu1 %v8628_v46 }
0x2804   :  { %9634 = vmatmul.mubr.msk.f32.vlgmr.msra.gmra.mxu1 %vm96_vm0, %v11121_v33 }
0x28bc   :  { %v11144_v45 = vpop.f32.mrf.mxu1  ;;  %v11146_v35 = vpop.f32.mrf.mxu0 }
0x28bd   :  { %9654 = vmatprep.subr.mxu0 %v11146_v35 }
0x28be   :  { %v11149_v37 = vpop.f32.mrf.mxu1  ;;  %v11151_v36 = vpop.f32.mrf.mxu0  ;;  %9655 = vmatpush3.msra.mxu0 %v11146_v35 }
0x28bf   :  { %9651 = vmatprep.mubr.msk.f32.mxu1 %vm328_vm1, %v11149_v37  ;;  %9656 = vmatprep.subr.mxu0 %v11151_v36 }
0x28c0   :  { %9657 = vmatpush3.msra.mxu0 %v11151_v36 }
0x28c4   :  { %v11158_v2 = vpop.f32.mrf.mxu1 }
0x28c5   :  { %4733 = vrot.lane.b32.xlu1 %v11158_v2, %s10307_s6  ;;  %9647 = vmatprep.subr.msk.mxu1 %vm328_vm1, %v11158_v2 }
0x28c6   :  { %v11164_v38 = vpop.f32.mrf.mxu1  ;;  %9648 = vmatpush3.xpose.msk.msra.mxu1 %vm328_vm1, %v11158_v2 }
0x28c7   :  { %4731 = vrot.lane.b32.xlu0 %v11164_v38, %s10307_s6  ;;  %9649 = vmatprep.subr.msk.mxu1 %vm328_vm1, %v11164_v38 }
0x28c9   :  { %4727 = vrot.lane.b32.xlu1 %v11149_v37, %s10307_s6 }
0x28ca   :  { %9650 = vmatpush3.xpose.msk.msra.mxu1 %vm328_vm1, %v11164_v38 }
0x28cd   :  { %4729 = vrot.lane.b32.xlu1 %v11144_v45, %s10307_s6  ;;  %9652 = vmatmul.mubr.msk.f32.vlgmr.msra.gmra.mxu1 %vm328_vm1, %v11144_v45 }
0x2937   :  { %v4734_v3 = vpop.permute.xlu1 %4733 }
0x2938   :  { %9661 = vmatprep.subr.msk.mxu1 %vm328_vm1, %v4734_v3 }
0x2939   :  { %v4732_v8 = vpop.permute.xlu0 %4731  ;;  %9662 = vmatpush3.xpose.msk.msra.mxu1 %vm328_vm1, %v4734_v3 }
0x293a   :  { %9663 = vmatprep.subr.msk.mxu1 %vm328_vm1, %v4732_v8 }
0x293b   :  { %v4728_v62 = vpop.permute.xlu1 %4727 }
0x293c   :  { %9665 = vmatprep.mubr.msk.f32.mxu1 %vm328_vm1, %v4728_v62 }
0x293d   :  { %9664 = vmatpush3.xpose.msk.msra.mxu1 %vm328_vm1, %v4732_v8 }
0x293f   :  { %v4730_v39 = vpop.permute.xlu1 %4729 }
0x2940   :  { %9666 = vmatmul.mubr.msk.f32.vlgmr.msra.gmra.mxu1 %vm328_vm1, %v4730_v39 }
0x298d   :  { %v9653_v7 = vpop.f32.mrf.mxu1 }
0x298e   :  { %v4621_v40 = vmul.f32 0.35355338, %v9653_v7 }
0x298f   :  { %v4611_v17 = vpop.f32.mrf.mxu1 }
0x2990   :  { %v4623_v22 = vadd.f32 %v11189_v41, %v4621_v40  ;;  %v4620_v31 = vmul.f32 0.35355338, %v4611_v17 }
0x2992   :  { %v4622_v28 = vadd.f32 %v11195_v42, %v4620_v31  ;;  %v4627_v43 = vsel %vm420_vm2, %v4623_v22, -inf }
0x2993   :  { %4628 = vmax.xlane.f32.xlu1 %v4627_v43 }
0x2994   :  { %v4624_v49 = vsel %vm420_vm2, %v4622_v28, -inf }
0x2995   :  { %4625 = vmax.xlane.f32.xlu0 %v4624_v49 }
0x29a4   :  { %4848 = vrot.lane.b32.xlu1 %v11146_v35, %s10307_s6 }
0x2a00   :  { %v9667_v44 = vpop.f32.mrf.mxu1 }
0x2a01   :  { %v4819_v60 = vmul.f32 0.35355338, %v9667_v44 }
0x2a02   :  { %v4809_v0 = vpop.f32.mrf.mxu1 }
0x2a03   :  { %v4818_v59 = vmul.f32 0.35355338, %v4809_v0  ;;  %v4821_v14 = vadd.f32 %v11189_v41, %v4819_v60 }
0x2a05   :  { %v4820_v47 = vadd.f32 %v11195_v42, %v4818_v59  ;;  %v4825_v27 = vsel %vm420_vm2, %v4821_v14, -inf }
0x2a07   :  { %v4822_v51 = vsel %vm420_vm2, %v4820_v47, -inf }
0x2a08   :  { %4823 = vmax.xlane.f32.xlu0 %v4822_v51 }
0x2a0c   :  { %4826 = vmax.xlane.f32.xlu0 %v4825_v27 }
0x2a1c   :  { %v4629_v52 = vpop.xlane.xlu1 %4628 }
0x2a1d   :  { %v4631_v55 = vsub.f32 %v4623_v22, %v4629_v52 }
0x2a1e   :  { %v4626_v56 = vpop.xlane.xlu0 %4625 }
0x2a1f   :  { %v4634_v57 = vmul.f32 1.442695, %v4631_v55  ;;  %v4630_v50 = vsub.f32 %v4622_v28, %v4626_v56 }
0x2a20   :  { %v4849_v63 = vpop.permute.xlu1 %4848 }
0x2a21   :  { %10133 = vpow2.f32 %v4634_v57  ;;  %v4632_v58 = vmul.f32 1.442695, %v4630_v50  ;;  %9668 = vmatprep.subr.mxu0 %v4849_v63 }
0x2a23   :  { %10135 = vpow2.f32 %v4632_v58 }
0x2a2e   :  { %v10134_v15 = vpop.eup %10133 }
0x2a2f   :  { %v4639_v9 = vsel %vm420_vm2, %v10134_v15, 0.0 }
0x2a30   :  { %v10136_v5 = vpop.eup %10135  ;;  %4640 = vadd.xlane.f32.xlu0 %v4639_v9 }
0x2a31   :  { %v4636_v61 = vsel %vm420_vm2, %v10136_v5, 0.0 }
0x2a32   :  { %4637 = vadd.xlane.f32.xlu1 %v4636_v61 }
0x2a43   :  { %4939 = vrot.lane.b32.xlu1 %v11158_v2, %s10308_s11 }
0x2a47   :  { %4937 = vrot.lane.b32.xlu1 %v11164_v38, %s10308_s11 }
0x2a91   :  { %v4824_v4 = vpop.xlane.xlu0 %4823 }
0x2a92   :  { %v4828_v6 = vsub.f32 %v4820_v47, %v4824_v4 }
0x2a94   :  { %v4830_v10 = vmul.f32 1.442695, %v4828_v6 }
0x2a95   :  { %v4827_v11 = vpop.xlane.xlu0 %4826 }
0x2a96   :  { %10137 = vpow2.f32 %v4830_v10  ;;  %v4829_v12 = vsub.f32 %v4821_v14, %v4827_v11 }
0x2a98   :  { %v4832_v13 = vmul.f32 1.442695, %v4829_v12 }
0x2a9a   :  { %10139 = vpow2.f32 %v4832_v13 }
0x2aa3   :  { %v10138_v16 = vpop.eup %10137 }
0x2aa4   :  { %v4834_v1 = vsel %vm420_vm2, %v10138_v16, 0.0 }
0x2aa5   :  { %4835 = vadd.xlane.f32.xlu1 %v4834_v1 }
0x2aa7   :  { %v10140_v26 = vpop.eup %10139 }
0x2aa8   :  { %v4837_v21 = vsel %vm420_vm2, %v10140_v26, 0.0 }
0x2aa9   :  { %4838 = vadd.xlane.f32.xlu0 %v4837_v21 }
0x2ab6   :  { %4935 = vrot.lane.b32.xlu1 %v11144_v45, %s10308_s11 }
0x2ab9   :  { %v4641_v54 = vpop.xlane.xlu0 %4640 }
0x2aba   :  { %10141 = vrcp.f32 %v4641_v54 }
0x2abb   :  { %v4638_v18 = vpop.xlane.xlu1 %4637 }
0x2abc   :  { %10143 = vrcp.f32 %v4638_v18 }
0x2abf   :  { %4846 = vrot.lane.b32.xlu0 %v11151_v36, %s10307_s6  ;;  %v4940_v23 = vpop.permute.xlu1 %4939 }
0x2ac3   :  { %4933 = vrot.lane.b32.xlu0 %v11149_v37, %s10308_s11  ;;  %v4938_v24 = vpop.permute.xlu1 %4937 }
0x2ac7   :  { %v10142_v29 = vpop.eup %10141 }
0x2ac8   :  { %v4645_v20 = vmul.f32 %v10142_v29, %v10134_v15 }
0x2ac9   :  { %v10144_v53 = vpop.eup %10143 }
0x2aca   :  { %v4643_v48 = vmul.f32 %v10144_v53, %v10136_v5 }
0x2acc   :  { %9658 = vmatprep.mubr.msk.f32.mxu0 %vm420_vm2, %v4643_v48 }
0x2acd   :  { %9659 = vmatmul.mubr.msk.f32.vlgmr.msra.gmra.mxu0 %vm420_vm2, %v4645_v20 }
0x2ace   :  { %9669 = vmatpush3.msra.mxu0 %v4849_v63 }
0x2b2e   :  { %v4836_v25 = vpop.xlane.xlu1 %4835 }
0x2b2f   :  { %10145 = vrcp.f32 %v4836_v25 }
0x2b32   :  { %v4839_v30 = vpop.xlane.xlu0 %4838  ;;  %v4936_v39 = vpop.permute.xlu1 %4935 }
0x2b33   :  { %10147 = vrcp.f32 %v4839_v30 }
0x2b36   :  { %v4847_v34 = vpop.permute.xlu0 %4846 }
0x2b37   :  { %9670 = vmatprep.subr.mxu0 %v4847_v34 }
0x2b38   :  { %9671 = vmatpush3.msra.mxu0 %v4847_v34 }
0x2b39   :  { %9675 = vmatprep.subr.msk.mxu0 %vm328_vm1, %v4940_v23 }
0x2b3a   :  { %v4934_v62 = vpop.permute.xlu0 %4933 }
0x2b3c   :  { %v10146_v19 = vpop.eup %10145 }
0x2b3d   :  { %v4841_v46 = vmul.f32 %v10146_v19, %v10138_v16 }
0x2b3f   :  { %9672 = vmatprep.mubr.msk.f32.mxu0 %vm420_vm2, %v4841_v46 }
0x2b40   :  { %v10148_v3 = vpop.eup %10147 }
0x2b41   :  { %v4843_v8 = vmul.f32 %v10148_v3, %v10140_v26 }
0x2b43   :  { %9673 = vmatmul.mubr.msk.f32.vlgmr.msra.gmra.mxu0 %vm420_vm2, %v4843_v8 }
0x2b44   :  { %9676 = vmatpush3.xpose.msk.msra.mxu0 %vm328_vm1, %v4940_v23  ;;  %9679 = vmatprep.mubr.msk.f32.mxu0 %vm328_vm1, %v4934_v62 }
0x2b45   :  { %9677 = vmatprep.subr.msk.mxu0 %vm328_vm1, %v4938_v24 }
0x2b48   :  { %9678 = vmatpush3.xpose.msk.msra.mxu0 %vm328_vm1, %v4938_v24 }
0x2b4b   :  { %9680 = vmatmul.mubr.msk.f32.vlgmr.msra.gmra.mxu0 %vm328_vm1, %v4936_v39 }
0x2b8d   :  { %v11230_v7 = vpop.f32.mrf.mxu0 }
0x2b8f   :  { %v11232_v40 = vpop.f32.mrf.mxu0 }
0x2c03   :  { %v11234_v17 = vpop.f32.mrf.mxu0 }
0x2c05   :  { %v11236_v22 = vpop.f32.mrf.mxu0 }
0x2c0b   :  { %v9681_v31 = vpop.f32.mrf.mxu0 }
0x2c0c   :  { %v5025_v28 = vmul.f32 0.35355338, %v9681_v31 }
0x2c0d   :  { %v5015_v43 = vpop.f32.mrf.mxu0 }
0x2c0e   :  { %v5027_v49 = vadd.f32 %v11189_v41, %v5025_v28  ;;  %v5024_v44 = vmul.f32 0.35355338, %v5015_v43  ;;  %v4287_v28 = vld [vmem:[#allocation2 + $0x78] sm:$0xff]  ;;  %v4286_v43 = vld [vmem:[#allocation2 + $0x70] sm:$0xff] }
0x2c10   :  { %v5026_v0 = vadd.f32 %v11195_v42, %v5024_v44  ;;  %v5031_v60 = vsel %vm420_vm2, %v5027_v49, -inf }
0x2c11   :  { %5032 = vmax.xlane.f32.xlu1 %v5031_v60 }
0x2c12   :  { %v5028_v59 = vsel %vm420_vm2, %v5026_v0, -inf }
0x2c13   :  { %5029 = vmax.xlane.f32.xlu0 %v5028_v59 }
0x2c22   :  { %5052 = vrot.lane.b32.xlu1 %v11146_v35, %s10308_s11 }
0x2c26   :  { %5143 = vrot.lane.b32.xlu1 %v11158_v2, %s10309_s12 }
0x2c2a   :  { %5141 = vrot.lane.b32.xlu1 %v11164_v38, %s10309_s12 }
0x2c2e   :  { %5139 = vrot.lane.b32.xlu1 %v11144_v45, %s10309_s12 }
0x2c9a   :  { %v5033_v47 = vpop.xlane.xlu1 %5032 }
0x2c9b   :  { %v5035_v14 = vsub.f32 %v5027_v49, %v5033_v47  ;;  %v4284_v49 = vld [vmem:[#allocation2 + $0x60] sm:$0xff] }
0x2c9c   :  { %v5030_v51 = vpop.xlane.xlu0 %5029 }
0x2c9d   :  { %v5038_v27 = vmul.f32 1.442695, %v5035_v14  ;;  %v5034_v52 = vsub.f32 %v5026_v0, %v5030_v51 }
0x2c9e   :  { %v5053_v55 = vpop.permute.xlu1 %5052 }
0x2c9f   :  { %10149 = vpow2.f32 %v5038_v27  ;;  %v5036_v56 = vmul.f32 1.442695, %v5034_v52  ;;  %9682 = vmatprep.subr.mxu1 %v5053_v55 }
0x2ca0   :  { %9683 = vmatpush3.msra.mxu1 %v5053_v55 }
0x2ca1   :  { %10151 = vpow2.f32 %v5036_v56 }
0x2ca2   :  { %v5144_v15 = vpop.permute.xlu1 %5143 }
0x2cac   :  { %v10150_v57 = vpop.eup %10149 }
0x2cad   :  { %v5043_v2 = vsel %vm420_vm2, %v10150_v57, 0.0 }
0x2cae   :  { %v10152_v50 = vpop.eup %10151  ;;  %5044 = vadd.xlane.f32.xlu0 %v5043_v2 }
0x2caf   :  { %v5040_v38 = vsel %vm420_vm2, %v10152_v50, 0.0 }
0x2cb2   :  { %5041 = vadd.xlane.f32.xlu0 %v5040_v38 }
0x2cc8   :  { %5050 = vrot.lane.b32.xlu0 %v11151_v36, %s10308_s11 }
0x2ccc   :  { %5137 = vrot.lane.b32.xlu0 %v11149_v37, %s10309_s12  ;;  %v5142_v37 = vpop.permute.xlu1 %5141 }
0x2cd0   :  { %v5140_v10 = vpop.permute.xlu1 %5139 }
0x2d37   :  { %v5045_v45 = vpop.xlane.xlu0 %5044 }
0x2d38   :  { %10153 = vrcp.f32 %v5045_v45 }
0x2d3b   :  { %v5042_v63 = vpop.xlane.xlu0 %5041 }
0x2d3c   :  { %10155 = vrcp.f32 %v5042_v63 }
0x2d3f   :  { %v5051_v58 = vpop.permute.xlu0 %5050 }
0x2d40   :  { %9684 = vmatprep.subr.mxu1 %v5051_v58 }
0x2d41   :  { %9685 = vmatpush3.msra.mxu1 %v5051_v58 }
0x2d42   :  { %9689 = vmatprep.subr.msk.mxu1 %vm328_vm1, %v5144_v15 }
0x2d43   :  { %v5138_v6 = vpop.permute.xlu0 %5137 }
0x2d45   :  { %v10154_v9 = vpop.eup %10153 }
0x2d46   :  { %v5049_v4 = vmul.f32 %v10154_v9, %v10150_v57 }
0x2d49   :  { %v10156_v5 = vpop.eup %10155 }
0x2d4a   :  { %v5047_v61 = vmul.f32 %v10156_v5, %v10152_v50 }
0x2d4c   :  { %9686 = vmatprep.mubr.msk.f32.mxu1 %vm420_vm2, %v5047_v61 }
0x2d4d   :  { %9687 = vmatmul.mubr.msk.f32.vlgmr.msra.gmra.mxu1 %vm420_vm2, %v5049_v4 }
0x2d4e   :  { %9690 = vmatpush3.xpose.msk.msra.mxu1 %vm328_vm1, %v5144_v15  ;;  %9693 = vmatprep.mubr.msk.f32.mxu1 %vm328_vm1, %v5138_v6 }
0x2d4f   :  { %9691 = vmatprep.subr.msk.mxu1 %vm328_vm1, %v5142_v37 }
0x2d52   :  { %9692 = vmatpush3.xpose.msk.msra.mxu1 %vm328_vm1, %v5142_v37 }
0x2d55   :  { %9694 = vmatmul.mubr.msk.f32.vlgmr.msra.gmra.mxu1 %vm328_vm1, %v5140_v10 }
0x2e0d   :  { %v9688_v11 = vpop.f32.mrf.mxu1 }
0x2e0f   :  { %v5128_v12 = vpop.f32.mrf.mxu1 }
0x2e15   :  { %v9695_v13 = vpop.f32.mrf.mxu1 }
0x2e16   :  { %v5229_v16 = vmul.f32 0.35355338, %v9695_v13  ;;  %v4290_v13 = vld [vmem:[#allocation4 + $0x68] sm:$0xff] }
0x2e17   :  { %v5219_v1 = vpop.f32.mrf.mxu1 }
0x2e18   :  { %v5231_v26 = vadd.f32 %v11189_v41, %v5229_v16  ;;  %v5228_v21 = vmul.f32 0.35355338, %v5219_v1  ;;  %v4289_v16 = vld [vmem:[#allocation4 + $0x60] sm:$0xff]  ;;  %v8643_v1 = vld [vmem:[%s11818_s8 + $0xf8] sm:$0xff] }
0x2e1a   :  { %v5230_v54 = vadd.f32 %v11195_v42, %v5228_v21  ;;  %v5235_v18 = vsel %vm420_vm2, %v5231_v26, -inf  ;;  %v8641_v21 = vld [vmem:[%s11818_s8 + $0xe8] sm:$0xff] }
0x2e1b   :  { %5236 = vmax.xlane.f32.xlu1 %v5235_v18  ;;  %v8639_v18 = vld [vmem:[%s11818_s8 + $0xd8] sm:$0xff] }
0x2e1c   :  { %v5232_v29 = vsel %vm420_vm2, %v5230_v54, -inf }
0x2e1d   :  { %5233 = vmax.xlane.f32.xlu0 %v5232_v29 }
0x2e2c   :  { %5256 = vrot.lane.b32.xlu1 %v11146_v35, %s10309_s12 }
0x2e30   :  { %5343 = vrot.lane.b32.xlu1 %v11236_v22, %s10305_s13 }
0x2e34   :  { %5345 = vrot.lane.b32.xlu1 %v11234_v17, %s10305_s13 }
0x2e38   :  { %5353 = vrot.lane.b32.xlu1 %v9688_v11, %s10310_s14 }
0x2ea4   :  { %v5237_v53 = vpop.xlane.xlu1 %5236 }
0x2ea5   :  { %v5239_v48 = vsub.f32 %v5231_v26, %v5237_v53  ;;  %v8642_v26 = vld [vmem:[%s11818_s8 + $0xf0] sm:$0xff] }
0x2ea6   :  { %v5234_v20 = vpop.xlane.xlu0 %5233 }
0x2ea7   :  { %v5242_v23 = vmul.f32 1.442695, %v5239_v48  ;;  %v5238_v24 = vsub.f32 %v5230_v54, %v5234_v20  ;;  %v8640_v54 = vld [vmem:[%s11818_s8 + $0xe0] sm:$0xff] }
0x2ea8   :  { %v5257_v25 = vpop.permute.xlu1 %5256 }
0x2ea9   :  { %10157 = vpow2.f32 %v5242_v23  ;;  %v5240_v30 = vmul.f32 1.442695, %v5238_v24  ;;  %9696 = vmatprep.subr.mxu0 %v5257_v25 }
0x2eaa   :  { %9697 = vmatpush3.msra.mxu0 %v5257_v25 }
0x2eab   :  { %10159 = vpow2.f32 %v5240_v30 }
0x2eac   :  { %v5344_v60 = vpop.permute.xlu1 %5343 }
0x2ead   :  { %v5365_v51 = vsel %vm328_vm1, %v11232_v40, %v5344_v60 }
0x2eb0   :  { %v5346_v59 = vpop.permute.xlu1 %5345 }
0x2eb1   :  { %v5366_v52 = vsel %vm328_vm1, %v11230_v7, %v5346_v59 }
0x2eb4   :  { %v5354_v47 = vpop.permute.xlu1 %5353 }
0x2eb5   :  { %v5368_v57 = vsel %vm420_vm2, %v5366_v52, %v5354_v47 }
0x2eb6   :  { %v10158_v35 = vpop.eup %10157 }
0x2eb7   :  { %v5247_v34 = vsel %vm420_vm2, %v10158_v35, 0.0 }
0x2eb8   :  { %v10160_v19 = vpop.eup %10159  ;;  %5248 = vadd.xlane.f32.xlu0 %v5247_v34 }
0x2eb9   :  { %v5244_v46 = vsel %vm420_vm2, %v10160_v19, 0.0 }
0x2ebc   :  { %5245 = vadd.xlane.f32.xlu0 %v5244_v46  ;;  %v8637_v46 = vld [vmem:[%s11818_s8 + $0xc8] sm:$0xff] }
0x2ed2   :  { %5254 = vrot.lane.b32.xlu0 %v11151_v36, %s10309_s12  ;;  %v4285_v36 = vld [vmem:[#allocation2 + $0x68] sm:$0xff] }
0x2ed6   :  { %5351 = vrot.lane.b32.xlu0 %v5128_v12, %s10310_s14  ;;  %v4291_v12 = vld [vmem:[#allocation4 + $0x70] sm:$0xff] }
0x2f41   :  { %v5249_v3 = vpop.xlane.xlu0 %5248 }
0x2f42   :  { %10161 = vrcp.f32 %v5249_v3  ;;  %v8636_v3 = vld [vmem:[%s11818_s8 + $0xc0] sm:$0xff] }
0x2f45   :  { %v5246_v8 = vpop.xlane.xlu0 %5245 }
0x2f46   :  { %10163 = vrcp.f32 %v5246_v8 }
0x2f49   :  { %v5255_v62 = vpop.permute.xlu0 %5254 }
0x2f4a   :  { %9698 = vmatprep.subr.mxu0 %v5255_v62 }
0x2f4b   :  { %9699 = vmatpush3.msra.mxu0 %v5255_v62 }
0x2f4c   :  { %9703 = vmatprep.subr.mxu0 %v4287_v28 }
0x2f4d   :  { %v5352_v14 = vpop.permute.xlu0 %5351 }
0x2f4e   :  { %v5367_v55 = vsel %vm420_vm2, %v5365_v51, %v5352_v14 }
0x2f4f   :  { %v10162_v39 = vpop.eup %10161 }
0x2f50   :  { %v5253_v31 = vmul.f32 %v10162_v39, %v10158_v35 }
0x2f53   :  { %v10164_v17 = vpop.eup %10163 }
0x2f54   :  { %v5251_v22 = vmul.f32 %v10164_v17, %v10160_v19  ;;  %v8638_v19 = vld [vmem:[%s11818_s8 + $0xd0] sm:$0xff] }
0x2f56   :  { %9700 = vmatprep.mubr.msk.f32.mxu0 %vm420_vm2, %v5251_v22 }
0x2f57   :  { %9701 = vmatmul.mubr.msk.f32.vlgmr.msra.gmra.mxu0 %vm420_vm2, %v5253_v31 }
0x2f58   :  { %9704 = vmatpush3.msra.mxu0 %v4287_v28 }
0x2f59   :  { %9705 = vmatprep.subr.mxu0 %v4286_v43 }
0x2f5a   :  { %9706 = vmatpush3.msra.mxu0 %v4286_v43 }
0x2f5b   :  { %9707 = vmatprep.subr.mxu0 %v4285_v36 }
0x2f5c   :  { %9708 = vmatpush3.msra.mxu0 %v4285_v36 }
0x2f5d   :  { %9709 = vmatprep.subr.mxu0 %v4284_v49 }
0x2f5e   :  { %9710 = vmatpush3.msra.mxu0 %v4284_v49 }
0x2f5f   :  { %9725 = vmatprep.subr.mxu0 %v8643_v1 }
0x3017   :  { %v9702_v44 = vpop.f32.mrf.mxu0 }
0x3018   :  { %5361 = vrot.lane.b32.xlu1 %v9702_v44, %s10311_s0 }
0x3019   :  { %v5332_v0 = vpop.f32.mrf.mxu0 }
0x301a   :  { %5359 = vrot.lane.b32.xlu0 %v5332_v0, %s10311_s0 }
0x308a   :  { %v5362_v27 = vpop.permute.xlu1 %5361 }
0x308b   :  { %v5370_v50 = vsel %vm1166_vm3, %v5368_v57, %v5362_v27  ;;  %v8691_v57 = vld [vmem:[%s11815_s5 + $0x98] sm:$0xff] }
0x308c   :  { %v5360_v56 = vpop.permute.xlu0 %5359 }
0x308d   :  { %v5369_v2 = vsel %vm1166_vm3, %v5367_v55, %v5360_v56  ;;  %v8683_v56 = vld [vmem:[%s11813_s3 + $0x98] sm:$0xff] }
0x308e   :  { %9711 = vmatprep.mubr.msk.f32.mxu0 %vm96_vm0, %v5369_v2  ;;  %v8682_v2 = vld [vmem:[%s11813_s3 + $0x90] sm:$0xff] }
0x308f   :  { %9712 = vmatmul.mubr.msk.f32.vlgmr.msra.gmra.mxu0 %vm96_vm0, %v5370_v50  ;;  %v8690_v50 = vld [vmem:[%s11815_s5 + $0x90] sm:$0xff] }
0x3090   :  { %9726 = vmatpush3.msra.mxu0 %v8643_v1 }
0x3091   :  { %9727 = vmatprep.subr.mxu0 %v8642_v26 }
0x3092   :  { %9728 = vmatpush3.msra.mxu0 %v8642_v26 }
0x3093   :  { %9729 = vmatprep.subr.mxu0 %v8641_v21 }
0x3094   :  { %9730 = vmatpush3.msra.mxu0 %v8641_v21 }
0x3095   :  { %9731 = vmatprep.subr.mxu0 %v8640_v54 }
0x3096   :  { %9732 = vmatpush3.msra.mxu0 %v8640_v54 }
0x3097   :  { %9733 = vmatprep.subr.mxu0 %v8639_v18 }
0x3098   :  { %9734 = vmatpush3.msra.mxu0 %v8639_v18 }
0x3099   :  { %9735 = vmatprep.subr.mxu0 %v8638_v19 }
0x309a   :  { %9736 = vmatpush3.msra.mxu0 %v8638_v19 }
0x309b   :  { %9737 = vmatprep.subr.mxu0 %v8637_v46 }
0x309c   :  { %9738 = vmatpush3.msra.mxu0 %v8637_v46 }
0x309d   :  { %9739 = vmatprep.subr.mxu0 %v8636_v3 }
0x309e   :  { %9740 = vmatpush3.msra.mxu0 %v8636_v3 }
0x309f   :  { %9766 = vmatprep.subr.mxu0 %v8691_v57 }
0x314f   :  { %v9713_v38 = vpop.f32.mrf.mxu0 }
0x3150   :  { %v5449_v40 = vadd.f32 %v9713_v38, %v11121_v33  ;;  %v8681_v38 = vld [vmem:[%s11813_s3 + $0x88] sm:$0xff] }
0x3151   :  { %v5443_v45 = vpop.f32.mrf.mxu0 }
0x3152   :  { %v5444_v63 = vadd.f32 %v5443_v45, %v11119_v32  ;;  %v5455_v7 = vsel %vm96_vm0, %v5449_v40, 0.0  ;;  %v4292_v32 = vld [vmem:[#allocation4 + $0x78] sm:$0xff]  ;;  %v8680_v45 = vld [vmem:[%s11813_s3 + $0x80] sm:$0xff] }
0x3153   :  { %5456 = vadd.xlane.f32.xlu1 %v5455_v7  ;;  %9714 = vmatprep.subr.mxu1 %v4292_v32  ;;  %v8687_v7 = vld [vmem:[%s11814_s4 + $0x98] sm:$0xff] }
0x3154   :  { %v5452_v58 = vsel %vm96_vm0, %v5444_v63, 0.0  ;;  %9715 = vmatpush3.msra.mxu1 %v4292_v32  ;;  %v8685_v32 = vld [vmem:[%s11814_s4 + $0x88] sm:$0xff] }
0x3155   :  { %5453 = vadd.xlane.f32.xlu0 %v5452_v58  ;;  %9716 = vmatprep.subr.mxu1 %v4291_v12 }
0x3156   :  { %9717 = vmatpush3.msra.mxu1 %v4291_v12  ;;  %v8684_v12 = vld [vmem:[%s11814_s4 + $0x80] sm:$0xff] }
0x3157   :  { %9718 = vmatprep.subr.mxu1 %v4290_v13 }
0x3158   :  { %9719 = vmatpush3.msra.mxu1 %v4290_v13 }
0x3159   :  { %9720 = vmatprep.subr.mxu1 %v4289_v16 }
0x315a   :  { %9721 = vmatpush3.msra.mxu1 %v4289_v16 }
0x315b   :  { %9744 = vmatprep.subr.mxu1 %v8683_v56 }
0x31dc   :  { %v5457_v15 = vpop.xlane.xlu1 %5456 }
0x31dd   :  { %v5459_v9 = vmul.f32 0.03125, %v5457_v15 }
0x31de   :  { %v5454_v5 = vpop.xlane.xlu0 %5453 }
0x31df   :  { %v5458_v61 = vmul.f32 0.03125, %v5454_v5  ;;  %v5461_v4 = vsub.f32 %v5449_v40, %v5459_v9  ;;  %v8689_v40 = vld [vmem:[%s11815_s5 + $0x88] sm:$0xff] }
0x31e1   :  { %v5460_v6 = vsub.f32 %v5444_v63, %v5458_v61  ;;  %v5463_v11 = vmul.f32 %v5461_v4, %v5461_v4  ;;  %v8688_v63 = vld [vmem:[%s11815_s5 + $0x80] sm:$0xff] }
0x31e3   :  { %v5462_v37 = vmul.f32 %v5460_v6, %v5460_v6  ;;  %v5467_v33 = vsel %vm96_vm0, %v5463_v11, 0.0 }
0x31e5   :  { %v5464_v10 = vsel %vm96_vm0, %v5462_v37, 0.0 }
0x31e6   :  { %5465 = vadd.xlane.f32.xlu0 %v5464_v10 }
0x31ea   :  { %5468 = vadd.xlane.f32.xlu0 %v5467_v33  ;;  %v8686_v33 = vld [vmem:[%s11814_s4 + $0x90] sm:$0xff] }
0x326f   :  { %v5466_v29 = vpop.xlane.xlu0 %5465 }
0x3270   :  { %v5470_v53 = vmul.f32 0.03125, %v5466_v29 }
0x3272   :  { %v5472_v48 = vadd.f32 1e-05, %v5470_v53 }
0x3273   :  { %v5469_v20 = vpop.xlane.xlu0 %5468 }
0x3274   :  { %10165 = vrsqrt.f32 %v5472_v48  ;;  %v5471_v23 = vmul.f32 0.03125, %v5469_v20 }
0x3276   :  { %v5473_v24 = vadd.f32 1e-05, %v5471_v23 }
0x3278   :  { %10167 = vrsqrt.f32 %v5473_v24 }
0x3281   :  { %v10166_v25 = vpop.eup %10165 }
0x3282   :  { %v5476_v30 = vmul.f32 %v10166_v25, %v5460_v6 }
0x3284   :  { %9722 = vmatprep.mubr.msk.f32.mxu1 %vm96_vm0, %v5476_v30 }
0x3285   :  { %v10168_v35 = vpop.eup %10167 }
0x3286   :  { %v5477_v34 = vmul.f32 %v10168_v35, %v5461_v4 }
0x3288   :  { %9723 = vmatmul.mubr.msk.f32.vlgmr.msra.gmra.mxu1 %vm96_vm0, %v5477_v34 }
0x3289   :  { %9745 = vmatpush3.msra.mxu1 %v8683_v56 }
0x328a   :  { %9746 = vmatprep.subr.mxu1 %v8682_v2 }
0x328b   :  { %9747 = vmatpush3.msra.mxu1 %v8682_v2 }
0x328c   :  { %9748 = vmatprep.subr.mxu1 %v8681_v38 }
0x328d   :  { %9749 = vmatpush3.msra.mxu1 %v8681_v38 }
0x328e   :  { %9750 = vmatprep.subr.mxu1 %v8680_v45 }
0x328f   :  { %9751 = vmatpush3.msra.mxu1 %v8680_v45 }
0x3290   :  { %9755 = vmatprep.subr.mxu1 %v8687_v7 }
0x3348   :  { %v9724_v8 = vpop.f32.mrf.mxu1 }
0x3349   :  { %v5560_v17 = vmax.f32 %v9724_v8, 0.0 }
0x334a   :  { %v5550_v62 = vpop.f32.mrf.mxu1 }
0x334b   :  { %v5559_v39 = vmax.f32 %v5550_v62, 0.0 }
0x334d   :  { %9741 = vmatprep.mubr.msk.f32.mxu0 %vm1360_vm4, %v5559_v39 }
0x334e   :  { %9742 = vmatmul.mubr.msk.f32.vlgmr.msra.gmra.mxu0 %vm1360_vm4, %v5560_v17 }
0x334f   :  { %9767 = vmatpush3.msra.mxu0 %v8691_v57 }
0x3350   :  { %9768 = vmatprep.subr.mxu0 %v8690_v50 }
0x3351   :  { %9769 = vmatpush3.msra.mxu0 %v8690_v50 }
0x3352   :  { %9770 = vmatprep.subr.mxu0 %v8689_v40 }
0x3353   :  { %9771 = vmatpush3.msra.mxu0 %v8689_v40 }
0x3354   :  { %9772 = vmatprep.subr.mxu0 %v8688_v63 }
0x3355   :  { %9773 = vmatpush3.msra.mxu0 %v8688_v63 }
0x340e   :  { %v9743_v22 = vpop.f32.mrf.mxu0 }
0x340f   :  { %v5639_v31 = vadd.f32 %v9743_v22, %v5477_v34 }
0x3410   :  { %v5633_v28 = vpop.f32.mrf.mxu0 }
0x3411   :  { %v5634_v43 = vadd.f32 %v5633_v28, %v5476_v30  ;;  %v5645_v36 = vsel %vm96_vm0, %v5639_v31, 0.0 }
0x3412   :  { %5646 = vadd.xlane.f32.xlu0 %v5645_v36 }
0x3413   :  { %v5642_v49 = vsel %vm96_vm0, %v5634_v43, 0.0 }
0x3414   :  { %5643 = vadd.xlane.f32.xlu1 %v5642_v49 }
0x349b   :  { %v5647_v44 = vpop.xlane.xlu0 %5646 }
0x349c   :  { %v5649_v0 = vmul.f32 0.03125, %v5647_v44 }
0x349d   :  { %v5644_v60 = vpop.xlane.xlu1 %5643 }
0x349e   :  { %v5651_v59 = vsub.f32 %v5639_v31, %v5649_v0  ;;  %v5648_v47 = vmul.f32 0.03125, %v5644_v60 }
0x34a0   :  { %v5650_v14 = vsub.f32 %v5634_v43, %v5648_v47  ;;  %v5653_v51 = vmul.f32 %v5651_v59, %v5651_v59 }
0x34a2   :  { %v5657_v27 = vsel %vm96_vm0, %v5653_v51, 0.0  ;;  %v5652_v52 = vmul.f32 %v5650_v14, %v5650_v14 }
0x34a3   :  { %5658 = vadd.xlane.f32.xlu0 %v5657_v27 }
0x34a4   :  { %v5654_v55 = vsel %vm96_vm0, %v5652_v52, 0.0 }
0x34a5   :  { %5655 = vadd.xlane.f32.xlu1 %v5654_v55 }
0x352c   :  { %v5659_v58 = vpop.xlane.xlu0 %5658 }
0x352d   :  { %v5661_v15 = vmul.f32 0.03125, %v5659_v58 }
0x352e   :  { %v5656_v9 = vpop.xlane.xlu1 %5655 }
0x352f   :  { %v5663_v5 = vadd.f32 1e-05, %v5661_v15  ;;  %v5660_v61 = vmul.f32 0.03125, %v5656_v9 }
0x3531   :  { %v5662_v4 = vadd.f32 1e-05, %v5660_v61  ;;  %10169 = vrsqrt.f32 %v5663_v5 }
0x3533   :  { %10171 = vrsqrt.f32 %v5662_v4 }
0x353e   :  { %v10170_v6 = vpop.eup %10169 }
0x353f   :  { %v11361_v11 = vmul.f32 %v10170_v6, %v5651_v59 }
0x3540   :  { %v10172_v37 = vpop.eup %10171 }
0x3541   :  { %v11359_v10 = vmul.f32 %v10172_v37, %v5650_v14 }
0x3543   :  { %9752 = vmatprep.mubr.msk.f32.mxu1 %vm96_vm0, %v11359_v10  ;;  %9774 = vmatprep.mubr.msk.f32.mxu0 %vm96_vm0, %v11359_v10 }
0x3544   :  { %9753 = vmatmul.mubr.msk.f32.vlgmr.msra.gmra.mxu1 %vm96_vm0, %v11361_v11  ;;  %9775 = vmatmul.mubr.msk.f32.vlgmr.msra.gmra.mxu0 %vm96_vm0, %v11361_v11 }
0x3545   :  { %9756 = vmatpush3.msra.mxu1 %v8687_v7  ;;  %9763 = vmatprep.mubr.msk.f32.mxu1 %vm96_vm0, %v11359_v10 }
0x3546   :  { %9757 = vmatprep.subr.mxu1 %v8686_v33 }
0x3547   :  { %9758 = vmatpush3.msra.mxu1 %v8686_v33 }
0x3548   :  { %9759 = vmatprep.subr.mxu1 %v8685_v32 }
0x3549   :  { %9760 = vmatpush3.msra.mxu1 %v8685_v32 }
0x354a   :  { %9761 = vmatprep.subr.mxu1 %v8684_v12 }
0x354b   :  { %9762 = vmatpush3.msra.mxu1 %v8684_v12 }
0x354c   :  { %9764 = vmatmul.mubr.msk.f32.vlgmr.msra.gmra.mxu1 %vm96_vm0, %v11361_v11 }
0x3604   :  { %v11384_v13 = vpop.f32.mrf.mxu1  ;;  %v11386_v16 = vpop.f32.mrf.mxu0 }
0x3605   :  { %9784 = vmatprep.subr.mxu0 %v11386_v16 }
0x3606   :  { %v11389_v1 = vpop.f32.mrf.mxu1  ;;  %v11391_v26 = vpop.f32.mrf.mxu0  ;;  %9785 = vmatpush3.msra.mxu0 %v11386_v16 }
0x3607   :  { %9781 = vmatprep.mubr.msk.f32.mxu1 %vm328_vm1, %v11389_v1  ;;  %9786 = vmatprep.subr.mxu0 %v11391_v26 }
0x3608   :  { %9787 = vmatpush3.msra.mxu0 %v11391_v26 }
0x360c   :  { %v11398_v21 = vpop.f32.mrf.mxu1 }
0x360d   :  { %6133 = vrot.lane.b32.xlu1 %v11398_v21, %s10307_s6  ;;  %9777 = vmatprep.subr.msk.mxu1 %vm328_vm1, %v11398_v21 }
0x360e   :  { %v11404_v54 = vpop.f32.mrf.mxu1  ;;  %9778 = vmatpush3.xpose.msk.msra.mxu1 %vm328_vm1, %v11398_v21 }
0x360f   :  { %6131 = vrot.lane.b32.xlu0 %v11404_v54, %s10307_s6  ;;  %9779 = vmatprep.subr.msk.mxu1 %vm328_vm1, %v11404_v54 }
0x3611   :  { %6127 = vrot.lane.b32.xlu1 %v11389_v1, %s10307_s6 }
0x3612   :  { %9780 = vmatpush3.xpose.msk.msra.mxu1 %vm328_vm1, %v11404_v54 }
0x3615   :  { %6129 = vrot.lane.b32.xlu1 %v11384_v13, %s10307_s6  ;;  %9782 = vmatmul.mubr.msk.f32.vlgmr.msra.gmra.mxu1 %vm328_vm1, %v11384_v13 }
0x367f   :  { %v6134_v18 = vpop.permute.xlu1 %6133 }
0x3680   :  { %9791 = vmatprep.subr.msk.mxu1 %vm328_vm1, %v6134_v18 }
0x3681   :  { %v6132_v29 = vpop.permute.xlu0 %6131  ;;  %9792 = vmatpush3.xpose.msk.msra.mxu1 %vm328_vm1, %v6134_v18 }
0x3682   :  { %9793 = vmatprep.subr.msk.mxu1 %vm328_vm1, %v6132_v29 }
0x3683   :  { %v6128_v53 = vpop.permute.xlu1 %6127 }
0x3684   :  { %9795 = vmatprep.mubr.msk.f32.mxu1 %vm328_vm1, %v6128_v53 }
0x3685   :  { %9794 = vmatpush3.xpose.msk.msra.mxu1 %vm328_vm1, %v6132_v29 }
0x3687   :  { %v6130_v48 = vpop.permute.xlu1 %6129 }
0x3688   :  { %9796 = vmatmul.mubr.msk.f32.vlgmr.msra.gmra.mxu1 %vm328_vm1, %v6130_v48 }
0x36d5   :  { %v9783_v20 = vpop.f32.mrf.mxu1 }
0x36d6   :  { %v6021_v23 = vmul.f32 0.35355338, %v9783_v20 }
0x36d7   :  { %v6011_v24 = vpop.f32.mrf.mxu1 }
0x36d8   :  { %v6023_v25 = vadd.f32 %v11189_v41, %v6021_v23  ;;  %v6020_v30 = vmul.f32 0.35355338, %v6011_v24 }
0x36da   :  { %v6022_v35 = vadd.f32 %v11195_v42, %v6020_v30  ;;  %v6027_v34 = vsel %vm420_vm2, %v6023_v25, -inf }
0x36db   :  { %6028 = vmax.xlane.f32.xlu1 %v6027_v34 }
0x36dc   :  { %v6024_v19 = vsel %vm420_vm2, %v6022_v35, -inf }
0x36dd   :  { %6025 = vmax.xlane.f32.xlu0 %v6024_v19 }
0x36ec   :  { %6248 = vrot.lane.b32.xlu1 %v11386_v16, %s10307_s6 }
0x3748   :  { %v9797_v46 = vpop.f32.mrf.mxu1 }
0x3749   :  { %v6219_v8 = vmul.f32 0.35355338, %v9797_v46 }
0x374a   :  { %v6209_v3 = vpop.f32.mrf.mxu1 }
0x374b   :  { %v6218_v62 = vmul.f32 0.35355338, %v6209_v3  ;;  %v6221_v17 = vadd.f32 %v11189_v41, %v6219_v8 }
0x374d   :  { %v6220_v39 = vadd.f32 %v11195_v42, %v6218_v62  ;;  %v6225_v31 = vsel %vm420_vm2, %v6221_v17, -inf }
0x374f   :  { %v6222_v22 = vsel %vm420_vm2, %v6220_v39, -inf }
0x3750   :  { %6223 = vmax.xlane.f32.xlu0 %v6222_v22 }
0x3754   :  { %6226 = vmax.xlane.f32.xlu0 %v6225_v31 }
0x3764   :  { %v6029_v28 = vpop.xlane.xlu1 %6028 }
0x3765   :  { %v6031_v43 = vsub.f32 %v6023_v25, %v6029_v28 }
0x3766   :  { %v6026_v36 = vpop.xlane.xlu0 %6025 }
0x3767   :  { %v6034_v49 = vmul.f32 1.442695, %v6031_v43  ;;  %v6030_v44 = vsub.f32 %v6022_v35, %v6026_v36 }
0x3768   :  { %v6249_v0 = vpop.permute.xlu1 %6248 }
0x3769   :  { %10173 = vpow2.f32 %v6034_v49  ;;  %v6032_v60 = vmul.f32 1.442695, %v6030_v44  ;;  %9798 = vmatprep.subr.mxu0 %v6249_v0 }
0x376b   :  { %10175 = vpow2.f32 %v6032_v60 }
0x3776   :  { %v10174_v59 = vpop.eup %10173 }
0x3777   :  { %v6039_v47 = vsel %vm420_vm2, %v10174_v59, 0.0 }
0x3778   :  { %v10176_v14 = vpop.eup %10175  ;;  %6040 = vadd.xlane.f32.xlu0 %v6039_v47 }
0x3779   :  { %v6036_v51 = vsel %vm420_vm2, %v10176_v14, 0.0 }
0x377a   :  { %6037 = vadd.xlane.f32.xlu1 %v6036_v51 }
0x378b   :  { %6339 = vrot.lane.b32.xlu1 %v11398_v21, %s10308_s11 }
0x378f   :  { %6337 = vrot.lane.b32.xlu1 %v11404_v54, %s10308_s11 }
0x37d9   :  { %v6224_v27 = vpop.xlane.xlu0 %6223 }
0x37da   :  { %v6228_v52 = vsub.f32 %v6220_v39, %v6224_v27 }
0x37dc   :  { %v6230_v55 = vmul.f32 1.442695, %v6228_v52 }
0x37dd   :  { %v6227_v56 = vpop.xlane.xlu0 %6226 }
0x37de   :  { %10177 = vpow2.f32 %v6230_v55  ;;  %v6229_v57 = vsub.f32 %v6221_v17, %v6227_v56 }
0x37e0   :  { %v6232_v2 = vmul.f32 1.442695, %v6229_v57 }
0x37e2   :  { %10179 = vpow2.f32 %v6232_v2 }
0x37eb   :  { %v10178_v50 = vpop.eup %10177 }
0x37ec   :  { %v6234_v38 = vsel %vm420_vm2, %v10178_v50, 0.0 }
0x37ed   :  { %6235 = vadd.xlane.f32.xlu1 %v6234_v38 }
0x37ef   :  { %v10180_v40 = vpop.eup %10179 }
0x37f0   :  { %v6237_v45 = vsel %vm420_vm2, %v10180_v40, 0.0 }
0x37f1   :  { %6238 = vadd.xlane.f32.xlu0 %v6237_v45  ;;  %v11503_v45 = vld [vmem:[%s11812_s2] sm:$0xff] }
0x37fe   :  { %6335 = vrot.lane.b32.xlu1 %v11384_v13, %s10308_s11 }
0x3801   :  { %v6041_v63 = vpop.xlane.xlu0 %6040 }
0x3802   :  { %10181 = vrcp.f32 %v6041_v63 }
0x3803   :  { %v6038_v7 = vpop.xlane.xlu1 %6037 }
0x3804   :  { %10183 = vrcp.f32 %v6038_v7 }
0x3807   :  { %6246 = vrot.lane.b32.xlu0 %v11391_v26, %s10307_s6  ;;  %v6340_v61 = vpop.permute.xlu1 %6339 }
0x380b   :  { %6333 = vrot.lane.b32.xlu0 %v11389_v1, %s10308_s11  ;;  %v6338_v4 = vpop.permute.xlu1 %6337 }
0x380f   :  { %v10182_v58 = vpop.eup %10181 }
0x3810   :  { %v6045_v5 = vmul.f32 %v10182_v58, %v10174_v59 }
0x3811   :  { %v10184_v15 = vpop.eup %10183 }
0x3812   :  { %v6043_v9 = vmul.f32 %v10184_v15, %v10176_v14 }
0x3814   :  { %9788 = vmatprep.mubr.msk.f32.mxu0 %vm420_vm2, %v6043_v9 }
0x3815   :  { %9789 = vmatmul.mubr.msk.f32.vlgmr.msra.gmra.mxu0 %vm420_vm2, %v6045_v5 }
0x3816   :  { %9799 = vmatpush3.msra.mxu0 %v6249_v0 }
0x3876   :  { %v6236_v6 = vpop.xlane.xlu1 %6235 }
0x3877   :  { %10185 = vrcp.f32 %v6236_v6 }
0x387a   :  { %v6239_v37 = vpop.xlane.xlu0 %6238  ;;  %v6336_v48 = vpop.permute.xlu1 %6335 }
0x387b   :  { %10187 = vrcp.f32 %v6239_v37 }
0x387e   :  { %v6247_v33 = vpop.permute.xlu0 %6246 }
0x387f   :  { %9800 = vmatprep.subr.mxu0 %v6247_v33 }
0x3880   :  { %9801 = vmatpush3.msra.mxu0 %v6247_v33 }
0x3881   :  { %9805 = vmatprep.subr.msk.mxu0 %vm328_vm1, %v6340_v61 }
0x3882   :  { %v6334_v53 = vpop.permute.xlu0 %6333 }
0x3884   :  { %v10186_v32 = vpop.eup %10185 }
0x3885   :  { %v6241_v12 = vmul.f32 %v10186_v32, %v10178_v50  ;;  %v11497_v50 = vld [vmem:[%s11812_s2 + $0x8] sm:$0xff] }
0x3887   :  { %9802 = vmatprep.mubr.msk.f32.mxu0 %vm420_vm2, %v6241_v12 }
0x3888   :  { %v10188_v18 = vpop.eup %10187 }
0x3889   :  { %v6243_v29 = vmul.f32 %v10188_v18, %v10180_v40 }
0x388b   :  { %9803 = vmatmul.mubr.msk.f32.vlgmr.msra.gmra.mxu0 %vm420_vm2, %v6243_v29 }
0x388c   :  { %9806 = vmatpush3.xpose.msk.msra.mxu0 %vm328_vm1, %v6340_v61  ;;  %9809 = vmatprep.mubr.msk.f32.mxu0 %vm328_vm1, %v6334_v53 }
0x388d   :  { %9807 = vmatprep.subr.msk.mxu0 %vm328_vm1, %v6338_v4 }
0x3890   :  { %9808 = vmatpush3.xpose.msk.msra.mxu0 %vm328_vm1, %v6338_v4 }
0x3893   :  { %9810 = vmatmul.mubr.msk.f32.vlgmr.msra.gmra.mxu0 %vm328_vm1, %v6336_v48 }
0x38d5   :  { %v11460_v20 = vpop.f32.mrf.mxu0 }
0x38d7   :  { %v11462_v23 = vpop.f32.mrf.mxu0 }
0x394b   :  { %v11464_v24 = vpop.f32.mrf.mxu0 }
0x394d   :  { %v11466_v25 = vpop.f32.mrf.mxu0 }
0x3953   :  { %v9811_v30 = vpop.f32.mrf.mxu0 }
0x3954   :  { %v6425_v35 = vmul.f32 0.35355338, %v9811_v30 }
0x3955   :  { %v6415_v34 = vpop.f32.mrf.mxu0 }
0x3956   :  { %v6427_v19 = vadd.f32 %v11189_v41, %v6425_v35  ;;  %v6424_v46 = vmul.f32 0.35355338, %v6415_v34  ;;  %v5687_v35 = vld [vmem:[#allocation2 + $0x98] sm:$0xff]  ;;  %v5686_v34 = vld [vmem:[#allocation2 + $0x90] sm:$0xff] }
0x3958   :  { %v6426_v3 = vadd.f32 %v11195_v42, %v6424_v46  ;;  %v6431_v8 = vsel %vm420_vm2, %v6427_v19, -inf }
0x3959   :  { %6432 = vmax.xlane.f32.xlu1 %v6431_v8 }
0x395a   :  { %v6428_v62 = vsel %vm420_vm2, %v6426_v3, -inf }
0x395b   :  { %6429 = vmax.xlane.f32.xlu0 %v6428_v62 }
0x396a   :  { %6452 = vrot.lane.b32.xlu1 %v11386_v16, %s10308_s11 }
0x396e   :  { %6543 = vrot.lane.b32.xlu1 %v11398_v21, %s10309_s12 }
0x3972   :  { %6541 = vrot.lane.b32.xlu1 %v11404_v54, %s10309_s12 }
0x3976   :  { %6539 = vrot.lane.b32.xlu1 %v11384_v13, %s10309_s12 }
0x39e2   :  { %v6433_v41 = vpop.xlane.xlu1 %6432 }
0x39e3   :  { %v6435_v42 = vsub.f32 %v6427_v19, %v6433_v41  ;;  %v5684_v19 = vld [vmem:[#allocation2 + $0x80] sm:$0xff] }
0x39e4   :  { %v6430_v39 = vpop.xlane.xlu0 %6429 }
0x39e5   :  { %v6438_v17 = vmul.f32 1.442695, %v6435_v42  ;;  %v6434_v22 = vsub.f32 %v6426_v3, %v6430_v39 }
0x39e6   :  { %v6453_v31 = vpop.permute.xlu1 %6452 }
0x39e7   :  { %10189 = vpow2.f32 %v6438_v17  ;;  %v6436_v28 = vmul.f32 1.442695, %v6434_v22  ;;  %9812 = vmatprep.subr.mxu1 %v6453_v31 }
0x39e8   :  { %9813 = vmatpush3.msra.mxu1 %v6453_v31 }
0x39e9   :  { %10191 = vpow2.f32 %v6436_v28 }
0x39ea   :  { %v6544_v0 = vpop.permute.xlu1 %6543 }
0x39f4   :  { %v10190_v43 = vpop.eup %10189 }
0x39f5   :  { %v6443_v21 = vsel %vm420_vm2, %v10190_v43, 0.0 }
0x39f6   :  { %v10192_v36 = vpop.eup %10191  ;;  %6444 = vadd.xlane.f32.xlu0 %v6443_v21 }
0x39f7   :  { %v6440_v54 = vsel %vm420_vm2, %v10192_v36, 0.0 }
0x39fa   :  { %6441 = vadd.xlane.f32.xlu0 %v6440_v54 }
0x3a10   :  { %6450 = vrot.lane.b32.xlu0 %v11391_v26, %s10308_s11 }
0x3a14   :  { %6537 = vrot.lane.b32.xlu0 %v11389_v1, %s10309_s12  ;;  %v6542_v1 = vpop.permute.xlu1 %6541 }
0x3a18   :  { %v6540_v27 = vpop.permute.xlu1 %6539 }
0x3a7f   :  { %v6445_v13 = vpop.xlane.xlu0 %6444 }
0x3a80   :  { %10193 = vrcp.f32 %v6445_v13 }
0x3a83   :  { %v6442_v49 = vpop.xlane.xlu0 %6441 }
0x3a84   :  { %10195 = vrcp.f32 %v6442_v49 }
0x3a87   :  { %v6451_v44 = vpop.permute.xlu0 %6450 }
0x3a88   :  { %9814 = vmatprep.subr.mxu1 %v6451_v44 }
0x3a89   :  { %9815 = vmatpush3.msra.mxu1 %v6451_v44 }
0x3a8a   :  { %9819 = vmatprep.subr.msk.mxu1 %vm328_vm1, %v6544_v0 }
0x3a8b   :  { %v6538_v51 = vpop.permute.xlu0 %6537 }
0x3a8d   :  { %v10194_v60 = vpop.eup %10193 }
0x3a8e   :  { %v6449_v14 = vmul.f32 %v10194_v60, %v10190_v43 }
0x3a91   :  { %v10196_v59 = vpop.eup %10195 }
0x3a92   :  { %v6447_v47 = vmul.f32 %v10196_v59, %v10192_v36 }
0x3a94   :  { %9816 = vmatprep.mubr.msk.f32.mxu1 %vm420_vm2, %v6447_v47 }
0x3a95   :  { %9817 = vmatmul.mubr.msk.f32.vlgmr.msra.gmra.mxu1 %vm420_vm2, %v6449_v14 }
0x3a96   :  { %9820 = vmatpush3.xpose.msk.msra.mxu1 %vm328_vm1, %v6544_v0  ;;  %9823 = vmatprep.mubr.msk.f32.mxu1 %vm328_vm1, %v6538_v51 }
0x3a97   :  { %9821 = vmatprep.subr.msk.mxu1 %vm328_vm1, %v6542_v1 }
0x3a9a   :  { %9822 = vmatpush3.xpose.msk.msra.mxu1 %vm328_vm1, %v6542_v1 }
0x3a9d   :  { %9824 = vmatmul.mubr.msk.f32.vlgmr.msra.gmra.mxu1 %vm328_vm1, %v6540_v27 }
0x3b55   :  { %v9818_v52 = vpop.f32.mrf.mxu1 }
0x3b57   :  { %v6528_v55 = vpop.f32.mrf.mxu1 }
0x3b5d   :  { %v9825_v56 = vpop.f32.mrf.mxu1 }
0x3b5e   :  { %v6629_v57 = vmul.f32 0.35355338, %v9825_v56  ;;  %v5690_v56 = vld [vmem:[#allocation4 + $0x88] sm:$0xff] }
0x3b5f   :  { %v6619_v2 = vpop.f32.mrf.mxu1 }
0x3b60   :  { %v6631_v38 = vadd.f32 %v11497_v50, %v6629_v57  ;;  %v6628_v40 = vmul.f32 0.35355338, %v6619_v2  ;;  %v5689_v57 = vld [vmem:[#allocation4 + $0x80] sm:$0xff]  ;;  %v8699_v2 = vld [vmem:[%s11818_s8 + $0x138] sm:$0xff] }
0x3b62   :  { %v6630_v63 = vadd.f32 %v11503_v45, %v6628_v40  ;;  %v6635_v7 = vsel %vm420_vm2, %v6631_v38, -inf  ;;  %v8697_v40 = vld [vmem:[%s11818_s8 + $0x128] sm:$0xff] }
0x3b63   :  { %6636 = vmax.xlane.f32.xlu1 %v6635_v7  ;;  %v8695_v7 = vld [vmem:[%s11818_s8 + $0x118] sm:$0xff] }
0x3b64   :  { %v6632_v58 = vsel %vm420_vm2, %v6630_v63, -inf }
0x3b65   :  { %6633 = vmax.xlane.f32.xlu0 %v6632_v58 }
0x3b74   :  { %6656 = vrot.lane.b32.xlu1 %v11386_v16, %s10309_s12 }
0x3b78   :  { %6743 = vrot.lane.b32.xlu1 %v11466_v25, %s10305_s13 }
0x3b7c   :  { %6745 = vrot.lane.b32.xlu1 %v11464_v24, %s10305_s13 }
0x3b80   :  { %6753 = vrot.lane.b32.xlu1 %v9818_v52, %s10310_s14 }
0x3bec   :  { %v6637_v15 = vpop.xlane.xlu1 %6636 }
0x3bed   :  { %v6639_v9 = vsub.f32 %v6631_v38, %v6637_v15  ;;  %v8698_v38 = vld [vmem:[%s11818_s8 + $0x130] sm:$0xff] }
0x3bee   :  { %v6634_v5 = vpop.xlane.xlu0 %6633 }
0x3bef   :  { %v6642_v61 = vmul.f32 1.442695, %v6639_v9  ;;  %v6638_v4 = vsub.f32 %v6630_v63, %v6634_v5  ;;  %v8696_v63 = vld [vmem:[%s11818_s8 + $0x120] sm:$0xff] }
0x3bf0   :  { %v6657_v6 = vpop.permute.xlu1 %6656 }
0x3bf1   :  { %10197 = vpow2.f32 %v6642_v61  ;;  %v6640_v37 = vmul.f32 1.442695, %v6638_v4  ;;  %9826 = vmatprep.subr.mxu0 %v6657_v6 }
0x3bf2   :  { %9827 = vmatpush3.msra.mxu0 %v6657_v6 }
0x3bf3   :  { %10199 = vpow2.f32 %v6640_v37 }
0x3bf4   :  { %v6744_v8 = vpop.permute.xlu1 %6743 }
0x3bf5   :  { %v6765_v39 = vsel %vm328_vm1, %v11462_v23, %v6744_v8 }
0x3bf8   :  { %v6746_v62 = vpop.permute.xlu1 %6745 }
0x3bf9   :  { %v6766_v22 = vsel %vm328_vm1, %v11460_v20, %v6746_v62 }
0x3bfc   :  { %v6754_v41 = vpop.permute.xlu1 %6753 }
0x3bfd   :  { %v6768_v43 = vsel %vm420_vm2, %v6766_v22, %v6754_v41 }
0x3bfe   :  { %v10198_v16 = vpop.eup %10197 }
0x3bff   :  { %v6647_v33 = vsel %vm420_vm2, %v10198_v16, 0.0 }
0x3c00   :  { %v10200_v32 = vpop.eup %10199  ;;  %6648 = vadd.xlane.f32.xlu0 %v6647_v33 }
0x3c01   :  { %v6644_v12 = vsel %vm420_vm2, %v10200_v32, 0.0 }
0x3c04   :  { %6645 = vadd.xlane.f32.xlu0 %v6644_v12  ;;  %v8693_v12 = vld [vmem:[%s11818_s8 + $0x108] sm:$0xff] }
0x3c1a   :  { %6654 = vrot.lane.b32.xlu0 %v11391_v26, %s10309_s12  ;;  %v5685_v26 = vld [vmem:[#allocation2 + $0x88] sm:$0xff] }
0x3c1e   :  { %6751 = vrot.lane.b32.xlu0 %v6528_v55, %s10310_s14  ;;  %v5691_v55 = vld [vmem:[#allocation4 + $0x90] sm:$0xff] }
0x3c89   :  { %v6649_v18 = vpop.xlane.xlu0 %6648 }
0x3c8a   :  { %10201 = vrcp.f32 %v6649_v18  ;;  %v8692_v18 = vld [vmem:[%s11818_s8 + $0x100] sm:$0xff] }
0x3c8d   :  { %v6646_v29 = vpop.xlane.xlu0 %6645 }
0x3c8e   :  { %10203 = vrcp.f32 %v6646_v29 }
0x3c91   :  { %v6655_v53 = vpop.permute.xlu0 %6654 }
0x3c92   :  { %9828 = vmatprep.subr.mxu0 %v6655_v53 }
0x3c93   :  { %9829 = vmatpush3.msra.mxu0 %v6655_v53 }
0x3c94   :  { %9833 = vmatprep.subr.mxu0 %v5687_v35 }
0x3c95   :  { %v6752_v42 = vpop.permute.xlu0 %6751 }
0x3c96   :  { %v6767_v31 = vsel %vm420_vm2, %v6765_v39, %v6752_v42 }
0x3c97   :  { %v10202_v48 = vpop.eup %10201 }
0x3c98   :  { %v6653_v30 = vmul.f32 %v10202_v48, %v10198_v16 }
0x3c9b   :  { %v10204_v24 = vpop.eup %10203 }
0x3c9c   :  { %v6651_v25 = vmul.f32 %v10204_v24, %v10200_v32  ;;  %v8694_v32 = vld [vmem:[%s11818_s8 + $0x110] sm:$0xff] }
0x3c9e   :  { %9830 = vmatprep.mubr.msk.f32.mxu0 %vm420_vm2, %v6651_v25 }
0x3c9f   :  { %9831 = vmatmul.mubr.msk.f32.vlgmr.msra.gmra.mxu0 %vm420_vm2, %v6653_v30 }
0x3ca0   :  { %9834 = vmatpush3.msra.mxu0 %v5687_v35 }
0x3ca1   :  { %9835 = vmatprep.subr.mxu0 %v5686_v34 }
0x3ca2   :  { %9836 = vmatpush3.msra.mxu0 %v5686_v34 }
0x3ca3   :  { %9837 = vmatprep.subr.mxu0 %v5685_v26 }
0x3ca4   :  { %9838 = vmatpush3.msra.mxu0 %v5685_v26 }
0x3ca5   :  { %9839 = vmatprep.subr.mxu0 %v5684_v19 }
0x3ca6   :  { %9840 = vmatpush3.msra.mxu0 %v5684_v19 }
0x3ca7   :  { %9855 = vmatprep.subr.mxu0 %v8699_v2 }
0x3d5f   :  { %v9832_v46 = vpop.f32.mrf.mxu0 }
0x3d60   :  { %6761 = vrot.lane.b32.xlu1 %v9832_v46, %s10311_s0 }
0x3d61   :  { %v6732_v3 = vpop.f32.mrf.mxu0 }
0x3d62   :  { %6759 = vrot.lane.b32.xlu0 %v6732_v3, %s10311_s0 }
0x3dd2   :  { %v6762_v17 = vpop.permute.xlu1 %6761 }
0x3dd3   :  { %v6770_v36 = vsel %vm1166_vm3, %v6768_v43, %v6762_v17  ;;  %v8747_v43 = vld [vmem:[%s11815_s5 + $0xb8] sm:$0xff] }
0x3dd4   :  { %v6760_v28 = vpop.permute.xlu0 %6759 }
0x3dd5   :  { %v6769_v21 = vsel %vm1166_vm3, %v6767_v31, %v6760_v28  ;;  %v8739_v28 = vld [vmem:[%s11813_s3 + $0xb8] sm:$0xff] }
0x3dd6   :  { %9841 = vmatprep.mubr.msk.f32.mxu0 %vm96_vm0, %v6769_v21  ;;  %v8738_v21 = vld [vmem:[%s11813_s3 + $0xb0] sm:$0xff] }
0x3dd7   :  { %9842 = vmatmul.mubr.msk.f32.vlgmr.msra.gmra.mxu0 %vm96_vm0, %v6770_v36  ;;  %v8746_v36 = vld [vmem:[%s11815_s5 + $0xb0] sm:$0xff] }
0x3dd8   :  { %9856 = vmatpush3.msra.mxu0 %v8699_v2 }
0x3dd9   :  { %9857 = vmatprep.subr.mxu0 %v8698_v38 }
0x3dda   :  { %9858 = vmatpush3.msra.mxu0 %v8698_v38 }
0x3ddb   :  { %9859 = vmatprep.subr.mxu0 %v8697_v40 }
0x3ddc   :  { %9860 = vmatpush3.msra.mxu0 %v8697_v40 }
0x3ddd   :  { %9861 = vmatprep.subr.mxu0 %v8696_v63 }
0x3dde   :  { %9862 = vmatpush3.msra.mxu0 %v8696_v63 }
0x3ddf   :  { %9863 = vmatprep.subr.mxu0 %v8695_v7 }
0x3de0   :  { %9864 = vmatpush3.msra.mxu0 %v8695_v7 }
0x3de1   :  { %9865 = vmatprep.subr.mxu0 %v8694_v32 }
0x3de2   :  { %9866 = vmatpush3.msra.mxu0 %v8694_v32 }
0x3de3   :  { %9867 = vmatprep.subr.mxu0 %v8693_v12 }
0x3de4   :  { %9868 = vmatpush3.msra.mxu0 %v8693_v12 }
0x3de5   :  { %9869 = vmatprep.subr.mxu0 %v8692_v18 }
0x3de6   :  { %9870 = vmatpush3.msra.mxu0 %v8692_v18 }
0x3de7   :  { %9896 = vmatprep.subr.mxu0 %v8747_v43 }
0x3e97   :  { %v9843_v54 = vpop.f32.mrf.mxu0 }
0x3e98   :  { %v6849_v23 = vadd.f32 %v9843_v54, %v11361_v11  ;;  %v8737_v54 = vld [vmem:[%s11813_s3 + $0xa8] sm:$0xff] }
0x3e99   :  { %v6843_v13 = vpop.f32.mrf.mxu0 }
0x3e9a   :  { %v6844_v49 = vadd.f32 %v6843_v13, %v11359_v10  ;;  %v6855_v20 = vsel %vm96_vm0, %v6849_v23, 0.0  ;;  %v5692_v10 = vld [vmem:[#allocation4 + $0x98] sm:$0xff]  ;;  %v8736_v13 = vld [vmem:[%s11813_s3 + $0xa0] sm:$0xff] }
0x3e9b   :  { %6856 = vadd.xlane.f32.xlu1 %v6855_v20  ;;  %9844 = vmatprep.subr.mxu1 %v5692_v10  ;;  %v8743_v20 = vld [vmem:[%s11814_s4 + $0xb8] sm:$0xff] }
0x3e9c   :  { %v6852_v44 = vsel %vm96_vm0, %v6844_v49, 0.0  ;;  %9845 = vmatpush3.msra.mxu1 %v5692_v10  ;;  %v8741_v10 = vld [vmem:[%s11814_s4 + $0xa8] sm:$0xff] }
0x3e9d   :  { %6853 = vadd.xlane.f32.xlu0 %v6852_v44  ;;  %9846 = vmatprep.subr.mxu1 %v5691_v55 }
0x3e9e   :  { %9847 = vmatpush3.msra.mxu1 %v5691_v55  ;;  %v8740_v55 = vld [vmem:[%s11814_s4 + $0xa0] sm:$0xff] }
0x3e9f   :  { %9848 = vmatprep.subr.mxu1 %v5690_v56 }
0x3ea0   :  { %9849 = vmatpush3.msra.mxu1 %v5690_v56 }
0x3ea1   :  { %9850 = vmatprep.subr.mxu1 %v5689_v57 }
0x3ea2   :  { %9851 = vmatpush3.msra.mxu1 %v5689_v57 }
0x3ea3   :  { %9874 = vmatprep.subr.mxu1 %v8739_v28 }
0x3f24   :  { %v6857_v0 = vpop.xlane.xlu1 %6856 }
0x3f25   :  { %v6859_v60 = vmul.f32 0.03125, %v6857_v0 }
0x3f26   :  { %v6854_v59 = vpop.xlane.xlu0 %6853 }
0x3f27   :  { %v6858_v47 = vmul.f32 0.03125, %v6854_v59  ;;  %v6861_v14 = vsub.f32 %v6849_v23, %v6859_v60  ;;  %v8745_v23 = vld [vmem:[%s11815_s5 + $0xa8] sm:$0xff] }
0x3f29   :  { %v6860_v51 = vsub.f32 %v6844_v49, %v6858_v47  ;;  %v6863_v52 = vmul.f32 %v6861_v14, %v6861_v14  ;;  %v8744_v49 = vld [vmem:[%s11815_s5 + $0xa0] sm:$0xff] }
0x3f2b   :  { %v6862_v1 = vmul.f32 %v6860_v51, %v6860_v51  ;;  %v6867_v11 = vsel %vm96_vm0, %v6863_v52, 0.0 }
0x3f2d   :  { %v6864_v27 = vsel %vm96_vm0, %v6862_v1, 0.0 }
0x3f2e   :  { %6865 = vadd.xlane.f32.xlu0 %v6864_v27 }
0x3f32   :  { %6868 = vadd.xlane.f32.xlu0 %v6867_v11  ;;  %v8742_v11 = vld [vmem:[%s11814_s4 + $0xb0] sm:$0xff] }
0x3fb7   :  { %v6866_v58 = vpop.xlane.xlu0 %6865 }
0x3fb8   :  { %v6870_v15 = vmul.f32 0.03125, %v6866_v58 }
0x3fba   :  { %v6872_v9 = vadd.f32 1e-05, %v6870_v15 }
0x3fbb   :  { %v6869_v5 = vpop.xlane.xlu0 %6868 }
0x3fbc   :  { %10205 = vrsqrt.f32 %v6872_v9  ;;  %v6871_v61 = vmul.f32 0.03125, %v6869_v5 }
0x3fbe   :  { %v6873_v4 = vadd.f32 1e-05, %v6871_v61 }
0x3fc0   :  { %10207 = vrsqrt.f32 %v6873_v4 }
0x3fc9   :  { %v10206_v6 = vpop.eup %10205 }
0x3fca   :  { %v6876_v37 = vmul.f32 %v10206_v6, %v6860_v51 }
0x3fcc   :  { %9852 = vmatprep.mubr.msk.f32.mxu1 %vm96_vm0, %v6876_v37 }
0x3fcd   :  { %v10208_v16 = vpop.eup %10207 }
0x3fce   :  { %v6877_v33 = vmul.f32 %v10208_v16, %v6861_v14 }
0x3fd0   :  { %9853 = vmatmul.mubr.msk.f32.vlgmr.msra.gmra.mxu1 %vm96_vm0, %v6877_v33 }
0x3fd1   :  { %9875 = vmatpush3.msra.mxu1 %v8739_v28 }
0x3fd2   :  { %9876 = vmatprep.subr.mxu1 %v8738_v21 }
0x3fd3   :  { %9877 = vmatpush3.msra.mxu1 %v8738_v21 }
0x3fd4   :  { %9878 = vmatprep.subr.mxu1 %v8737_v54 }
0x3fd5   :  { %9879 = vmatpush3.msra.mxu1 %v8737_v54 }
0x3fd6   :  { %9880 = vmatprep.subr.mxu1 %v8736_v13 }
0x3fd7   :  { %9881 = vmatpush3.msra.mxu1 %v8736_v13 }
0x3fd8   :  { %9885 = vmatprep.subr.mxu1 %v8743_v20 }
0x4090   :  { %v9854_v29 = vpop.f32.mrf.mxu1 }
0x4091   :  { %v6960_v24 = vmax.f32 %v9854_v29, 0.0 }
0x4092   :  { %v6950_v53 = vpop.f32.mrf.mxu1 }
0x4093   :  { %v6959_v48 = vmax.f32 %v6950_v53, 0.0 }
0x4095   :  { %9871 = vmatprep.mubr.msk.f32.mxu0 %vm1360_vm4, %v6959_v48 }
0x4096   :  { %9872 = vmatmul.mubr.msk.f32.vlgmr.msra.gmra.mxu0 %vm1360_vm4, %v6960_v24 }
0x4097   :  { %9897 = vmatpush3.msra.mxu0 %v8747_v43 }
0x4098   :  { %9898 = vmatprep.subr.mxu0 %v8746_v36 }
0x4099   :  { %9899 = vmatpush3.msra.mxu0 %v8746_v36 }
0x409a   :  { %9900 = vmatprep.subr.mxu0 %v8745_v23 }
0x409b   :  { %9901 = vmatpush3.msra.mxu0 %v8745_v23 }
0x409c   :  { %9902 = vmatprep.subr.mxu0 %v8744_v49 }
0x409d   :  { %9903 = vmatpush3.msra.mxu0 %v8744_v49 }
0x4156   :  { %v9873_v25 = vpop.f32.mrf.mxu0 }
0x4157   :  { %v7039_v30 = vadd.f32 %v9873_v25, %v6877_v33 }
0x4158   :  { %v7033_v35 = vpop.f32.mrf.mxu0 }
0x4159   :  { %v7034_v34 = vadd.f32 %v7033_v35, %v6876_v37  ;;  %v7045_v26 = vsel %vm96_vm0, %v7039_v30, 0.0 }
0x415a   :  { %7046 = vadd.xlane.f32.xlu0 %v7045_v26 }
0x415b   :  { %v7042_v19 = vsel %vm96_vm0, %v7034_v34, 0.0 }
0x415c   :  { %7043 = vadd.xlane.f32.xlu1 %v7042_v19 }
0x41e3   :  { %v7047_v46 = vpop.xlane.xlu0 %7046 }
0x41e4   :  { %v7049_v3 = vmul.f32 0.03125, %v7047_v46 }
0x41e5   :  { %v7044_v8 = vpop.xlane.xlu1 %7043 }
0x41e6   :  { %v7051_v62 = vsub.f32 %v7039_v30, %v7049_v3  ;;  %v7048_v41 = vmul.f32 0.03125, %v7044_v8 }
0x41e8   :  { %v7050_v42 = vsub.f32 %v7034_v34, %v7048_v41  ;;  %v7053_v39 = vmul.f32 %v7051_v62, %v7051_v62 }
0x41ea   :  { %v7057_v17 = vsel %vm96_vm0, %v7053_v39, 0.0  ;;  %v7052_v22 = vmul.f32 %v7050_v42, %v7050_v42 }
0x41eb   :  { %7058 = vadd.xlane.f32.xlu0 %v7057_v17 }
0x41ec   :  { %v7054_v31 = vsel %vm96_vm0, %v7052_v22, 0.0 }
0x41ed   :  { %7055 = vadd.xlane.f32.xlu1 %v7054_v31 }
0x4274   :  { %v7059_v44 = vpop.xlane.xlu0 %7058 }
0x4275   :  { %v7061_v0 = vmul.f32 0.03125, %v7059_v44 }
0x4276   :  { %v7056_v60 = vpop.xlane.xlu1 %7055 }
0x4277   :  { %v7063_v59 = vadd.f32 1e-05, %v7061_v0  ;;  %v7060_v47 = vmul.f32 0.03125, %v7056_v60 }
0x4279   :  { %v7062_v14 = vadd.f32 1e-05, %v7060_v47  ;;  %10209 = vrsqrt.f32 %v7063_v59 }
0x427b   :  { %10211 = vrsqrt.f32 %v7062_v14 }
0x4286   :  { %v10210_v51 = vpop.eup %10209 }
0x4287   :  { %v11601_v52 = vmul.f32 %v10210_v51, %v7051_v62 }
0x4288   :  { %v10212_v1 = vpop.eup %10211 }
0x4289   :  { %v11599_v27 = vmul.f32 %v10212_v1, %v7050_v42 }
0x428b   :  { %9882 = vmatprep.mubr.msk.f32.mxu1 %vm96_vm0, %v11599_v27  ;;  %9904 = vmatprep.mubr.msk.f32.mxu0 %vm96_vm0, %v11599_v27 }
0x428c   :  { %9883 = vmatmul.mubr.msk.f32.vlgmr.msra.gmra.mxu1 %vm96_vm0, %v11601_v52  ;;  %9905 = vmatmul.mubr.msk.f32.vlgmr.msra.gmra.mxu0 %vm96_vm0, %v11601_v52 }
0x428d   :  { %9886 = vmatpush3.msra.mxu1 %v8743_v20  ;;  %9893 = vmatprep.mubr.msk.f32.mxu1 %vm96_vm0, %v11599_v27 }
0x428e   :  { %9887 = vmatprep.subr.mxu1 %v8742_v11 }
0x428f   :  { %9888 = vmatpush3.msra.mxu1 %v8742_v11 }
0x4290   :  { %9889 = vmatprep.subr.mxu1 %v8741_v10 }
0x4291   :  { %9890 = vmatpush3.msra.mxu1 %v8741_v10 }
0x4292   :  { %9891 = vmatprep.subr.mxu1 %v8740_v55 }
0x4293   :  { %9892 = vmatpush3.msra.mxu1 %v8740_v55 }
0x4294   :  { %9894 = vmatmul.mubr.msk.f32.vlgmr.msra.gmra.mxu1 %vm96_vm0, %v11601_v52 }
0x434c   :  { %v11624_v56 = vpop.f32.mrf.mxu1  ;;  %v11626_v57 = vpop.f32.mrf.mxu0 }
0x434d   :  { %9914 = vmatprep.subr.mxu0 %v11626_v57 }
0x434e   :  { %v11629_v2 = vpop.f32.mrf.mxu1  ;;  %v11631_v38 = vpop.f32.mrf.mxu0  ;;  %9915 = vmatpush3.msra.mxu0 %v11626_v57 }
0x434f   :  { %9911 = vmatprep.mubr.msk.f32.mxu1 %vm328_vm1, %v11629_v2  ;;  %9916 = vmatprep.subr.mxu0 %v11631_v38 }
0x4350   :  { %9917 = vmatpush3.msra.mxu0 %v11631_v38 }
0x4354   :  { %v11638_v40 = vpop.f32.mrf.mxu1 }
0x4355   :  { %7533 = vrot.lane.b32.xlu1 %v11638_v40, %s10307_s6  ;;  %9907 = vmatprep.subr.msk.mxu1 %vm328_vm1, %v11638_v40 }
0x4356   :  { %v11644_v63 = vpop.f32.mrf.mxu1  ;;  %9908 = vmatpush3.xpose.msk.msra.mxu1 %vm328_vm1, %v11638_v40 }
0x4357   :  { %7531 = vrot.lane.b32.xlu0 %v11644_v63, %s10307_s6  ;;  %9909 = vmatprep.subr.msk.mxu1 %vm328_vm1, %v11644_v63 }
0x4359   :  { %7527 = vrot.lane.b32.xlu1 %v11629_v2, %s10307_s6 }
0x435a   :  { %9910 = vmatpush3.xpose.msk.msra.mxu1 %vm328_vm1, %v11644_v63 }
0x435d   :  { %7529 = vrot.lane.b32.xlu1 %v11624_v56, %s10307_s6  ;;  %9912 = vmatmul.mubr.msk.f32.vlgmr.msra.gmra.mxu1 %vm328_vm1, %v11624_v56 }
0x43c7   :  { %v7534_v7 = vpop.permute.xlu1 %7533 }
0x43c8   :  { %9921 = vmatprep.subr.msk.mxu1 %vm328_vm1, %v7534_v7 }
0x43c9   :  { %v7532_v58 = vpop.permute.xlu0 %7531  ;;  %9922 = vmatpush3.xpose.msk.msra.mxu1 %vm328_vm1, %v7534_v7 }
0x43ca   :  { %9923 = vmatprep.subr.msk.mxu1 %vm328_vm1, %v7532_v58 }
0x43cb   :  { %v7528_v15 = vpop.permute.xlu1 %7527 }
0x43cc   :  { %9925 = vmatprep.mubr.msk.f32.mxu1 %vm328_vm1, %v7528_v15 }
0x43cd   :  { %9924 = vmatpush3.xpose.msk.msra.mxu1 %vm328_vm1, %v7532_v58 }
0x43cf   :  { %v7530_v9 = vpop.permute.xlu1 %7529 }
0x43d0   :  { %9926 = vmatmul.mubr.msk.f32.vlgmr.msra.gmra.mxu1 %vm328_vm1, %v7530_v9 }
0x441d   :  { %v9913_v5 = vpop.f32.mrf.mxu1 }
0x441e   :  { %v7421_v61 = vmul.f32 0.35355338, %v9913_v5 }
0x441f   :  { %v7411_v4 = vpop.f32.mrf.mxu1 }
0x4420   :  { %v7423_v6 = vadd.f32 %v11497_v50, %v7421_v61  ;;  %v7420_v37 = vmul.f32 0.35355338, %v7411_v4 }
0x4422   :  { %v7422_v16 = vadd.f32 %v11503_v45, %v7420_v37  ;;  %v7427_v33 = vsel %vm420_vm2, %v7423_v6, -inf }
0x4423   :  { %7428 = vmax.xlane.f32.xlu1 %v7427_v33 }
0x4424   :  { %v7424_v32 = vsel %vm420_vm2, %v7422_v16, -inf }
0x4425   :  { %7425 = vmax.xlane.f32.xlu0 %v7424_v32 }
0x4434   :  { %7648 = vrot.lane.b32.xlu1 %v11626_v57, %s10307_s6 }
0x4490   :  { %v9927_v12 = vpop.f32.mrf.mxu1 }
0x4491   :  { %v7619_v29 = vmul.f32 0.35355338, %v9927_v12 }
0x4492   :  { %v7609_v18 = vpop.f32.mrf.mxu1 }
0x4493   :  { %v7618_v53 = vmul.f32 0.35355338, %v7609_v18  ;;  %v7621_v24 = vadd.f32 %v11497_v50, %v7619_v29 }
0x4495   :  { %v7620_v48 = vadd.f32 %v11503_v45, %v7618_v53  ;;  %v7625_v30 = vsel %vm420_vm2, %v7621_v24, -inf }
0x4497   :  { %v7622_v25 = vsel %vm420_vm2, %v7620_v48, -inf }
0x4498   :  { %7623 = vmax.xlane.f32.xlu0 %v7622_v25 }
0x449c   :  { %7626 = vmax.xlane.f32.xlu0 %v7625_v30 }
0x44ac   :  { %v7429_v35 = vpop.xlane.xlu1 %7428 }
0x44ad   :  { %v7431_v34 = vsub.f32 %v7423_v6, %v7429_v35 }
0x44ae   :  { %v7426_v26 = vpop.xlane.xlu0 %7425 }
0x44af   :  { %v7434_v19 = vmul.f32 1.442695, %v7431_v34  ;;  %v7430_v46 = vsub.f32 %v7422_v16, %v7426_v26 }
0x44b0   :  { %v7649_v3 = vpop.permute.xlu1 %7648 }
0x44b1   :  { %10213 = vpow2.f32 %v7434_v19  ;;  %v7432_v8 = vmul.f32 1.442695, %v7430_v46  ;;  %9928 = vmatprep.subr.mxu0 %v7649_v3 }
0x44b3   :  { %10215 = vpow2.f32 %v7432_v8 }
0x44be   :  { %v10214_v62 = vpop.eup %10213 }
0x44bf   :  { %v7439_v41 = vsel %vm420_vm2, %v10214_v62, 0.0 }
0x44c0   :  { %v10216_v42 = vpop.eup %10215  ;;  %7440 = vadd.xlane.f32.xlu0 %v7439_v41 }
0x44c1   :  { %v7436_v39 = vsel %vm420_vm2, %v10216_v42, 0.0 }
0x44c2   :  { %7437 = vadd.xlane.f32.xlu1 %v7436_v39 }
0x44d3   :  { %7739 = vrot.lane.b32.xlu1 %v11638_v40, %s10308_s11 }
0x44d7   :  { %7737 = vrot.lane.b32.xlu1 %v11644_v63, %s10308_s11 }
0x4521   :  { %v7624_v17 = vpop.xlane.xlu0 %7623 }
0x4522   :  { %v7628_v22 = vsub.f32 %v7620_v48, %v7624_v17 }
0x4524   :  { %v7630_v31 = vmul.f32 1.442695, %v7628_v22 }
0x4525   :  { %v7627_v28 = vpop.xlane.xlu0 %7626 }
0x4526   :  { %10217 = vpow2.f32 %v7630_v31  ;;  %v7629_v43 = vsub.f32 %v7621_v24, %v7627_v28 }
0x4528   :  { %v7632_v21 = vmul.f32 1.442695, %v7629_v43 }
0x452a   :  { %10219 = vpow2.f32 %v7632_v21 }
0x4533   :  { %v10218_v36 = vpop.eup %10217 }
0x4534   :  { %v7634_v54 = vsel %vm420_vm2, %v10218_v36, 0.0 }
0x4535   :  { %7635 = vadd.xlane.f32.xlu1 %v7634_v54 }
0x4537   :  { %v10220_v23 = vpop.eup %10219 }
0x4538   :  { %v7637_v13 = vsel %vm420_vm2, %v10220_v23, 0.0 }
0x4539   :  { %7638 = vadd.xlane.f32.xlu0 %v7637_v13 }
0x4546   :  { %7735 = vrot.lane.b32.xlu1 %v11624_v56, %s10308_s11 }
0x4549   :  { %v7441_v49 = vpop.xlane.xlu0 %7440 }
0x454a   :  { %10221 = vrcp.f32 %v7441_v49 }
0x454b   :  { %v7438_v20 = vpop.xlane.xlu1 %7437 }
0x454c   :  { %10223 = vrcp.f32 %v7438_v20 }
0x454f   :  { %7646 = vrot.lane.b32.xlu0 %v11631_v38, %s10307_s6  ;;  %v7740_v47 = vpop.permute.xlu1 %7739 }
0x4553   :  { %7733 = vrot.lane.b32.xlu0 %v11629_v2, %s10308_s11  ;;  %v7738_v14 = vpop.permute.xlu1 %7737 }
0x4557   :  { %v10222_v44 = vpop.eup %10221 }
0x4558   :  { %v7445_v59 = vmul.f32 %v10222_v44, %v10214_v62 }
0x4559   :  { %v10224_v0 = vpop.eup %10223 }
0x455a   :  { %v7443_v60 = vmul.f32 %v10224_v0, %v10216_v42 }
0x455c   :  { %9918 = vmatprep.mubr.msk.f32.mxu0 %vm420_vm2, %v7443_v60 }
0x455d   :  { %9919 = vmatmul.mubr.msk.f32.vlgmr.msra.gmra.mxu0 %vm420_vm2, %v7445_v59 }
0x455e   :  { %9929 = vmatpush3.msra.mxu0 %v7649_v3 }
0x45be   :  { %v7636_v51 = vpop.xlane.xlu1 %7635 }
0x45bf   :  { %10225 = vrcp.f32 %v7636_v51 }
0x45c2   :  { %v7639_v1 = vpop.xlane.xlu0 %7638  ;;  %v7736_v9 = vpop.permute.xlu1 %7735 }
0x45c3   :  { %10227 = vrcp.f32 %v7639_v1 }
0x45c6   :  { %v7647_v11 = vpop.permute.xlu0 %7646 }
0x45c7   :  { %9930 = vmatprep.subr.mxu0 %v7647_v11 }
0x45c8   :  { %9931 = vmatpush3.msra.mxu0 %v7647_v11 }
0x45c9   :  { %9935 = vmatprep.subr.msk.mxu0 %vm328_vm1, %v7740_v47 }
0x45ca   :  { %v7734_v15 = vpop.permute.xlu0 %7733 }
0x45cc   :  { %v10226_v10 = vpop.eup %10225 }
0x45cd   :  { %v7641_v55 = vmul.f32 %v10226_v10, %v10218_v36 }
0x45cf   :  { %9932 = vmatprep.mubr.msk.f32.mxu0 %vm420_vm2, %v7641_v55 }
0x45d0   :  { %v10228_v7 = vpop.eup %10227 }
0x45d1   :  { %v7643_v58 = vmul.f32 %v10228_v7, %v10220_v23 }
0x45d3   :  { %9933 = vmatmul.mubr.msk.f32.vlgmr.msra.gmra.mxu0 %vm420_vm2, %v7643_v58 }
0x45d4   :  { %9936 = vmatpush3.xpose.msk.msra.mxu0 %vm328_vm1, %v7740_v47  ;;  %9939 = vmatprep.mubr.msk.f32.mxu0 %vm328_vm1, %v7734_v15 }
0x45d5   :  { %9937 = vmatprep.subr.msk.mxu0 %vm328_vm1, %v7738_v14 }
0x45d8   :  { %9938 = vmatpush3.xpose.msk.msra.mxu0 %vm328_vm1, %v7738_v14 }
0x45db   :  { %9940 = vmatmul.mubr.msk.f32.vlgmr.msra.gmra.mxu0 %vm328_vm1, %v7736_v9 }
0x461d   :  { %v11700_v5 = vpop.f32.mrf.mxu0 }
0x461f   :  { %v11702_v61 = vpop.f32.mrf.mxu0 }
0x4693   :  { %v11704_v4 = vpop.f32.mrf.mxu0 }
0x4695   :  { %v11706_v6 = vpop.f32.mrf.mxu0 }
0x469b   :  { %v9941_v37 = vpop.f32.mrf.mxu0 }
0x469c   :  { %v7825_v16 = vmul.f32 0.35355338, %v9941_v37  ;;  %v7086_v37 = vld [vmem:[#allocation2 + $0xb0] sm:$0xff] }
0x469d   :  { %v7815_v33 = vpop.f32.mrf.mxu0 }
0x469e   :  { %v7827_v32 = vadd.f32 %v11497_v50, %v7825_v16  ;;  %v7824_v12 = vmul.f32 0.35355338, %v7815_v33  ;;  %v7084_v16 = vld [vmem:[#allocation2 + $0xa0] sm:$0xff] }
0x46a0   :  { %v7826_v18 = vadd.f32 %v11503_v45, %v7824_v12  ;;  %v7831_v29 = vsel %vm420_vm2, %v7827_v32, -inf }
0x46a1   :  { %7832 = vmax.xlane.f32.xlu1 %v7831_v29 }
0x46a2   :  { %v7828_v53 = vsel %vm420_vm2, %v7826_v18, -inf }
0x46a3   :  { %7829 = vmax.xlane.f32.xlu0 %v7828_v53 }
0x46b2   :  { %7852 = vrot.lane.b32.xlu1 %v11626_v57, %s10308_s11 }
0x46b6   :  { %7943 = vrot.lane.b32.xlu1 %v11638_v40, %s10309_s12 }
0x46ba   :  { %7941 = vrot.lane.b32.xlu1 %v11644_v63, %s10309_s12 }
0x46be   :  { %7939 = vrot.lane.b32.xlu1 %v11624_v56, %s10309_s12 }
0x472a   :  { %v7833_v48 = vpop.xlane.xlu1 %7832 }
0x472b   :  { %v7835_v24 = vsub.f32 %v7827_v32, %v7833_v48 }
0x472c   :  { %v7830_v25 = vpop.xlane.xlu0 %7829 }
0x472d   :  { %v7838_v30 = vmul.f32 1.442695, %v7835_v24  ;;  %v7834_v35 = vsub.f32 %v7826_v18, %v7830_v25 }
0x472e   :  { %v7853_v34 = vpop.permute.xlu1 %7852 }
0x472f   :  { %10229 = vpow2.f32 %v7838_v30  ;;  %v7836_v26 = vmul.f32 1.442695, %v7834_v35  ;;  %9942 = vmatprep.subr.mxu1 %v7853_v34 }
0x4730   :  { %9943 = vmatpush3.msra.mxu1 %v7853_v34 }
0x4731   :  { %10231 = vpow2.f32 %v7836_v26 }
0x4732   :  { %v7944_v62 = vpop.permute.xlu1 %7943 }
0x473c   :  { %v10230_v19 = vpop.eup %10229 }
0x473d   :  { %v7843_v40 = vsel %vm420_vm2, %v10230_v19, 0.0 }
0x473e   :  { %v10232_v46 = vpop.eup %10231  ;;  %7844 = vadd.xlane.f32.xlu0 %v7843_v40 }
0x473f   :  { %v7840_v63 = vsel %vm420_vm2, %v10232_v46, 0.0 }
0x4742   :  { %7841 = vadd.xlane.f32.xlu0 %v7840_v63 }
0x4758   :  { %7850 = vrot.lane.b32.xlu0 %v11631_v38, %s10308_s11 }
0x475c   :  { %7937 = vrot.lane.b32.xlu0 %v11629_v2, %s10309_s12  ;;  %v7942_v2 = vpop.permute.xlu1 %7941 }
0x4760   :  { %v7940_v31 = vpop.permute.xlu1 %7939 }
0x47c7   :  { %v7845_v56 = vpop.xlane.xlu0 %7844 }
0x47c8   :  { %10233 = vrcp.f32 %v7845_v56 }
0x47cb   :  { %v7842_v3 = vpop.xlane.xlu0 %7841 }
0x47cc   :  { %10235 = vrcp.f32 %v7842_v3 }
0x47cf   :  { %v7851_v8 = vpop.permute.xlu0 %7850 }
0x47d0   :  { %9944 = vmatprep.subr.mxu1 %v7851_v8 }
0x47d1   :  { %9945 = vmatpush3.msra.mxu1 %v7851_v8 }
0x47d2   :  { %9949 = vmatprep.subr.msk.mxu1 %vm328_vm1, %v7944_v62 }
0x47d3   :  { %v7938_v22 = vpop.permute.xlu0 %7937 }
0x47d5   :  { %v10234_v41 = vpop.eup %10233 }
0x47d6   :  { %v7849_v17 = vmul.f32 %v10234_v41, %v10230_v19 }
0x47d9   :  { %v10236_v42 = vpop.eup %10235 }
0x47da   :  { %v7847_v39 = vmul.f32 %v10236_v42, %v10232_v46 }
0x47dc   :  { %9946 = vmatprep.mubr.msk.f32.mxu1 %vm420_vm2, %v7847_v39 }
0x47dd   :  { %9947 = vmatmul.mubr.msk.f32.vlgmr.msra.gmra.mxu1 %vm420_vm2, %v7849_v17 }
0x47de   :  { %9950 = vmatpush3.xpose.msk.msra.mxu1 %vm328_vm1, %v7944_v62  ;;  %9953 = vmatprep.mubr.msk.f32.mxu1 %vm328_vm1, %v7938_v22 }
0x47df   :  { %9951 = vmatprep.subr.msk.mxu1 %vm328_vm1, %v7942_v2 }
0x47e2   :  { %9952 = vmatpush3.xpose.msk.msra.mxu1 %vm328_vm1, %v7942_v2 }
0x47e5   :  { %9954 = vmatmul.mubr.msk.f32.vlgmr.msra.gmra.mxu1 %vm328_vm1, %v7940_v31  ;;  %v7091_v31 = vld [vmem:[#allocation4 + $0xb0] sm:$0xff] }
0x489d   :  { %v9948_v28 = vpop.f32.mrf.mxu1 }
0x489f   :  { %v7928_v43 = vpop.f32.mrf.mxu1 }
0x48a5   :  { %v9955_v21 = vpop.f32.mrf.mxu1 }
0x48a6   :  { %v8029_v36 = vmul.f32 0.35355338, %v9955_v21  ;;  %v8755_v21 = vld [vmem:[%s11818_s8 + $0x178] sm:$0xff] }
0x48a7   :  { %v8019_v54 = vpop.f32.mrf.mxu1 }
0x48a8   :  { %v8031_v23 = vadd.f32 %v11497_v50, %v8029_v36  ;;  %v8028_v13 = vmul.f32 0.35355338, %v8019_v54  ;;  %v8754_v36 = vld [vmem:[%s11818_s8 + $0x170] sm:$0xff]  ;;  %v8753_v54 = vld [vmem:[%s11818_s8 + $0x168] sm:$0xff] }
0x48aa   :  { %v8030_v49 = vadd.f32 %v11503_v45, %v8028_v13  ;;  %v8035_v20 = vsel %vm420_vm2, %v8031_v23, -inf  ;;  %v8751_v13 = vld [vmem:[%s11818_s8 + $0x158] sm:$0xff] }
0x48ab   :  { %8036 = vmax.xlane.f32.xlu1 %v8035_v20 }
0x48ac   :  { %v8032_v44 = vsel %vm420_vm2, %v8030_v49, -inf }
0x48ad   :  { %8033 = vmax.xlane.f32.xlu0 %v8032_v44 }
0x48bc   :  { %8056 = vrot.lane.b32.xlu1 %v11626_v57, %s10309_s12 }
0x48c0   :  { %8143 = vrot.lane.b32.xlu1 %v11706_v6, %s10305_s13  ;;  %v7087_v6 = vld [vmem:[#allocation2 + $0xb8] sm:$0xff] }
0x48c4   :  { %8145 = vrot.lane.b32.xlu1 %v11704_v4, %s10305_s13 }
0x48c8   :  { %8153 = vrot.lane.b32.xlu1 %v9948_v28, %s10310_s14  ;;  %v7090_v28 = vld [vmem:[#allocation4 + $0xa8] sm:$0xff] }
0x4934   :  { %v8037_v50 = vpop.xlane.xlu1 %8036 }
0x4935   :  { %v8039_v0 = vsub.f32 %v8031_v23, %v8037_v50  ;;  %v8752_v23 = vld [vmem:[%s11818_s8 + $0x160] sm:$0xff] }
0x4936   :  { %v8034_v45 = vpop.xlane.xlu0 %8033 }
0x4937   :  { %v8042_v60 = vmul.f32 1.442695, %v8039_v0  ;;  %v8038_v59 = vsub.f32 %v8030_v49, %v8034_v45 }
0x4938   :  { %v8057_v47 = vpop.permute.xlu1 %8056 }
0x4939   :  { %10237 = vpow2.f32 %v8042_v60  ;;  %v8040_v14 = vmul.f32 1.442695, %v8038_v59  ;;  %9956 = vmatprep.subr.mxu0 %v8057_v47 }
0x493a   :  { %9957 = vmatpush3.msra.mxu0 %v8057_v47 }
0x493b   :  { %10239 = vpow2.f32 %v8040_v14 }
0x493c   :  { %v8144_v12 = vpop.permute.xlu1 %8143 }
0x493d   :  { %v8165_v48 = vsel %vm328_vm1, %v11702_v61, %v8144_v12 }
0x4940   :  { %v8146_v18 = vpop.permute.xlu1 %8145 }
0x4941   :  { %v8166_v25 = vsel %vm328_vm1, %v11700_v5, %v8146_v18 }
0x4944   :  { %v8154_v29 = vpop.permute.xlu1 %8153 }
0x4945   :  { %v8168_v34 = vsel %vm420_vm2, %v8166_v25, %v8154_v29 }
0x4946   :  { %v10238_v57 = vpop.eup %10237 }
0x4947   :  { %v8047_v51 = vsel %vm420_vm2, %v10238_v57, 0.0 }
0x4948   :  { %v10240_v1 = vpop.eup %10239  ;;  %8048 = vadd.xlane.f32.xlu0 %v8047_v51  ;;  %v8749_v51 = vld [vmem:[%s11818_s8 + $0x148] sm:$0xff] }
0x4949   :  { %v8044_v11 = vsel %vm420_vm2, %v10240_v1, 0.0 }
0x494c   :  { %8045 = vadd.xlane.f32.xlu0 %v8044_v11 }
0x4962   :  { %8054 = vrot.lane.b32.xlu0 %v11631_v38, %s10309_s12  ;;  %v7085_v38 = vld [vmem:[#allocation2 + $0xa8] sm:$0xff] }
0x4966   :  { %8151 = vrot.lane.b32.xlu0 %v7928_v43, %s10310_s14  ;;  %v7089_v43 = vld [vmem:[#allocation4 + $0xa0] sm:$0xff] }
0x49d1   :  { %v8049_v10 = vpop.xlane.xlu0 %8048 }
0x49d2   :  { %10241 = vrcp.f32 %v8049_v10 }
0x49d5   :  { %v8046_v55 = vpop.xlane.xlu0 %8045 }
0x49d6   :  { %10243 = vrcp.f32 %v8046_v55 }
0x49d9   :  { %v8055_v7 = vpop.permute.xlu0 %8054 }
0x49da   :  { %9958 = vmatprep.subr.mxu0 %v8055_v7 }
0x49db   :  { %9959 = vmatpush3.msra.mxu0 %v8055_v7 }
0x49dc   :  { %9963 = vmatprep.subr.mxu0 %v7087_v6 }
0x49dd   :  { %v8152_v53 = vpop.permute.xlu0 %8151 }
0x49de   :  { %v8167_v30 = vsel %vm420_vm2, %v8165_v48, %v8152_v53 }
0x49df   :  { %v10242_v58 = vpop.eup %10241 }
0x49e0   :  { %v8053_v4 = vmul.f32 %v10242_v58, %v10238_v57  ;;  %v8750_v57 = vld [vmem:[%s11818_s8 + $0x150] sm:$0xff] }
0x49e3   :  { %v10244_v15 = vpop.eup %10243 }
0x49e4   :  { %v8051_v9 = vmul.f32 %v10244_v15, %v10240_v1  ;;  %v8748_v1 = vld [vmem:[%s11818_s8 + $0x140] sm:$0xff] }
0x49e6   :  { %9960 = vmatprep.mubr.msk.f32.mxu0 %vm420_vm2, %v8051_v9 }
0x49e7   :  { %9961 = vmatmul.mubr.msk.f32.vlgmr.msra.gmra.mxu0 %vm420_vm2, %v8053_v4 }
0x49e8   :  { %9964 = vmatpush3.msra.mxu0 %v7087_v6 }
0x49e9   :  { %9965 = vmatprep.subr.mxu0 %v7086_v37 }
0x49ea   :  { %9966 = vmatpush3.msra.mxu0 %v7086_v37 }
0x49eb   :  { %9967 = vmatprep.subr.mxu0 %v7085_v38 }
0x49ec   :  { %9968 = vmatpush3.msra.mxu0 %v7085_v38 }
0x49ed   :  { %9969 = vmatprep.subr.mxu0 %v7084_v16 }
0x49ee   :  { %9970 = vmatpush3.msra.mxu0 %v7084_v16 }
0x49ef   :  { %9985 = vmatprep.subr.mxu0 %v8755_v21 }
0x4aa7   :  { %v9962_v33 = vpop.f32.mrf.mxu0 }
0x4aa8   :  { %8161 = vrot.lane.b32.xlu1 %v9962_v33, %s10311_s0 }
0x4aa9   :  { %v8132_v32 = vpop.f32.mrf.mxu0 }
0x4aaa   :  { %8159 = vrot.lane.b32.xlu0 %v8132_v32, %s10311_s0 }
0x4b1a   :  { %v8162_v24 = vpop.permute.xlu1 %8161 }
0x4b1b   :  { %v8170_v19 = vsel %vm1166_vm3, %v8168_v34, %v8162_v24 }
0x4b1c   :  { %v8160_v35 = vpop.permute.xlu0 %8159 }
0x4b1d   :  { %v8169_v26 = vsel %vm1166_vm3, %v8167_v30, %v8160_v35 }
0x4b1e   :  { %9971 = vmatprep.mubr.msk.f32.mxu0 %vm96_vm0, %v8169_v26 }
0x4b1f   :  { %9972 = vmatmul.mubr.msk.f32.vlgmr.msra.gmra.mxu0 %vm96_vm0, %v8170_v19 }
0x4b20   :  { %9986 = vmatpush3.msra.mxu0 %v8755_v21 }
0x4b21   :  { %9987 = vmatprep.subr.mxu0 %v8754_v36 }
0x4b22   :  { %9988 = vmatpush3.msra.mxu0 %v8754_v36 }
0x4b23   :  { %9989 = vmatprep.subr.mxu0 %v8753_v54 }
0x4b24   :  { %9990 = vmatpush3.msra.mxu0 %v8753_v54 }
0x4b25   :  { %9991 = vmatprep.subr.mxu0 %v8752_v23 }
0x4b26   :  { %9992 = vmatpush3.msra.mxu0 %v8752_v23 }
0x4b27   :  { %9993 = vmatprep.subr.mxu0 %v8751_v13 }
0x4b28   :  { %9994 = vmatpush3.msra.mxu0 %v8751_v13 }
0x4b29   :  { %9995 = vmatprep.subr.mxu0 %v8750_v57 }
0x4b2a   :  { %9996 = vmatpush3.msra.mxu0 %v8750_v57 }
0x4b2b   :  { %9997 = vmatprep.subr.mxu0 %v8749_v51 }
0x4b2c   :  { %9998 = vmatpush3.msra.mxu0 %v8749_v51 }
0x4b2d   :  { %9999 = vmatprep.subr.mxu0 %v8748_v1 }
0x4b2e   :  { %10000 = vmatpush3.msra.mxu0 %v8748_v1 }
0x4bdf   :  { %v9973_v40 = vpop.f32.mrf.mxu0 }
0x4be0   :  { %v8249_v61 = vadd.f32 %v9973_v40, %v11601_v52 }
0x4be1   :  { %v8243_v46 = vpop.f32.mrf.mxu0 }
0x4be2   :  { %v8244_v63 = vadd.f32 %v8243_v46, %v11599_v27  ;;  %v8255_v5 = vsel %vm96_vm0, %v8249_v61, 0.0  ;;  %v7092_v27 = vld [vmem:[#allocation4 + $0xb8] sm:$0xff] }
0x4be3   :  { %8256 = vadd.xlane.f32.xlu1 %v8255_v5  ;;  %9974 = vmatprep.subr.mxu1 %v7092_v27 }
0x4be4   :  { %v8252_v56 = vsel %vm96_vm0, %v8244_v63, 0.0  ;;  %9975 = vmatpush3.msra.mxu1 %v7092_v27 }
0x4be5   :  { %8253 = vadd.xlane.f32.xlu0 %v8252_v56  ;;  %9976 = vmatprep.subr.mxu1 %v7091_v31 }
0x4be6   :  { %9977 = vmatpush3.msra.mxu1 %v7091_v31 }
0x4be7   :  { %9978 = vmatprep.subr.mxu1 %v7090_v28 }
0x4be8   :  { %9979 = vmatpush3.msra.mxu1 %v7090_v28 }
0x4be9   :  { %9980 = vmatprep.subr.mxu1 %v7089_v43 }
0x4bea   :  { %9981 = vmatpush3.msra.mxu1 %v7089_v43 }
0x4c6c   :  { %v8257_v3 = vpop.xlane.xlu1 %8256 }
0x4c6d   :  { %v8259_v8 = vmul.f32 0.03125, %v8257_v3 }
0x4c6e   :  { %v8254_v62 = vpop.xlane.xlu0 %8253 }
0x4c6f   :  { %v8258_v41 = vmul.f32 0.03125, %v8254_v62  ;;  %v8261_v42 = vsub.f32 %v8249_v61, %v8259_v8 }
0x4c71   :  { %v8260_v39 = vsub.f32 %v8244_v63, %v8258_v41  ;;  %v8263_v2 = vmul.f32 %v8261_v42, %v8261_v42 }
0x4c73   :  { %v8262_v17 = vmul.f32 %v8260_v39, %v8260_v39  ;;  %v8267_v52 = vsel %vm96_vm0, %v8263_v2, 0.0 }
0x4c75   :  { %v8264_v22 = vsel %vm96_vm0, %v8262_v17, 0.0 }
0x4c76   :  { %8265 = vadd.xlane.f32.xlu0 %v8264_v22 }
0x4c7a   :  { %8268 = vadd.xlane.f32.xlu0 %v8267_v52 }
0x4cff   :  { %v8266_v49 = vpop.xlane.xlu0 %8265 }
0x4d00   :  { %v8270_v20 = vmul.f32 0.03125, %v8266_v49 }
0x4d02   :  { %v8272_v44 = vadd.f32 1e-05, %v8270_v20 }
0x4d03   :  { %v8269_v50 = vpop.xlane.xlu0 %8268 }
0x4d04   :  { %10245 = vrsqrt.f32 %v8272_v44  ;;  %v8271_v0 = vmul.f32 0.03125, %v8269_v50 }
0x4d06   :  { %v8273_v45 = vadd.f32 1e-05, %v8271_v0 }
0x4d08   :  { %10247 = vrsqrt.f32 %v8273_v45 }
0x4d11   :  { %v10246_v60 = vpop.eup %10245 }
0x4d12   :  { %v8276_v59 = vmul.f32 %v10246_v60, %v8260_v39 }
0x4d14   :  { %9982 = vmatprep.mubr.msk.f32.mxu1 %vm96_vm0, %v8276_v59 }
0x4d15   :  { %v10248_v47 = vpop.eup %10247 }
0x4d16   :  { %v8277_v14 = vmul.f32 %v10248_v47, %v8261_v42 }
0x4d18   :  { %9983 = vmatmul.mubr.msk.f32.vlgmr.msra.gmra.mxu1 %vm96_vm0, %v8277_v14 }
0x4dd8   :  { %v9984_v11 = vpop.f32.mrf.mxu1 }
0x4dd9   :  { %v8360_v7 = vmax.f32 %v9984_v11, 0.0 }
0x4dda   :  { %v8350_v10 = vpop.f32.mrf.mxu1 }
0x4ddb   :  { %v8359_v55 = vmax.f32 %v8350_v10, 0.0 }
0x4ddd   :  { %10001 = vmatprep.mubr.msk.f32.mxu0 %vm1360_vm4, %v8359_v55 }
0x4dde   :  { %10002 = vmatmul.mubr.msk.f32.vlgmr.msra.gmra.mxu0 %vm1360_vm4, %v8360_v7 }
0x4e9e   :  { %v10003_v58 = vpop.f32.mrf.mxu0 }
0x4e9f   :  { %v8439_v15 = vadd.f32 %v10003_v58, %v8277_v14 }
0x4ea0   :  { %v8433_v9 = vpop.f32.mrf.mxu0 }
0x4ea1   :  { %v8434_v4 = vadd.f32 %v8433_v9, %v8276_v59  ;;  %v8445_v6 = vsel %vm96_vm0, %v8439_v15, 0.0 }
0x4ea2   :  { %8446 = vadd.xlane.f32.xlu0 %v8445_v6 }
0x4ea3   :  { %v8442_v37 = vsel %vm96_vm0, %v8434_v4, 0.0 }
0x4ea4   :  { %8443 = vadd.xlane.f32.xlu1 %v8442_v37 }
0x4f2b   :  { %v8447_v38 = vpop.xlane.xlu0 %8446 }
0x4f2c   :  { %v8449_v16 = vmul.f32 0.03125, %v8447_v38 }
0x4f2d   :  { %v8444_v33 = vpop.xlane.xlu1 %8443 }
0x4f2e   :  { %v8451_v32 = vsub.f32 %v8439_v15, %v8449_v16  ;;  %v8448_v12 = vmul.f32 0.03125, %v8444_v33 }
0x4f30   :  { %v8450_v18 = vsub.f32 %v8434_v4, %v8448_v12  ;;  %v8453_v29 = vmul.f32 %v8451_v32, %v8451_v32 }
0x4f32   :  { %v8457_v53 = vsel %vm96_vm0, %v8453_v29, 0.0  ;;  %v8452_v48 = vmul.f32 %v8450_v18, %v8450_v18 }
0x4f33   :  { %8458 = vadd.xlane.f32.xlu0 %v8457_v53 }
0x4f34   :  { %v8454_v24 = vsel %vm96_vm0, %v8452_v48, 0.0 }
0x4f35   :  { %8455 = vadd.xlane.f32.xlu1 %v8454_v24 }
0x4fbc   :  { %v8459_v25 = vpop.xlane.xlu0 %8458 }
0x4fbd   :  { %v8461_v30 = vmul.f32 0.03125, %v8459_v25 }
0x4fbe   :  { %v8456_v35 = vpop.xlane.xlu1 %8455 }
0x4fbf   :  { %v8463_v34 = vadd.f32 1e-05, %v8461_v30  ;;  %v8460_v26 = vmul.f32 0.03125, %v8456_v35 }
0x4fc1   :  { %10249 = vrsqrt.f32 %v8463_v34  ;;  %v8462_v19 = vadd.f32 1e-05, %v8460_v26 }
0x4fc3   :  { %10251 = vrsqrt.f32 %v8462_v19 }
0x4fce   :  { %v10250_v40 = vpop.eup %10249 }
0x4fcf   :  { %v8467_v61 = vmul.f32 %v10250_v40, %v8451_v32 }
0x4fd0   :  { %v10252_v46 = vpop.eup %10251 }
0x4fd1   :  { %8469 = vst.msk [vmem:[%s11819_s9 + $0x8] sm:$0xff] %vm96_vm0, %v8467_v61  ;;  %v8466_v63 = vmul.f32 %v10252_v46, %v8450_v18 }
0x4fd3   :  { %8468 = vst.msk [vmem:[%s11819_s9] sm:$0xff] %vm96_vm0, %v8466_v63 }
0x4fd4   :  { %8474 = vsyncpa [#allocation3], 1 }
0x4fd5   :  { %8475 = vsyncpa [#allocation5], 1 }

</bundles_post_ra>
